<compile_context>
chip_gen: v6e
topology: v6e:2x2x1
jax: 0.10.0
libtpu: 0.0.40
codegen_flags: <defaults>
</compile_context>

<pallas_src>
import functools

import numpy as np

import jax
import jax.numpy as jnp
from jax import lax
from jax.experimental import pallas as pl
from jax.experimental.pallas import tpu as pltpu

C1P = 16      # conv1 out channels 10 -> 16
C2P = 32      # conv2 out channels 20 -> 32
F1P = 64      # fc1 out features   50 -> 64
NCLS_P = 128  # fc2 classes        10 -> 128 (lane-dense logits slab)
K1 = 6 * 28   # conv1 row-band contraction dim (6 image rows x 28 cols)
K2 = 6 * 12 * C1P  # conv2 row-band contraction dim (6 a1 rows x 12 cols x 16 ch)

# Batch rows per grid step.  ~8 MiB of VMEM at B=64 (fits every generation's
# scoped default); keep <= 128 on v7x (64 MiB physical VMEM).  Large batches
# give ceil(N/B) >= 2 grid steps so dimension_semantics=("parallel",) can
# split the batch across v7x's two TensorCores.
_BLOCK_B = 64


def _round_up(x, m):
    return (x + m - 1) // m * m


# ----------------------------- Pallas kernels -------------------------------

def _conv_block(B, p1_ref, w1_ref, b1_ref, w2_ref, b2_ref, a1_ref, p2_ref):
    """conv1 + pool + relu, conv2 + pool + relu.  Returns a2 (4*B, 128) f32.

    a1_ref: (12, B, 192) f32 (scratch or output block), rows = (row parity,
            row//2), lanes = pooled_col*16 + channel.
    p2_ref: (4*B, 1152) bf16 scratch, rows = (pooled_row, sample),
            lanes = (band row u, a1 col, channel).
    """
    f32, bf16 = jnp.float32, jnp.bfloat16

    # ---- conv1 (5x5, Cin=1) + 2x2 max-pool + ReLU --------------------------
    lhs1 = p1_ref[...].reshape(12 * B, K1)                       # (12B, 168) bf16
    acc = jnp.dot(lhs1, w1_ref[0], preferred_element_type=f32)   # (12B, 192)
    for ab in range(1, 4):
        acc = jnp.maximum(acc, jnp.dot(lhs1, w1_ref[ab],
                                       preferred_element_type=f32))
    a1 = jnp.maximum(acc + b1_ref[...], 0.0)
    a1_ref[...] = a1.reshape(12, B, 12 * C1P)

    # ---- conv2 im2col: 24 sublane-aligned, 192-lane-wide copies ------------
    # P2[(p2h, n), u*192 + pw*16 + ci] = a1[n, 2*p2h + u, pw, ci]
    for u in range(6):
        base = (u % 2) * 6 + u // 2          # a1 row 2*p2h+u lives at base+p2h
        for ph in range(4):
            p2_ref[ph * B:(ph + 1) * B, u * 192:(u + 1) * 192] = (
                a1_ref[base + ph].astype(bf16))

    # ---- conv2 (5x5, Cin=10) + 2x2 max-pool + ReLU --------------------------
    # TODO(synk): Dropout2d before the pool is identity (inference mode).
    lhs2 = p2_ref[...]                                           # (4B, 1152) bf16
    acc = jnp.dot(lhs2, w2_ref[0], preferred_element_type=f32)   # (4B, 128)
    for ab in range(1, 4):
        acc = jnp.maximum(acc, jnp.dot(lhs2, w2_ref[ab],
                                       preferred_element_type=f32))
    return jnp.maximum(acc + b2_ref[...], 0.0)                   # (4B, 128) f32


def _kernel_test(B, p1_ref, w1_ref, b1_ref, w2_ref, b2_ref,
                 wfc1_ref, bfc1_ref, wfc2_ref, bfc2_ref,
                 logp_ref, a1_ref, p2_ref):
    """Full is_test=True path: convs stay in VMEM, only log-probs hit HBM."""
    f32, bf16 = jnp.float32, jnp.bfloat16
    a2 = _conv_block(B, p1_ref, w1_ref, b1_ref, w2_ref, b2_ref, a1_ref, p2_ref)

    # ---- fc1 + ReLU (torch NCHW x.view(-1, 320) folded into weight layout) --
    # K = 512 split into 4 accumulated K=128 matmuls (one per pooled-row block).
    # TODO(synk): F.dropout after fc1 is identity (inference mode).
    h = jnp.dot(a2[0:B].astype(bf16), wfc1_ref[0], preferred_element_type=f32)
    for ph in range(1, 4):
        h = h + jnp.dot(a2[ph * B:(ph + 1) * B].astype(bf16), wfc1_ref[ph],
                        preferred_element_type=f32)
    h = jnp.maximum(h + bfc1_ref[...], 0.0)                      # (B, 64)

    # ---- fc2 + fused log_softmax (padded class lanes carry bias = -1e30) ----
    logits = jnp.dot(h.astype(bf16), wfc2_ref[...],
                     preferred_element_type=f32) + bfc2_ref[...]  # (B, 128)
    mx = jnp.max(logits, axis=-1, keepdims=True)
    s = logits - mx
    lse = jnp.log(jnp.sum(jnp.exp(s), axis=-1, keepdims=True))
    logp_ref[...] = s - lse


def _kernel_convs(B, p1_ref, w1_ref, b1_ref, w2_ref, b2_ref,
                  a1_ref, a2_ref, p2_ref):
    """is_test=False path: only conv1/conv2 activations (lane-dense) are output."""
    a2 = _conv_block(B, p1_ref, w1_ref, b1_ref, w2_ref, b2_ref, a1_ref, p2_ref)
    a2_ref[...] = a2.reshape(4, B, 4 * C2P)


# ------------------------------ pallas_call wrappers ------------------------

def _common_compiler_params():
    return pltpu.CompilerParams(
        dimension_semantics=("parallel",),
        vmem_limit_bytes=32 * 1024 * 1024,
    )


def _forward_test(p1, w1, b1, w2, b2, wfc1, bfc1, wfc2, bfc2, block_b):
    n_pad = p1.shape[2]
    B = block_b
    grid_spec = pltpu.PrefetchScalarGridSpec(
        num_scalar_prefetch=0,
        grid=(n_pad // B,),
        in_specs=[
            pl.BlockSpec((2, 6, B, K1), lambda i: (0, 0, i, 0)),
            pl.BlockSpec((4, K1, 12 * C1P), lambda i: (0, 0, 0)),
            pl.BlockSpec((1, 12 * C1P), lambda i: (0, 0)),
            pl.BlockSpec((4, K2, 4 * C2P), lambda i: (0, 0, 0)),
            pl.BlockSpec((1, 4 * C2P), lambda i: (0, 0)),
            pl.BlockSpec((4, 4 * C2P, F1P), lambda i: (0, 0, 0)),
            pl.BlockSpec((1, F1P), lambda i: (0, 0)),
            pl.BlockSpec((F1P, NCLS_P), lambda i: (0, 0)),
            pl.BlockSpec((1, NCLS_P), lambda i: (0, 0)),
        ],
        out_specs=pl.BlockSpec((B, NCLS_P), lambda i: (i, 0)),
        scratch_shapes=[
            pltpu.VMEM((12, B, 12 * C1P), jnp.float32),   # a1 (conv1 act)
            pltpu.VMEM((4 * B, K2), jnp.bfloat16),        # conv2 im2col
        ],
    )
    return pl.pallas_call(
        functools.partial(_kernel_test, B),
        out_shape=jax.ShapeDtypeStruct((n_pad, NCLS_P), jnp.float32),
        grid_spec=grid_spec,
        compiler_params=_common_compiler_params(),
    )(p1, w1, b1, w2, b2, wfc1, bfc1, wfc2, bfc2)


def _forward_convs(p1, w1, b1, w2, b2, block_b):
    n_pad = p1.shape[2]
    B = block_b
    grid_spec = pltpu.PrefetchScalarGridSpec(
        num_scalar_prefetch=0,
        grid=(n_pad // B,),
        in_specs=[
            pl.BlockSpec((2, 6, B, K1), lambda i: (0, 0, i, 0)),
            pl.BlockSpec((4, K1, 12 * C1P), lambda i: (0, 0, 0)),
            pl.BlockSpec((1, 12 * C1P), lambda i: (0, 0)),
            pl.BlockSpec((4, K2, 4 * C2P), lambda i: (0, 0, 0)),
            pl.BlockSpec((1, 4 * C2P), lambda i: (0, 0)),
        ],
        out_specs=[
            pl.BlockSpec((12, B, 12 * C1P), lambda i: (0, i, 0)),
            pl.BlockSpec((4, B, 4 * C2P), lambda i: (0, i, 0)),
        ],
        scratch_shapes=[pltpu.VMEM((4 * B, K2), jnp.bfloat16)],
    )
    return pl.pallas_call(
        functools.partial(_kernel_convs, B),
        out_shape=(
            jax.ShapeDtypeStruct((12, n_pad, 12 * C1P), jnp.float32),
            jax.ShapeDtypeStruct((4, n_pad, 4 * C2P), jnp.float32),
        ),
        grid_spec=grid_spec,
        compiler_params=_common_compiler_params(),
    )(p1, w1, b1, w2, b2)


# ------------------------------ host-side prep ------------------------------

def _prep_inputs(x_nchw, n_pad):
    """Build conv1 row-band patches: P1[pu, r, n, s*28 + x] = img[n, 4r+2pu+s, x].

    Rows are ordered (row parity pu, r) so the conv1 matmul output is already
    parity-split for the 2x2 pools.  ~2.6x the raw image size in bf16 (vs. 24x
    for a full im2col), and the last dim (168) stays the full-array dim.
    """
    n = x_nchw.shape[0]
    xs = x_nchw[:, 0]                                    # (N, 28, 28)
    if n_pad > n:
        xs = jnp.pad(xs, ((0, n_pad - n), (0, 0), (0, 0)))
    pu = np.arange(2)
    r = np.arange(6)
    s = np.arange(6)
    rows = (4 * r[None, :, None] + 2 * pu[:, None, None] + s[None, None, :])
    p1 = xs[:, rows, :]                                  # (N, 2, 6, 6, 28)
    p1 = jnp.transpose(p1, (1, 2, 0, 3, 4)).reshape(2, 6, n_pad, K1)
    return p1.astype(jnp.bfloat16)


def _prep_weights(params):
    f32, bf16 = jnp.float32, jnp.bfloat16

    # conv1 row-band weight: one (168, 192) matrix per pool-window (a, b);
    # rows = (band row s, image col x), cols = (pooled col pw, channel ci).
    w1t = jnp.transpose(params['conv1_w'][:, 0], (1, 2, 0))       # (5,5,10)
    w1t = jnp.pad(w1t, ((0, 0), (0, 0), (0, C1P - 10)))           # (5,5,16)
    w1big = jnp.zeros((2, 2, 6, 28, 12, C1P), f32)
    for a in range(2):
        for b in range(2):
            for pw in range(12):
                w1big = w1big.at[a, b, a:a + 5,
                                 2 * pw + b:2 * pw + b + 5, pw, :].set(w1t)
    w1big = w1big.reshape(4, K1, 12 * C1P).astype(bf16)
    b1c = jnp.tile(jnp.pad(params['conv1_b'], (0, C1P - 10)), 12).reshape(1, 12 * C1P)

    # conv2 row-band weight: one (1152, 128) matrix per pool-window (a2, b2);
    # rows = (band row u, a1 col w, ci), cols = (pooled col p2w, co).
    w2t = jnp.transpose(params['conv2_w'], (2, 3, 1, 0))          # (5,5,10,20)
    w2t = jnp.pad(w2t, ((0, 0), (0, 0), (0, C1P - 10), (0, C2P - 20)))
    w2big = jnp.zeros((2, 2, 6, 12, C1P, 4, C2P), f32)
    for a2 in range(2):
        for b2 in range(2):
            for pw in range(4):
                w2big = w2big.at[a2, b2, a2:a2 + 5,
                                 2 * pw + b2:2 * pw + b2 + 5, :, pw, :].set(w2t)
    w2big = w2big.reshape(4, K2, 4 * C2P).astype(bf16)
    b2c = jnp.tile(jnp.pad(params['conv2_b'], (0, C2P - 20)), 4).reshape(1, 4 * C2P)

    # fc1: fold torch's x.view(-1, 320) (NCHW: co*16 + p2h*4 + p2w) into the
    # weight; one (128, 64) slab per pooled row p2h.
    wf = params['fc1_w'].reshape(50, 20, 4, 4)                    # (f, co, p2h, p2w)
    wf = jnp.transpose(wf, (2, 3, 1, 0))                          # (p2h, p2w, co, f)
    wf = jnp.pad(wf, ((0, 0), (0, 0), (0, C2P - 20), (0, F1P - 50)))
    wfc1 = wf.reshape(4, 4 * C2P, F1P).astype(bf16)
    bfc1 = jnp.pad(params['fc1_b'], (0, F1P - 50)).reshape(1, F1P)

    # fc2: classes padded to a lane-dense 128; padded-class bias = -1e30 so the
    # fused log_softmax gives them zero mass (host slices to 10 classes).
    wfc2 = jnp.pad(params['fc2_w'].T,
                   ((0, F1P - 50), (0, NCLS_P - 10))).astype(bf16)
    bfc2 = jnp.concatenate(
        [params['fc2_b'], jnp.full((NCLS_P - 10,), -1e30, f32)]).reshape(1, NCLS_P)
    return w1big, b1c, w2big, b2c, wfc1, bfc1, wfc2, bfc2


@functools.partial(jax.jit, static_argnames=("is_test",))
def demo_net_forward(params, x_nchw, is_test=True):
    """Reproduces DemoNet.forward (teacher / no-CM path, eval mode)."""
    n = x_nchw.shape[0]
    block_b = min(_BLOCK_B, _round_up(n, 16))
    n_pad = _round_up(n, block_b)
    p1 = _prep_inputs(x_nchw.astype(jnp.float32), n_pad)
    w1, b1, w2, b2, wfc1, bfc1, wfc2, bfc2 = _prep_weights(params)

    if is_test:
        logp = _forward_test(p1, w1, b1, w2, b2, wfc1, bfc1, wfc2, bfc2, block_b)
        return logp[:n, :10]

    a1, a2 = _forward_convs(p1, w1, b1, w2, b2, block_b)
    # (12, N, 192) [rows = (pu, r), lanes = pw*16+ci] -> NCHW (N, 10, 12, 12)
    conv1 = (a1[:, :n].reshape(2, 6, n, 12, C1P)
             .transpose(2, 4, 1, 0, 3).reshape(n, C1P, 12, 12)[:, :10])
    # (4, N, 128) [rows = p2h, lanes = p2w*32+co] -> NCHW (N, 20, 4, 4)
    conv2 = a2[:, :n].reshape(4, n, 4, C2P).transpose(1, 3, 0, 2)[:, :20]
    return {'conv1': conv1, 'conv2': conv2}


# ----------------------------- reference / params ---------------------------

def _reference_forward(params, x, is_test=True):
    """Pure-JAX (f32) reference of DemoNet.forward in eval mode."""
    def conv(x, w, b):
        y = lax.conv_general_dilated(x, w, (1, 1), 'VALID',
                                     dimension_numbers=('NCHW', 'OIHW', 'NCHW'))
        return y + b[None, :, None, None]

    def maxpool2(x):
        return lax.reduce_window(x, -jnp.inf, lax.max,
                                 (1, 1, 2, 2), (1, 1, 2, 2), 'VALID')

    a1 = jax.nn.relu(maxpool2(conv(x, params['conv1_w'], params['conv1_b'])))
    a2 = jax.nn.relu(maxpool2(conv(a1, params['conv2_w'], params['conv2_b'])))
    if not is_test:
        return {'conv1': a1, 'conv2': a2}
    h = a2.reshape(a2.shape[0], -1)
    h = jax.nn.relu(h @ params['fc1_w'].T + params['fc1_b'])
    logits = h @ params['fc2_w'].T + params['fc2_b']
    return jax.nn.log_softmax(logits, axis=-1)


def init_params(key):
    """Deterministic PyTorch-default-style uniform(-1/sqrt(fan_in), ...)."""
    ks = jax.random.split(key, 8)

    def u(k, shape, fan_in):
        bound = 1.0 / jnp.sqrt(jnp.float32(fan_in))
        return jax.random.uniform(k, shape, jnp.float32, -bound, bound)

    return {
        'conv1_w': u(ks[0], (10, 1, 5, 5), 1 * 5 * 5),
        'conv1_b': u(ks[1], (10,), 1 * 5 * 5),
        'conv2_w': u(ks[2], (20, 10, 5, 5), 10 * 5 * 5),
        'conv2_b': u(ks[3], (20,), 10 * 5 * 5),
        'fc1_w':   u(ks[4], (50, 320), 320),
        'fc1_b':   u(ks[5], (50,), 320),
        'fc2_w':   u(ks[6], (10, 50), 50),
        'fc2_b':   u(ks[7], (10,), 50),
    }


if __name__ == "__main__":
    key = jax.random.PRNGKey(0)
    kx, kp = jax.random.split(key)
    # Input must be 28x28 so that x.view(-1, 320) matches (20 * 4 * 4 = 320).
    x = jax.random.normal(kx, (2, 1, 28, 28), jnp.float32)
    params = init_params(kp)

    logp = demo_net_forward(params, x, is_test=True)           # torch: log_softmax
    conv_out = demo_net_forward(params, x, is_test=False)      # torch: conv dict
    jax.block_until_ready((logp, conv_out))

    assert logp.shape == (2, 10)
    assert conv_out['conv1'].shape == (2, 10, 12, 12)
    assert conv_out['conv2'].shape == (2, 20, 4, 4)

    # Correctness vs. a pure-JAX f32 reference (bf16 MXU operands => loose tol).
    ref_logp = _reference_forward(params, x, is_test=True)
    ref_conv = _reference_forward(params, x, is_test=False)
    np.testing.assert_allclose(np.asarray(logp), np.asarray(ref_logp),
                               rtol=2e-2, atol=2e-2)
    np.testing.assert_allclose(np.asarray(conv_out['conv1']),
                               np.asarray(ref_conv['conv1']), rtol=2e-2, atol=2e-2)
    np.testing.assert_allclose(np.asarray(conv_out['conv2']),
                               np.asarray(ref_conv['conv2']), rtol=2e-2, atol=2e-2)
    print("KERNEL_OK")
</pallas_src>

<mosaic_0001>
module attributes {stable_mosaic.version = 11 : i64} {
  func.func @_kernel_test(%arg0: i32, %arg1: memref<2x6x16x168xbf16, #tpu.memory_space<vmem>>, %arg2: memref<4x168x192xbf16, #tpu.memory_space<vmem>>, %arg3: memref<1x192xf32, #tpu.memory_space<vmem>>, %arg4: memref<4x1152x128xbf16, #tpu.memory_space<vmem>>, %arg5: memref<1x128xf32, #tpu.memory_space<vmem>>, %arg6: memref<4x128x64xbf16, #tpu.memory_space<vmem>>, %arg7: memref<1x64xf32, #tpu.memory_space<vmem>>, %arg8: memref<64x128xbf16, #tpu.memory_space<vmem>>, %arg9: memref<1x128xf32, #tpu.memory_space<vmem>>, %arg10: memref<16x128xf32, #tpu.memory_space<vmem>>, %arg11: memref<12x16x192xf32, #tpu.memory_space<vmem>>, %arg12: memref<64x1152xbf16, #tpu.memory_space<vmem>>) attributes {dimension_semantics = [#tpu.dimension_semantics<parallel>], iteration_bounds = array<i64: 1>, scalar_prefetch = 0 : i64, scratch_operands = 2 : i64, tpu.core_type = #tpu.core_type<tc>, window_params = [{transform_indices = @transform_0, window_bounds = array<i64: 2, 6, 16, 168>}, {pipeline_mode = #tpu.pipeline_mode<synchronous>, transform_indices = @transform_1, window_bounds = array<i64: 4, 168, 192>}, {pipeline_mode = #tpu.pipeline_mode<synchronous>, transform_indices = @transform_2, window_bounds = array<i64: 1, 192>}, {pipeline_mode = #tpu.pipeline_mode<synchronous>, transform_indices = @transform_3, window_bounds = array<i64: 4, 1152, 128>}, {pipeline_mode = #tpu.pipeline_mode<synchronous>, transform_indices = @transform_4, window_bounds = array<i64: 1, 128>}, {pipeline_mode = #tpu.pipeline_mode<synchronous>, transform_indices = @transform_5, window_bounds = array<i64: 4, 128, 64>}, {pipeline_mode = #tpu.pipeline_mode<synchronous>, transform_indices = @transform_6, window_bounds = array<i64: 1, 64>}, {pipeline_mode = #tpu.pipeline_mode<synchronous>, transform_indices = @transform_7, window_bounds = array<i64: 64, 128>}, {pipeline_mode = #tpu.pipeline_mode<synchronous>, transform_indices = @transform_8, window_bounds = array<i64: 1, 128>}, {transform_indices = @transform_9, window_bounds = array<i64: 16, 128>}]} {
    %c0 = arith.constant 0 : index
    %c0_0 = arith.constant 0 : index
    %c0_1 = arith.constant 0 : index
    %c0_2 = arith.constant 0 : index
    %0 = vector.load %arg1[%c0, %c0_0, %c0_1, %c0_2] : memref<2x6x16x168xbf16, #tpu.memory_space<vmem>>, vector<2x6x16x168xbf16>
    %1 = vector.shape_cast %0 : vector<2x6x16x168xbf16> to vector<192x168xbf16>
    %c0_3 = arith.constant 0 : index
    %c0_4 = arith.constant 0 : index
    %c0_5 = arith.constant 0 : index
    %2 = vector.load %arg2[%c0_3, %c0_4, %c0_5] : memref<4x168x192xbf16, #tpu.memory_space<vmem>>, vector<1x168x192xbf16>
    %3 = vector.shape_cast %2 : vector<1x168x192xbf16> to vector<168x192xbf16>
    %cst = arith.constant dense<0.000000e+00> : vector<192x192xf32>
    %4 = tpu.matmul %1, %3, %cst {dimension_numbers = #tpu.dot_dimension_numbers<[1], [0], [0], [1], [0, 0, 1, 1], [], []>} : vector<192x168xbf16>, vector<168x192xbf16>, vector<192x192xf32> -> vector<192x192xf32>
    %c1 = arith.constant 1 : index
    %c0_6 = arith.constant 0 : index
    %c0_7 = arith.constant 0 : index
    %5 = vector.load %arg2[%c1, %c0_6, %c0_7] : memref<4x168x192xbf16, #tpu.memory_space<vmem>>, vector<1x168x192xbf16>
    %6 = vector.shape_cast %5 : vector<1x168x192xbf16> to vector<168x192xbf16>
    %cst_8 = arith.constant dense<0.000000e+00> : vector<192x192xf32>
    %7 = tpu.matmul %1, %6, %cst_8 {dimension_numbers = #tpu.dot_dimension_numbers<[1], [0], [0], [1], [0, 0, 1, 1], [], []>} : vector<192x168xbf16>, vector<168x192xbf16>, vector<192x192xf32> -> vector<192x192xf32>
    %8 = arith.maximumf %4, %7 : vector<192x192xf32>
    %c2 = arith.constant 2 : index
    %c0_9 = arith.constant 0 : index
    %c0_10 = arith.constant 0 : index
    %9 = vector.load %arg2[%c2, %c0_9, %c0_10] : memref<4x168x192xbf16, #tpu.memory_space<vmem>>, vector<1x168x192xbf16>
    %10 = vector.shape_cast %9 : vector<1x168x192xbf16> to vector<168x192xbf16>
    %cst_11 = arith.constant dense<0.000000e+00> : vector<192x192xf32>
    %11 = tpu.matmul %1, %10, %cst_11 {dimension_numbers = #tpu.dot_dimension_numbers<[1], [0], [0], [1], [0, 0, 1, 1], [], []>} : vector<192x168xbf16>, vector<168x192xbf16>, vector<192x192xf32> -> vector<192x192xf32>
    %12 = arith.maximumf %8, %11 : vector<192x192xf32>
    %c3 = arith.constant 3 : index
    %c0_12 = arith.constant 0 : index
    %c0_13 = arith.constant 0 : index
    %13 = vector.load %arg2[%c3, %c0_12, %c0_13] : memref<4x168x192xbf16, #tpu.memory_space<vmem>>, vector<1x168x192xbf16>
    %14 = vector.shape_cast %13 : vector<1x168x192xbf16> to vector<168x192xbf16>
    %cst_14 = arith.constant dense<0.000000e+00> : vector<192x192xf32>
    %15 = tpu.matmul %1, %14, %cst_14 {dimension_numbers = #tpu.dot_dimension_numbers<[1], [0], [0], [1], [0, 0, 1, 1], [], []>} : vector<192x168xbf16>, vector<168x192xbf16>, vector<192x192xf32> -> vector<192x192xf32>
    %16 = arith.maximumf %12, %15 : vector<192x192xf32>
    %c0_15 = arith.constant 0 : index
    %c0_16 = arith.constant 0 : index
    %17 = vector.load %arg3[%c0_15, %c0_16] : memref<1x192xf32, #tpu.memory_space<vmem>>, vector<1x192xf32>
    %18 = vector.broadcast %17 : vector<1x192xf32> to vector<192x192xf32>
    %19 = arith.addf %16, %18 : vector<192x192xf32>
    %cst_17 = arith.constant 0.000000e+00 : f32
    %20 = vector.broadcast %cst_17 : f32 to vector<192x192xf32>
    %21 = arith.maximumf %19, %20 : vector<192x192xf32>
    %22 = vector.shape_cast %21 : vector<192x192xf32> to vector<12x16x192xf32>
    %c0_18 = arith.constant 0 : index
    %c0_19 = arith.constant 0 : index
    %c0_20 = arith.constant 0 : index
    %23 = vector.load %arg11[%c0_18, %c0_19, %c0_20] : memref<12x16x192xf32, #tpu.memory_space<vmem>>, vector<12x16x192xf32>
    tpu.vector_store %arg11[%c0_18, %c0_19, %c0_20], %22 {strides = array<i32>} : memref<12x16x192xf32, #tpu.memory_space<vmem>>, vector<12x16x192xf32>,
    %c0_21 = arith.constant 0 : index
    %c0_22 = arith.constant 0 : index
    %c0_23 = arith.constant 0 : index
    %24 = vector.load %arg11[%c0_21, %c0_22, %c0_23] : memref<12x16x192xf32, #tpu.memory_space<vmem>>, vector<1x16x192xf32>
    %25 = vector.shape_cast %24 : vector<1x16x192xf32> to vector<16x192xf32>
    %26 = arith.truncf %25 : vector<16x192xf32> to vector<16x192xbf16>
    %c0_24 = arith.constant 0 : index
    %c0_25 = arith.constant 0 : index
    %27 = vector.load %arg12[%c0_24, %c0_25] : memref<64x1152xbf16, #tpu.memory_space<vmem>>, vector<16x192xbf16>
    tpu.vector_store %arg12[%c0_24, %c0_25], %26 {strides = array<i32>} : memref<64x1152xbf16, #tpu.memory_space<vmem>>, vector<16x192xbf16>,
    %c1_26 = arith.constant 1 : index
    %c0_27 = arith.constant 0 : index
    %c0_28 = arith.constant 0 : index
    %28 = vector.load %arg11[%c1_26, %c0_27, %c0_28] : memref<12x16x192xf32, #tpu.memory_space<vmem>>, vector<1x16x192xf32>
    %29 = vector.shape_cast %28 : vector<1x16x192xf32> to vector<16x192xf32>
    %30 = arith.truncf %29 : vector<16x192xf32> to vector<16x192xbf16>
    %c16 = arith.constant 16 : index
    %c0_29 = arith.constant 0 : index
    %31 = vector.load %arg12[%c16, %c0_29] : memref<64x1152xbf16, #tpu.memory_space<vmem>>, vector<16x192xbf16>
    tpu.vector_store %arg12[%c16, %c0_29], %30 {strides = array<i32>} : memref<64x1152xbf16, #tpu.memory_space<vmem>>, vector<16x192xbf16>,
    %c2_30 = arith.constant 2 : index
    %c0_31 = arith.constant 0 : index
    %c0_32 = arith.constant 0 : index
    %32 = vector.load %arg11[%c2_30, %c0_31, %c0_32] : memref<12x16x192xf32, #tpu.memory_space<vmem>>, vector<1x16x192xf32>
    %33 = vector.shape_cast %32 : vector<1x16x192xf32> to vector<16x192xf32>
    %34 = arith.truncf %33 : vector<16x192xf32> to vector<16x192xbf16>
    %c32 = arith.constant 32 : index
    %c0_33 = arith.constant 0 : index
    %35 = vector.load %arg12[%c32, %c0_33] : memref<64x1152xbf16, #tpu.memory_space<vmem>>, vector<16x192xbf16>
    tpu.vector_store %arg12[%c32, %c0_33], %34 {strides = array<i32>} : memref<64x1152xbf16, #tpu.memory_space<vmem>>, vector<16x192xbf16>,
    %c3_34 = arith.constant 3 : index
    %c0_35 = arith.constant 0 : index
    %c0_36 = arith.constant 0 : index
    %36 = vector.load %arg11[%c3_34, %c0_35, %c0_36] : memref<12x16x192xf32, #tpu.memory_space<vmem>>, vector<1x16x192xf32>
    %37 = vector.shape_cast %36 : vector<1x16x192xf32> to vector<16x192xf32>
    %38 = arith.truncf %37 : vector<16x192xf32> to vector<16x192xbf16>
    %c48 = arith.constant 48 : index
    %c0_37 = arith.constant 0 : index
    %39 = vector.load %arg12[%c48, %c0_37] : memref<64x1152xbf16, #tpu.memory_space<vmem>>, vector<16x192xbf16>
    tpu.vector_store %arg12[%c48, %c0_37], %38 {strides = array<i32>} : memref<64x1152xbf16, #tpu.memory_space<vmem>>, vector<16x192xbf16>,
    %c6 = arith.constant 6 : index
    %c0_38 = arith.constant 0 : index
    %c0_39 = arith.constant 0 : index
    %40 = vector.load %arg11[%c6, %c0_38, %c0_39] : memref<12x16x192xf32, #tpu.memory_space<vmem>>, vector<1x16x192xf32>
    %41 = vector.shape_cast %40 : vector<1x16x192xf32> to vector<16x192xf32>
    %42 = arith.truncf %41 : vector<16x192xf32> to vector<16x192xbf16>
    %c0_40 = arith.constant 0 : index
    %c192 = arith.constant 192 : index
    %43 = vector.load %arg12[%c0_40, %c192] : memref<64x1152xbf16, #tpu.memory_space<vmem>>, vector<16x192xbf16>
    tpu.vector_store %arg12[%c0_40, %c192], %42 {strides = array<i32>} : memref<64x1152xbf16, #tpu.memory_space<vmem>>, vector<16x192xbf16>,
    %c7 = arith.constant 7 : index
    %c0_41 = arith.constant 0 : index
    %c0_42 = arith.constant 0 : index
    %44 = vector.load %arg11[%c7, %c0_41, %c0_42] : memref<12x16x192xf32, #tpu.memory_space<vmem>>, vector<1x16x192xf32>
    %45 = vector.shape_cast %44 : vector<1x16x192xf32> to vector<16x192xf32>
    %46 = arith.truncf %45 : vector<16x192xf32> to vector<16x192xbf16>
    %c16_43 = arith.constant 16 : index
    %c192_44 = arith.constant 192 : index
    %47 = vector.load %arg12[%c16_43, %c192_44] : memref<64x1152xbf16, #tpu.memory_space<vmem>>, vector<16x192xbf16>
    tpu.vector_store %arg12[%c16_43, %c192_44], %46 {strides = array<i32>} : memref<64x1152xbf16, #tpu.memory_space<vmem>>, vector<16x192xbf16>,
    %c8 = arith.constant 8 : index
    %c0_45 = arith.constant 0 : index
    %c0_46 = arith.constant 0 : index
    %48 = vector.load %arg11[%c8, %c0_45, %c0_46] : memref<12x16x192xf32, #tpu.memory_space<vmem>>, vector<1x16x192xf32>
    %49 = vector.shape_cast %48 : vector<1x16x192xf32> to vector<16x192xf32>
    %50 = arith.truncf %49 : vector<16x192xf32> to vector<16x192xbf16>
    %c32_47 = arith.constant 32 : index
    %c192_48 = arith.constant 192 : index
    %51 = vector.load %arg12[%c32_47, %c192_48] : memref<64x1152xbf16, #tpu.memory_space<vmem>>, vector<16x192xbf16>
    tpu.vector_store %arg12[%c32_47, %c192_48], %50 {strides = array<i32>} : memref<64x1152xbf16, #tpu.memory_space<vmem>>, vector<16x192xbf16>,
    %c9 = arith.constant 9 : index
    %c0_49 = arith.constant 0 : index
    %c0_50 = arith.constant 0 : index
    %52 = vector.load %arg11[%c9, %c0_49, %c0_50] : memref<12x16x192xf32, #tpu.memory_space<vmem>>, vector<1x16x192xf32>
    %53 = vector.shape_cast %52 : vector<1x16x192xf32> to vector<16x192xf32>
    %54 = arith.truncf %53 : vector<16x192xf32> to vector<16x192xbf16>
    %c48_51 = arith.constant 48 : index
    %c192_52 = arith.constant 192 : index
    %55 = vector.load %arg12[%c48_51, %c192_52] : memref<64x1152xbf16, #tpu.memory_space<vmem>>, vector<16x192xbf16>
    tpu.vector_store %arg12[%c48_51, %c192_52], %54 {strides = array<i32>} : memref<64x1152xbf16, #tpu.memory_space<vmem>>, vector<16x192xbf16>,
    %c1_53 = arith.constant 1 : index
    %c0_54 = arith.constant 0 : index
    %c0_55 = arith.constant 0 : index
    %56 = vector.load %arg11[%c1_53, %c0_54, %c0_55] : memref<12x16x192xf32, #tpu.memory_space<vmem>>, vector<1x16x192xf32>
    %57 = vector.shape_cast %56 : vector<1x16x192xf32> to vector<16x192xf32>
    %58 = arith.truncf %57 : vector<16x192xf32> to vector<16x192xbf16>
    %c0_56 = arith.constant 0 : index
    %c384 = arith.constant 384 : index
    %59 = vector.load %arg12[%c0_56, %c384] : memref<64x1152xbf16, #tpu.memory_space<vmem>>, vector<16x192xbf16>
    tpu.vector_store %arg12[%c0_56, %c384], %58 {strides = array<i32>} : memref<64x1152xbf16, #tpu.memory_space<vmem>>, vector<16x192xbf16>,
    %c2_57 = arith.constant 2 : index
    %c0_58 = arith.constant 0 : index
    %c0_59 = arith.constant 0 : index
    %60 = vector.load %arg11[%c2_57, %c0_58, %c0_59] : memref<12x16x192xf32, #tpu.memory_space<vmem>>, vector<1x16x192xf32>
    %61 = vector.shape_cast %60 : vector<1x16x192xf32> to vector<16x192xf32>
    %62 = arith.truncf %61 : vector<16x192xf32> to vector<16x192xbf16>
    %c16_60 = arith.constant 16 : index
    %c384_61 = arith.constant 384 : index
    %63 = vector.load %arg12[%c16_60, %c384_61] : memref<64x1152xbf16, #tpu.memory_space<vmem>>, vector<16x192xbf16>
    tpu.vector_store %arg12[%c16_60, %c384_61], %62 {strides = array<i32>} : memref<64x1152xbf16, #tpu.memory_space<vmem>>, vector<16x192xbf16>,
    %c3_62 = arith.constant 3 : index
    %c0_63 = arith.constant 0 : index
    %c0_64 = arith.constant 0 : index
    %64 = vector.load %arg11[%c3_62, %c0_63, %c0_64] : memref<12x16x192xf32, #tpu.memory_space<vmem>>, vector<1x16x192xf32>
    %65 = vector.shape_cast %64 : vector<1x16x192xf32> to vector<16x192xf32>
    %66 = arith.truncf %65 : vector<16x192xf32> to vector<16x192xbf16>
    %c32_65 = arith.constant 32 : index
    %c384_66 = arith.constant 384 : index
    %67 = vector.load %arg12[%c32_65, %c384_66] : memref<64x1152xbf16, #tpu.memory_space<vmem>>, vector<16x192xbf16>
    tpu.vector_store %arg12[%c32_65, %c384_66], %66 {strides = array<i32>} : memref<64x1152xbf16, #tpu.memory_space<vmem>>, vector<16x192xbf16>,
    %c4 = arith.constant 4 : index
    %c0_67 = arith.constant 0 : index
    %c0_68 = arith.constant 0 : index
    %68 = vector.load %arg11[%c4, %c0_67, %c0_68] : memref<12x16x192xf32, #tpu.memory_space<vmem>>, vector<1x16x192xf32>
    %69 = vector.shape_cast %68 : vector<1x16x192xf32> to vector<16x192xf32>
    %70 = arith.truncf %69 : vector<16x192xf32> to vector<16x192xbf16>
    %c48_69 = arith.constant 48 : index
    %c384_70 = arith.constant 384 : index
    %71 = vector.load %arg12[%c48_69, %c384_70] : memref<64x1152xbf16, #tpu.memory_space<vmem>>, vector<16x192xbf16>
    tpu.vector_store %arg12[%c48_69, %c384_70], %70 {strides = array<i32>} : memref<64x1152xbf16, #tpu.memory_space<vmem>>, vector<16x192xbf16>,
    %c7_71 = arith.constant 7 : index
    %c0_72 = arith.constant 0 : index
    %c0_73 = arith.constant 0 : index
    %72 = vector.load %arg11[%c7_71, %c0_72, %c0_73] : memref<12x16x192xf32, #tpu.memory_space<vmem>>, vector<1x16x192xf32>
    %73 = vector.shape_cast %72 : vector<1x16x192xf32> to vector<16x192xf32>
    %74 = arith.truncf %73 : vector<16x192xf32> to vector<16x192xbf16>
    %c0_74 = arith.constant 0 : index
    %c576 = arith.constant 576 : index
    %75 = vector.load %arg12[%c0_74, %c576] : memref<64x1152xbf16, #tpu.memory_space<vmem>>, vector<16x192xbf16>
    tpu.vector_store %arg12[%c0_74, %c576], %74 {strides = array<i32>} : memref<64x1152xbf16, #tpu.memory_space<vmem>>, vector<16x192xbf16>,
    %c8_75 = arith.constant 8 : index
    %c0_76 = arith.constant 0 : index
    %c0_77 = arith.constant 0 : index
    %76 = vector.load %arg11[%c8_75, %c0_76, %c0_77] : memref<12x16x192xf32, #tpu.memory_space<vmem>>, vector<1x16x192xf32>
    %77 = vector.shape_cast %76 : vector<1x16x192xf32> to vector<16x192xf32>
    %78 = arith.truncf %77 : vector<16x192xf32> to vector<16x192xbf16>
    %c16_78 = arith.constant 16 : index
    %c576_79 = arith.constant 576 : index
    %79 = vector.load %arg12[%c16_78, %c576_79] : memref<64x1152xbf16, #tpu.memory_space<vmem>>, vector<16x192xbf16>
    tpu.vector_store %arg12[%c16_78, %c576_79], %78 {strides = array<i32>} : memref<64x1152xbf16, #tpu.memory_space<vmem>>, vector<16x192xbf16>,
    %c9_80 = arith.constant 9 : index
    %c0_81 = arith.constant 0 : index
    %c0_82 = arith.constant 0 : index
    %80 = vector.load %arg11[%c9_80, %c0_81, %c0_82] : memref<12x16x192xf32, #tpu.memory_space<vmem>>, vector<1x16x192xf32>
    %81 = vector.shape_cast %80 : vector<1x16x192xf32> to vector<16x192xf32>
    %82 = arith.truncf %81 : vector<16x192xf32> to vector<16x192xbf16>
    %c32_83 = arith.constant 32 : index
    %c576_84 = arith.constant 576 : index
    %83 = vector.load %arg12[%c32_83, %c576_84] : memref<64x1152xbf16, #tpu.memory_space<vmem>>, vector<16x192xbf16>
    tpu.vector_store %arg12[%c32_83, %c576_84], %82 {strides = array<i32>} : memref<64x1152xbf16, #tpu.memory_space<vmem>>, vector<16x192xbf16>,
    %c10 = arith.constant 10 : index
    %c0_85 = arith.constant 0 : index
    %c0_86 = arith.constant 0 : index
    %84 = vector.load %arg11[%c10, %c0_85, %c0_86] : memref<12x16x192xf32, #tpu.memory_space<vmem>>, vector<1x16x192xf32>
    %85 = vector.shape_cast %84 : vector<1x16x192xf32> to vector<16x192xf32>
    %86 = arith.truncf %85 : vector<16x192xf32> to vector<16x192xbf16>
    %c48_87 = arith.constant 48 : index
    %c576_88 = arith.constant 576 : index
    %87 = vector.load %arg12[%c48_87, %c576_88] : memref<64x1152xbf16, #tpu.memory_space<vmem>>, vector<16x192xbf16>
    tpu.vector_store %arg12[%c48_87, %c576_88], %86 {strides = array<i32>} : memref<64x1152xbf16, #tpu.memory_space<vmem>>, vector<16x192xbf16>,
    %c2_89 = arith.constant 2 : index
    %c0_90 = arith.constant 0 : index
    %c0_91 = arith.constant 0 : index
    %88 = vector.load %arg11[%c2_89, %c0_90, %c0_91] : memref<12x16x192xf32, #tpu.memory_space<vmem>>, vector<1x16x192xf32>
    %89 = vector.shape_cast %88 : vector<1x16x192xf32> to vector<16x192xf32>
    %90 = arith.truncf %89 : vector<16x192xf32> to vector<16x192xbf16>
    %c0_92 = arith.constant 0 : index
    %c768 = arith.constant 768 : index
    %91 = vector.load %arg12[%c0_92, %c768] : memref<64x1152xbf16, #tpu.memory_space<vmem>>, vector<16x192xbf16>
    tpu.vector_store %arg12[%c0_92, %c768], %90 {strides = array<i32>} : memref<64x1152xbf16, #tpu.memory_space<vmem>>, vector<16x192xbf16>,
    %c3_93 = arith.constant 3 : index
    %c0_94 = arith.constant 0 : index
    %c0_95 = arith.constant 0 : index
    %92 = vector.load %arg11[%c3_93, %c0_94, %c0_95] : memref<12x16x192xf32, #tpu.memory_space<vmem>>, vector<1x16x192xf32>
    %93 = vector.shape_cast %92 : vector<1x16x192xf32> to vector<16x192xf32>
    %94 = arith.truncf %93 : vector<16x192xf32> to vector<16x192xbf16>
    %c16_96 = arith.constant 16 : index
    %c768_97 = arith.constant 768 : index
    %95 = vector.load %arg12[%c16_96, %c768_97] : memref<64x1152xbf16, #tpu.memory_space<vmem>>, vector<16x192xbf16>
    tpu.vector_store %arg12[%c16_96, %c768_97], %94 {strides = array<i32>} : memref<64x1152xbf16, #tpu.memory_space<vmem>>, vector<16x192xbf16>,
    %c4_98 = arith.constant 4 : index
    %c0_99 = arith.constant 0 : index
    %c0_100 = arith.constant 0 : index
    %96 = vector.load %arg11[%c4_98, %c0_99, %c0_100] : memref<12x16x192xf32, #tpu.memory_space<vmem>>, vector<1x16x192xf32>
    %97 = vector.shape_cast %96 : vector<1x16x192xf32> to vector<16x192xf32>
    %98 = arith.truncf %97 : vector<16x192xf32> to vector<16x192xbf16>
    %c32_101 = arith.constant 32 : index
    %c768_102 = arith.constant 768 : index
    %99 = vector.load %arg12[%c32_101, %c768_102] : memref<64x1152xbf16, #tpu.memory_space<vmem>>, vector<16x192xbf16>
    tpu.vector_store %arg12[%c32_101, %c768_102], %98 {strides = array<i32>} : memref<64x1152xbf16, #tpu.memory_space<vmem>>, vector<16x192xbf16>,
    %c5 = arith.constant 5 : index
    %c0_103 = arith.constant 0 : index
    %c0_104 = arith.constant 0 : index
    %100 = vector.load %arg11[%c5, %c0_103, %c0_104] : memref<12x16x192xf32, #tpu.memory_space<vmem>>, vector<1x16x192xf32>
    %101 = vector.shape_cast %100 : vector<1x16x192xf32> to vector<16x192xf32>
    %102 = arith.truncf %101 : vector<16x192xf32> to vector<16x192xbf16>
    %c48_105 = arith.constant 48 : index
    %c768_106 = arith.constant 768 : index
    %103 = vector.load %arg12[%c48_105, %c768_106] : memref<64x1152xbf16, #tpu.memory_space<vmem>>, vector<16x192xbf16>
    tpu.vector_store %arg12[%c48_105, %c768_106], %102 {strides = array<i32>} : memref<64x1152xbf16, #tpu.memory_space<vmem>>, vector<16x192xbf16>,
    %c8_107 = arith.constant 8 : index
    %c0_108 = arith.constant 0 : index
    %c0_109 = arith.constant 0 : index
    %104 = vector.load %arg11[%c8_107, %c0_108, %c0_109] : memref<12x16x192xf32, #tpu.memory_space<vmem>>, vector<1x16x192xf32>
    %105 = vector.shape_cast %104 : vector<1x16x192xf32> to vector<16x192xf32>
    %106 = arith.truncf %105 : vector<16x192xf32> to vector<16x192xbf16>
    %c0_110 = arith.constant 0 : index
    %c960 = arith.constant 960 : index
    %107 = vector.load %arg12[%c0_110, %c960] : memref<64x1152xbf16, #tpu.memory_space<vmem>>, vector<16x192xbf16>
    tpu.vector_store %arg12[%c0_110, %c960], %106 {strides = array<i32>} : memref<64x1152xbf16, #tpu.memory_space<vmem>>, vector<16x192xbf16>,
    %c9_111 = arith.constant 9 : index
    %c0_112 = arith.constant 0 : index
    %c0_113 = arith.constant 0 : index
    %108 = vector.load %arg11[%c9_111, %c0_112, %c0_113] : memref<12x16x192xf32, #tpu.memory_space<vmem>>, vector<1x16x192xf32>
    %109 = vector.shape_cast %108 : vector<1x16x192xf32> to vector<16x192xf32>
    %110 = arith.truncf %109 : vector<16x192xf32> to vector<16x192xbf16>
    %c16_114 = arith.constant 16 : index
    %c960_115 = arith.constant 960 : index
    %111 = vector.load %arg12[%c16_114, %c960_115] : memref<64x1152xbf16, #tpu.memory_space<vmem>>, vector<16x192xbf16>
    tpu.vector_store %arg12[%c16_114, %c960_115], %110 {strides = array<i32>} : memref<64x1152xbf16, #tpu.memory_space<vmem>>, vector<16x192xbf16>,
    %c10_116 = arith.constant 10 : index
    %c0_117 = arith.constant 0 : index
    %c0_118 = arith.constant 0 : index
    %112 = vector.load %arg11[%c10_116, %c0_117, %c0_118] : memref<12x16x192xf32, #tpu.memory_space<vmem>>, vector<1x16x192xf32>
    %113 = vector.shape_cast %112 : vector<1x16x192xf32> to vector<16x192xf32>
    %114 = arith.truncf %113 : vector<16x192xf32> to vector<16x192xbf16>
    %c32_119 = arith.constant 32 : index
    %c960_120 = arith.constant 960 : index
    %115 = vector.load %arg12[%c32_119, %c960_120] : memref<64x1152xbf16, #tpu.memory_space<vmem>>, vector<16x192xbf16>
    tpu.vector_store %arg12[%c32_119, %c960_120], %114 {strides = array<i32>} : memref<64x1152xbf16, #tpu.memory_space<vmem>>, vector<16x192xbf16>,
    %c11 = arith.constant 11 : index
    %c0_121 = arith.constant 0 : index
    %c0_122 = arith.constant 0 : index
    %116 = vector.load %arg11[%c11, %c0_121, %c0_122] : memref<12x16x192xf32, #tpu.memory_space<vmem>>, vector<1x16x192xf32>
    %117 = vector.shape_cast %116 : vector<1x16x192xf32> to vector<16x192xf32>
    %118 = arith.truncf %117 : vector<16x192xf32> to vector<16x192xbf16>
    %c48_123 = arith.constant 48 : index
    %c960_124 = arith.constant 960 : index
    %119 = vector.load %arg12[%c48_123, %c960_124] : memref<64x1152xbf16, #tpu.memory_space<vmem>>, vector<16x192xbf16>
    tpu.vector_store %arg12[%c48_123, %c960_124], %118 {strides = array<i32>} : memref<64x1152xbf16, #tpu.memory_space<vmem>>, vector<16x192xbf16>,
    %c0_125 = arith.constant 0 : index
    %c0_126 = arith.constant 0 : index
    %120 = vector.load %arg12[%c0_125, %c0_126] : memref<64x1152xbf16, #tpu.memory_space<vmem>>, vector<64x1152xbf16>
    %c0_127 = arith.constant 0 : index
    %c0_128 = arith.constant 0 : index
    %c0_129 = arith.constant 0 : index
    %121 = vector.load %arg4[%c0_127, %c0_128, %c0_129] : memref<4x1152x128xbf16, #tpu.memory_space<vmem>>, vector<1x1152x128xbf16>
    %122 = vector.shape_cast %121 : vector<1x1152x128xbf16> to vector<1152x128xbf16>
    %cst_130 = arith.constant dense<0.000000e+00> : vector<64x128xf32>
    %123 = tpu.matmul %120, %122, %cst_130 {dimension_numbers = #tpu.dot_dimension_numbers<[1], [0], [0], [1], [0, 0, 1, 1], [], []>} : vector<64x1152xbf16>, vector<1152x128xbf16>, vector<64x128xf32> -> vector<64x128xf32>
    %c1_131 = arith.constant 1 : index
    %c0_132 = arith.constant 0 : index
    %c0_133 = arith.constant 0 : index
    %124 = vector.load %arg4[%c1_131, %c0_132, %c0_133] : memref<4x1152x128xbf16, #tpu.memory_space<vmem>>, vector<1x1152x128xbf16>
    %125 = vector.shape_cast %124 : vector<1x1152x128xbf16> to vector<1152x128xbf16>
    %cst_134 = arith.constant dense<0.000000e+00> : vector<64x128xf32>
    %126 = tpu.matmul %120, %125, %cst_134 {dimension_numbers = #tpu.dot_dimension_numbers<[1], [0], [0], [1], [0, 0, 1, 1], [], []>} : vector<64x1152xbf16>, vector<1152x128xbf16>, vector<64x128xf32> -> vector<64x128xf32>
    %127 = arith.maximumf %123, %126 : vector<64x128xf32>
    %c2_135 = arith.constant 2 : index
    %c0_136 = arith.constant 0 : index
    %c0_137 = arith.constant 0 : index
    %128 = vector.load %arg4[%c2_135, %c0_136, %c0_137] : memref<4x1152x128xbf16, #tpu.memory_space<vmem>>, vector<1x1152x128xbf16>
    %129 = vector.shape_cast %128 : vector<1x1152x128xbf16> to vector<1152x128xbf16>
    %cst_138 = arith.constant dense<0.000000e+00> : vector<64x128xf32>
    %130 = tpu.matmul %120, %129, %cst_138 {dimension_numbers = #tpu.dot_dimension_numbers<[1], [0], [0], [1], [0, 0, 1, 1], [], []>} : vector<64x1152xbf16>, vector<1152x128xbf16>, vector<64x128xf32> -> vector<64x128xf32>
    %131 = arith.maximumf %127, %130 : vector<64x128xf32>
    %c3_139 = arith.constant 3 : index
    %c0_140 = arith.constant 0 : index
    %c0_141 = arith.constant 0 : index
    %132 = vector.load %arg4[%c3_139, %c0_140, %c0_141] : memref<4x1152x128xbf16, #tpu.memory_space<vmem>>, vector<1x1152x128xbf16>
    %133 = vector.shape_cast %132 : vector<1x1152x128xbf16> to vector<1152x128xbf16>
    %cst_142 = arith.constant dense<0.000000e+00> : vector<64x128xf32>
    %134 = tpu.matmul %120, %133, %cst_142 {dimension_numbers = #tpu.dot_dimension_numbers<[1], [0], [0], [1], [0, 0, 1, 1], [], []>} : vector<64x1152xbf16>, vector<1152x128xbf16>, vector<64x128xf32> -> vector<64x128xf32>
    %135 = arith.maximumf %131, %134 : vector<64x128xf32>
    %c0_143 = arith.constant 0 : index
    %c0_144 = arith.constant 0 : index
    %136 = vector.load %arg5[%c0_143, %c0_144] : memref<1x128xf32, #tpu.memory_space<vmem>>, vector<1x128xf32>
    %137 = vector.broadcast %136 : vector<1x128xf32> to vector<64x128xf32>
    %138 = arith.addf %135, %137 : vector<64x128xf32>
    %cst_145 = arith.constant 0.000000e+00 : f32
    %139 = vector.broadcast %cst_145 : f32 to vector<64x128xf32>
    %140 = arith.maximumf %138, %139 : vector<64x128xf32>
    %141 = vector.extract_strided_slice %140 {offsets = [0, 0], sizes = [16, 128], strides = [1, 1]} : vector<64x128xf32> to vector<16x128xf32>
    %142 = arith.truncf %141 : vector<16x128xf32> to vector<16x128xbf16>
    %c0_146 = arith.constant 0 : index
    %c0_147 = arith.constant 0 : index
    %c0_148 = arith.constant 0 : index
    %143 = vector.load %arg6[%c0_146, %c0_147, %c0_148] : memref<4x128x64xbf16, #tpu.memory_space<vmem>>, vector<1x128x64xbf16>
    %144 = vector.shape_cast %143 : vector<1x128x64xbf16> to vector<128x64xbf16>
    %cst_149 = arith.constant dense<0.000000e+00> : vector<16x64xf32>
    %145 = tpu.matmul %142, %144, %cst_149 {dimension_numbers = #tpu.dot_dimension_numbers<[1], [0], [0], [1], [0, 0, 1, 1], [], []>} : vector<16x128xbf16>, vector<128x64xbf16>, vector<16x64xf32> -> vector<16x64xf32>
    %146 = vector.extract_strided_slice %140 {offsets = [16, 0], sizes = [16, 128], strides = [1, 1]} : vector<64x128xf32> to vector<16x128xf32>
    %147 = arith.truncf %146 : vector<16x128xf32> to vector<16x128xbf16>
    %c1_150 = arith.constant 1 : index
    %c0_151 = arith.constant 0 : index
    %c0_152 = arith.constant 0 : index
    %148 = vector.load %arg6[%c1_150, %c0_151, %c0_152] : memref<4x128x64xbf16, #tpu.memory_space<vmem>>, vector<1x128x64xbf16>
    %149 = vector.shape_cast %148 : vector<1x128x64xbf16> to vector<128x64xbf16>
    %cst_153 = arith.constant dense<0.000000e+00> : vector<16x64xf32>
    %150 = tpu.matmul %147, %149, %cst_153 {dimension_numbers = #tpu.dot_dimension_numbers<[1], [0], [0], [1], [0, 0, 1, 1], [], []>} : vector<16x128xbf16>, vector<128x64xbf16>, vector<16x64xf32> -> vector<16x64xf32>
    %151 = arith.addf %145, %150 : vector<16x64xf32>
    %152 = vector.extract_strided_slice %140 {offsets = [32, 0], sizes = [16, 128], strides = [1, 1]} : vector<64x128xf32> to vector<16x128xf32>
    %153 = arith.truncf %152 : vector<16x128xf32> to vector<16x128xbf16>
    %c2_154 = arith.constant 2 : index
    %c0_155 = arith.constant 0 : index
    %c0_156 = arith.constant 0 : index
    %154 = vector.load %arg6[%c2_154, %c0_155, %c0_156] : memref<4x128x64xbf16, #tpu.memory_space<vmem>>, vector<1x128x64xbf16>
    %155 = vector.shape_cast %154 : vector<1x128x64xbf16> to vector<128x64xbf16>
    %cst_157 = arith.constant dense<0.000000e+00> : vector<16x64xf32>
    %156 = tpu.matmul %153, %155, %cst_157 {dimension_numbers = #tpu.dot_dimension_numbers<[1], [0], [0], [1], [0, 0, 1, 1], [], []>} : vector<16x128xbf16>, vector<128x64xbf16>, vector<16x64xf32> -> vector<16x64xf32>
    %157 = arith.addf %151, %156 : vector<16x64xf32>
    %158 = vector.extract_strided_slice %140 {offsets = [48, 0], sizes = [16, 128], strides = [1, 1]} : vector<64x128xf32> to vector<16x128xf32>
    %159 = arith.truncf %158 : vector<16x128xf32> to vector<16x128xbf16>
    %c3_158 = arith.constant 3 : index
    %c0_159 = arith.constant 0 : index
    %c0_160 = arith.constant 0 : index
    %160 = vector.load %arg6[%c3_158, %c0_159, %c0_160] : memref<4x128x64xbf16, #tpu.memory_space<vmem>>, vector<1x128x64xbf16>
    %161 = vector.shape_cast %160 : vector<1x128x64xbf16> to vector<128x64xbf16>
    %cst_161 = arith.constant dense<0.000000e+00> : vector<16x64xf32>
    %162 = tpu.matmul %159, %161, %cst_161 {dimension_numbers = #tpu.dot_dimension_numbers<[1], [0], [0], [1], [0, 0, 1, 1], [], []>} : vector<16x128xbf16>, vector<128x64xbf16>, vector<16x64xf32> -> vector<16x64xf32>
    %163 = arith.addf %157, %162 : vector<16x64xf32>
    %c0_162 = arith.constant 0 : index
    %c0_163 = arith.constant 0 : index
    %164 = vector.load %arg7[%c0_162, %c0_163] : memref<1x64xf32, #tpu.memory_space<vmem>>, vector<1x64xf32>
    %165 = vector.broadcast %164 : vector<1x64xf32> to vector<16x64xf32>
    %166 = arith.addf %163, %165 : vector<16x64xf32>
    %cst_164 = arith.constant 0.000000e+00 : f32
    %167 = vector.broadcast %cst_164 : f32 to vector<16x64xf32>
    %168 = arith.maximumf %166, %167 : vector<16x64xf32>
    %169 = arith.truncf %168 : vector<16x64xf32> to vector<16x64xbf16>
    %c0_165 = arith.constant 0 : index
    %c0_166 = arith.constant 0 : index
    %170 = vector.load %arg8[%c0_165, %c0_166] : memref<64x128xbf16, #tpu.memory_space<vmem>>, vector<64x128xbf16>
    %cst_167 = arith.constant dense<0.000000e+00> : vector<16x128xf32>
    %171 = tpu.matmul %169, %170, %cst_167 {dimension_numbers = #tpu.dot_dimension_numbers<[1], [0], [0], [1], [0, 0, 1, 1], [], []>} : vector<16x64xbf16>, vector<64x128xbf16>, vector<16x128xf32> -> vector<16x128xf32>
    %c0_168 = arith.constant 0 : index
    %c0_169 = arith.constant 0 : index
    %172 = vector.load %arg9[%c0_168, %c0_169] : memref<1x128xf32, #tpu.memory_space<vmem>>, vector<1x128xf32>
    %173 = vector.broadcast %172 : vector<1x128xf32> to vector<16x128xf32>
    %174 = arith.addf %171, %173 : vector<16x128xf32>
    %cst_170 = arith.constant dense<0xFF800000> : vector<16xf32>
    %175 = vector.multi_reduction <maximumf>, %174, %cst_170 [1] : vector<16x128xf32> to vector<16xf32>
    %176 = vector.shape_cast %175 : vector<16xf32> to vector<16x1xf32>
    %177 = vector.broadcast %176 : vector<16x1xf32> to vector<16x128xf32>
    %178 = arith.subf %174, %177 : vector<16x128xf32>
    %179 = math.exp %178 : vector<16x128xf32>
    %cst_171 = arith.constant dense<0.000000e+00> : vector<16xf32>
    %180 = vector.multi_reduction <add>, %179, %cst_171 [1] : vector<16x128xf32> to vector<16xf32>
    %181 = vector.shape_cast %180 : vector<16xf32> to vector<16x1xf32>
    %182 = math.log %181 : vector<16x1xf32>
    %183 = vector.broadcast %182 : vector<16x1xf32> to vector<16x128xf32>
    %184 = arith.subf %178, %183 : vector<16x128xf32>
    %c0_172 = arith.constant 0 : index
    %c0_173 = arith.constant 0 : index
    %185 = vector.load %arg10[%c0_172, %c0_173] : memref<16x128xf32, #tpu.memory_space<vmem>>, vector<16x128xf32>
    tpu.vector_store %arg10[%c0_172, %c0_173], %184 {strides = array<i32>} : memref<16x128xf32, #tpu.memory_space<vmem>>, vector<16x128xf32>,
    return
  }
  func.func @transform_0(%arg0: i32) -> (i32, i32, i32, i32) {
    %c0_i32 = arith.constant 0 : i32
    %c0_i32_0 = arith.constant 0 : i32
    %c0_i32_1 = arith.constant 0 : i32
    %c0_i32_2 = arith.constant 0 : i32
    return %c0_i32, %c0_i32_0, %arg0, %c0_i32_1 : i32, i32, i32, i32
  }
  func.func @transform_1(%arg0: i32) -> (i32, i32, i32) {
    %c0_i32 = arith.constant 0 : i32
    %c0_i32_0 = arith.constant 0 : i32
    %c0_i32_1 = arith.constant 0 : i32
    %c0_i32_2 = arith.constant 0 : i32
    return %c0_i32, %c0_i32_0, %c0_i32_1 : i32, i32, i32
  }
  func.func @transform_2(%arg0: i32) -> (i32, i32) {
    %c0_i32 = arith.constant 0 : i32
    %c0_i32_0 = arith.constant 0 : i32
    %c0_i32_1 = arith.constant 0 : i32
    return %c0_i32, %c0_i32_0 : i32, i32
  }
  func.func @transform_3(%arg0: i32) -> (i32, i32, i32) {
    %c0_i32 = arith.constant 0 : i32
    %c0_i32_0 = arith.constant 0 : i32
    %c0_i32_1 = arith.constant 0 : i32
    %c0_i32_2 = arith.constant 0 : i32
    return %c0_i32, %c0_i32_0, %c0_i32_1 : i32, i32, i32
  }
  func.func @transform_4(%arg0: i32) -> (i32, i32) {
    %c0_i32 = arith.constant 0 : i32
    %c0_i32_0 = arith.constant 0 : i32
    %c0_i32_1 = arith.constant 0 : i32
    return %c0_i32, %c0_i32_0 : i32, i32
  }
  func.func @transform_5(%arg0: i32) -> (i32, i32, i32) {
    %c0_i32 = arith.constant 0 : i32
    %c0_i32_0 = arith.constant 0 : i32
    %c0_i32_1 = arith.constant 0 : i32
    %c0_i32_2 = arith.constant 0 : i32
    return %c0_i32, %c0_i32_0, %c0_i32_1 : i32, i32, i32
  }
  func.func @transform_6(%arg0: i32) -> (i32, i32) {
    %c0_i32 = arith.constant 0 : i32
    %c0_i32_0 = arith.constant 0 : i32
    %c0_i32_1 = arith.constant 0 : i32
    return %c0_i32, %c0_i32_0 : i32, i32
  }
  func.func @transform_7(%arg0: i32) -> (i32, i32) {
    %c0_i32 = arith.constant 0 : i32
    %c0_i32_0 = arith.constant 0 : i32
    %c0_i32_1 = arith.constant 0 : i32
    return %c0_i32, %c0_i32_0 : i32, i32
  }
  func.func @transform_8(%arg0: i32) -> (i32, i32) {
    %c0_i32 = arith.constant 0 : i32
    %c0_i32_0 = arith.constant 0 : i32
    %c0_i32_1 = arith.constant 0 : i32
    return %c0_i32, %c0_i32_0 : i32, i32
  }
  func.func @transform_9(%arg0: i32) -> (i32, i32) {
    %c0_i32 = arith.constant 0 : i32
    %c0_i32_0 = arith.constant 0 : i32
    return %arg0, %c0_i32 : i32, i32
  }
}

</mosaic_0001>

<bundles_post_ra>
// kernel: tile.13
= control target key start
LH: loop header
LB: loop body
LE: loop exit
PB: predicated region body
PF: predicated region fallthrough
CT: control target
= control target key end

     0   :  { %s28_s0 = inlined_call_operand.vmem [shape: f32[16], index: 0, kind: input, shape index: {}]   ;;  %s29_s1 = inlined_call_operand.vmem [shape: f32[12,16], index: 1, kind: output, shape index: {}]  }
   0x1   :  { %v4_v0 = vld [vmem:[%s28_s0] ss:$0 sm:$0xff] }
   0x2   :  { %5 = vst [vmem:[%s29_s1] sm:$0xff] %v4_v0  ;;  %8 = vst [vmem:[%s29_s1 + $0x8] sm:$0xff] %v4_v0 }

// kernel: tile.14
= control target key start
LH: loop header
LB: loop body
LE: loop exit
PB: predicated region body
PF: predicated region fallthrough
CT: control target
= control target key end

     0   :  { %s80_s10 = smov 112   ;;  %s81_s11 = smov 80   ;;  %vm4_vm0 = vcmask 130048   ;;  %vm10_vm1 = vcmask 1048448   ;;  %vm16_vm2 = vcmask 917248   ;;  %vm22_vm3 = vcmask 786048   ;;  %s127_s0 = inlined_call_operand.vmem [shape: f32[12,16], index: 0, kind: input, shape index: {}]   ;;  %s128_s1 = inlined_call_operand.vmem [shape: f32[1,192], index: 1, kind: output, shape index: {}]  }
   0x1   :  { %v65_v0 = vld [vmem:[%s127_s0 + $0x7] sm:$0x1]   ;;  %v67_v1 = vld [vmem:[%s127_s0 + $0x5] sm:$0x1]   ;;  %v66_v2 = vld [vmem:[%s127_s0 + $0x6] sm:$0x1]  }
   0x2   :  { %8 = vrot.lane.b32.xlu0 %v65_v0, %s80_s10  ;;  %20 = vrot.lane.b32.xlu1 %v67_v1, %s81_s11  ;;  %v68_v3 = vld [vmem:[%s127_s0 + $0x4] sm:$0x1]   ;;  %s31_s16 = smov 3  ;;  %s38_s17 = smov 3  ;;  %vm28_vm4 = vcmask 654848   ;;  %vm35_vm5 = vcmask 523648  }
   0x3   :  { %s82_s18 = smov 96   ;;  %s83_s19 = smov 64   ;;  %v69_v4 = vld [vmem:[%s127_s0 + $0x3] ss:$8 sm:%s31_s16]   ;;  %v70_v5 = vld [vmem:[%s127_s0 + $0x2] ss:$8 sm:%s38_s17]  }
   0x4   :  { %s2_s22 = smov 3  ;;  %s45_s27 = smov 3  ;;  %vm42_vm6 = vcmask 392448   ;;  %vm49_vm7 = vcmask 261248  }
   0x5   :  { %v3_v6 = vld [vmem:[%s127_s0] ss:$8 sm:%s2_s22]   ;;  %s84_s28 = smov 48   ;;  %s85_s29 = smov 32   ;;  %v71_v7 = vld [vmem:[%s127_s0 + $0x1] ss:$8 sm:%s45_s27]  }
   0x6   :  { %14 = vrot.lane.b32.xlu0 %v66_v2, %s82_s18  ;;  %26 = vrot.lane.b32.xlu1 %v68_v3, %s83_s19  ;;  %5 = vst.msk [vmem:[#allocation0] ss:$8 sm:$0x3] %vm4_vm0, %v3_v6   ;;  %s86_s0 = smov 16  }
   0xa   :  { %33 = vrot.lane.b32.xlu0 %v69_v4, %s84_s28  ;;  %40 = vrot.lane.b32.xlu1 %v70_v5, %s85_s29 }
   0xe   :  { %47 = vrot.lane.b32.xlu0 %v71_v7, %s86_s0 }
  0x74   :  { %v9_v8 = vpop.permute.xlu0 %8   ;;  %v21_v9 = vpop.permute.xlu1 %20  }
  0x75   :  { %11 = vst.msk [vmem:[#allocation0] sm:$0x1] %vm10_vm1, %v9_v8  }
  0x78   :  { %v15_v10 = vpop.permute.xlu0 %14   ;;  %v27_v11 = vpop.permute.xlu1 %26  }
  0x79   :  { %17 = vst.msk [vmem:[#allocation0] sm:$0x1] %vm16_vm2, %v15_v10  }
  0x7a   :  { %23 = vst.msk [vmem:[#allocation0] sm:$0x1] %vm22_vm3, %v21_v9  }
  0x7b   :  { %29 = vst.msk [vmem:[#allocation0] sm:$0x1] %vm28_vm4, %v27_v11  }
  0x7c   :  { %v34_v12 = vpop.permute.xlu0 %33   ;;  %v41_v13 = vpop.permute.xlu1 %40  }
  0x7d   :  { %36 = vst.msk [vmem:[#allocation0] ss:$8 sm:$0x3] %vm35_vm5, %v34_v12  }
  0x7e   :  { %43 = vst.msk [vmem:[#allocation0] ss:$8 sm:$0x3] %vm42_vm6, %v41_v13  }
  0x80   :  { %v48_v14 = vpop.permute.xlu0 %47  }
  0x81   :  { %50 = vst.msk [vmem:[#allocation0] ss:$8 sm:$0x3] %vm49_vm7, %v48_v14  }
  0x88   :  { %v55_v15 = vld [vmem:[#allocation0] sm:$0x1]  ;;  %v60_v16 = vld [vmem:[#allocation0 + $0x8] sm:$0x1] }
  0x89   :  { %58 = vst [vmem:[%s128_s1] sm:$0x1] %v55_v15  ;;  %72 = vst [vmem:[%s128_s1 + $0x1] sm:$0x1] %v60_v16 }

// kernel: tile.18
= control target key start
LH: loop header
LB: loop body
LE: loop exit
PB: predicated region body
PF: predicated region fallthrough
CT: control target
= control target key end

     0   :  { %s22_s0 = inlined_call_operand.vmem [shape: f32[32], index: 0, kind: input, shape index: {}]   ;;  %s23_s1 = inlined_call_operand.vmem [shape: f32[4,32], index: 1, kind: output, shape index: {}]  }
   0x1   :  { %v4_v0 = vld [vmem:[%s22_s0] ss:$0 sm:$0xff] }
   0x2   :  { %5 = vst [vmem:[%s23_s1] sm:$0xf] %v4_v0 }

// kernel: tile.19
= control target key start
LH: loop header
LB: loop body
LE: loop exit
PB: predicated region body
PF: predicated region fallthrough
CT: control target
= control target key end

     0   :  { %vm8_vm0 = vcmask 261120   ;;  %s40_s8 = smov 32   ;;  %s41_s9 = smov 64   ;;  %vm14_vm1 = vcmask 1048320   ;;  %vm20_vm2 = vcmask 785920   ;;  %vm26_vm3 = vcmask 523520   ;;  %s58_s0 = inlined_call_operand.vmem [shape: f32[4,32], index: 0, kind: input, shape index: {}]   ;;  %s59_s1 = inlined_call_operand.vmem [shape: f32[1,128], index: 1, kind: output, shape index: {}]  }
   0x1   :  { %v5_v0 = vld [vmem:[%s58_s0] sm:$0xf]  ;;  %s39_s0 = smov 96  }
   0x2   :  { %6 = vst [vmem:[#allocation1] sm:$0xf] %v5_v0 }
   0x9   :  { %v11_v1 = vld [vmem:[#allocation1 + $0x3] sm:$0x1]   ;;  %v23_v2 = vld [vmem:[#allocation1 + $0x1] sm:$0x1]   ;;  %v7_v3 = vld [vmem:[#allocation1] sm:$0x1]  }
   0xa   :  { %12 = vrot.lane.b32.xlu0 %v11_v1, %s39_s0  ;;  %24 = vrot.lane.b32.xlu1 %v23_v2, %s40_s8  ;;  %v17_v4 = vld [vmem:[#allocation1 + $0x2] sm:$0x1]   ;;  %9 = vst.msk [vmem:[#allocation0] sm:$0x1] %vm8_vm0, %v7_v3  }
   0xe   :  { %18 = vrot.lane.b32.xlu0 %v17_v4, %s41_s9 }
  0x7c   :  { %v13_v5 = vpop.permute.xlu0 %12   ;;  %v25_v6 = vpop.permute.xlu1 %24  }
  0x7d   :  { %15 = vst.msk [vmem:[#allocation0] sm:$0x1] %vm14_vm1, %v13_v5  }
  0x80   :  { %v19_v7 = vpop.permute.xlu0 %18  }
  0x81   :  { %21 = vst.msk [vmem:[#allocation0] sm:$0x1] %vm20_vm2, %v19_v7  }
  0x82   :  { %27 = vst.msk [vmem:[#allocation0] sm:$0x1] %vm26_vm3, %v25_v6  }
  0x89   :  { %v32_v8 = vld [vmem:[#allocation0] sm:$0x1] }
  0x8a   :  { %35 = vst [vmem:[%s59_s1] sm:$0x1] %v32_v8 }

// kernel: demo_net_forward.1
= control target key start
LH: loop header
LB: loop body
LE: loop exit
PB: predicated region body
PF: predicated region fallthrough
CT: control target
= control target key end

     0   :  { %vm291_vm0 = vcmask 326656   ;;  %vm328_vm1 = vcmask 1043456   ;;  %vm1663_vm2 = vcmask 523268   ;;  %vm1599_vm3 = vcmask 523264   ;;  %s9289_s29 = smov 64   ;;  %s12105_s1 = inlined_call_operand.vmem [shape: bf16[4,168,192], index: 1, kind: input, shape index: {}]   ;;  %s12106_s0 = inlined_call_operand.vmem [shape: bf16[2,6,16,168], index: 0, kind: input, shape index: {}]   ;;  %s12107_s3 = inlined_call_operand.vmem [shape: bf16[4,1152,128], index: 3, kind: input, shape index: {}]   ;;  %s12108_s2 = inlined_call_operand.vmem [shape: f32[1,192], index: 2, kind: input, shape index: {}]   ;;  %s12109_s5 = inlined_call_operand.vmem [shape: bf16[4,128,64], index: 5, kind: input, shape index: {}]   ;;  %s12110_s4 = inlined_call_operand.vmem [shape: f32[1,128], index: 4, kind: input, shape index: {}]   ;;  %s12111_s7 = inlined_call_operand.vmem [shape: bf16[64,128], index: 7, kind: input, shape index: {}]   ;;  %s12112_s6 = inlined_call_operand.vmem [shape: f32[1,64], index: 6, kind: input, shape index: {}]   ;;  %s12113_s8 = inlined_call_operand.vmem [shape: f32[1,128], index: 8, kind: input, shape index: {}]   ;;  %s12114_s9 = inlined_call_operand.vmem [shape: f32[16,128], index: 9, kind: output, shape index: {}]  }
   0x1   :  { %v8709_v0 = vld [vmem:[%s12105_s1 + $0x74] ss:$8 sps:$4 sm:$0xff]   ;;  %v8713_v2 = vld [vmem:[%s12105_s1 + $0x70] ss:$8 sps:$4 sm:$0xff]   ;;  %v8715_v4 = vld [vmem:[%s12105_s1 + $0x64] ss:$8 sps:$4 sm:$0xff]  }
   0x2   :  { %v8711_v1 = vld [vmem:[%s12105_s1 + $0x11c] ss:$8 sps:$4 sm:$0xff]   ;;  %335 = vmatprep.subr.bf16.mxu0 %v8709_v0  ;;  %v8714_v3 = vld [vmem:[%s12105_s1 + $0x118] ss:$8 sps:$4 sm:$0xff]   ;;  %v8717_v5 = vld [vmem:[%s12105_s1 + $0x10c] ss:$8 sps:$4 sm:$0xff]  }
   0x3   :  { %621 = vmatprep.subr.bf16.mxu1 %v8711_v1  ;;  %336 = vmatpush1.bf16.msra.mxu0 %v8713_v2  ;;  %v8719_v6 = vld [vmem:[%s12105_s1 + $0x60] ss:$8 sps:$4 sm:$0xff]   ;;  %v8721_v8 = vld [vmem:[%s12105_s1 + $0x54] ss:$8 sps:$4 sm:$0xff]   ;;  %v8725_v10 = vld [vmem:[%s12105_s1 + $0x50] ss:$8 sps:$4 sm:$0xff]  }
   0x4   :  { %622 = vmatpush1.bf16.msra.mxu1 %v8714_v3  ;;  %337 = vmatprep.subr.bf16.mxu0 %v8715_v4  ;;  %v8720_v7 = vld [vmem:[%s12105_s1 + $0x108] ss:$8 sps:$4 sm:$0xff]   ;;  %v8723_v9 = vld [vmem:[%s12105_s1 + $0xfc] ss:$8 sps:$4 sm:$0xff]   ;;  %v8726_v11 = vld [vmem:[%s12105_s1 + $0xf8] ss:$8 sps:$4 sm:$0xff]  }
   0x5   :  { %623 = vmatprep.subr.bf16.mxu1 %v8717_v5  ;;  %v8727_v12 = vld [vmem:[%s12105_s1 + $0x44] ss:$8 sps:$4 sm:$0xff]   ;;  %v8731_v14 = vld [vmem:[%s12105_s1 + $0x40] ss:$8 sps:$4 sm:$0xff]   ;;  %v8733_v16 = vld [vmem:[%s12105_s1 + $0x34] ss:$8 sps:$4 sm:$0xff]  }
   0x6   :  { %v8729_v13 = vld [vmem:[%s12105_s1 + $0xec] ss:$8 sps:$4 sm:$0xff]   ;;  %v8732_v15 = vld [vmem:[%s12105_s1 + $0xe8] ss:$8 sps:$4 sm:$0xff]   ;;  %v8735_v17 = vld [vmem:[%s12105_s1 + $0xdc] ss:$8 sps:$4 sm:$0xff]  }
   0x7   :  { %338 = vmatpush1.bf16.msra.mxu0 %v8719_v6  ;;  %v8737_v18 = vld [vmem:[%s12105_s1 + $0x30] ss:$8 sps:$4 sm:$0xff]   ;;  %v8739_v20 = vld [vmem:[%s12105_s1 + $0x24] ss:$8 sps:$4 sm:$0xff]   ;;  %v8743_v22 = vld [vmem:[%s12105_s1 + $0x20] ss:$8 sps:$4 sm:$0xff]  }
   0x8   :  { %624 = vmatpush1.bf16.msra.mxu1 %v8720_v7  ;;  %339 = vmatprep.subr.bf16.mxu0 %v8721_v8  ;;  %v8738_v19 = vld [vmem:[%s12105_s1 + $0xd8] ss:$8 sps:$4 sm:$0xff]   ;;  %v8741_v21 = vld [vmem:[%s12105_s1 + $0xcc] ss:$8 sps:$4 sm:$0xff]   ;;  %v8744_v23 = vld [vmem:[%s12105_s1 + $0xc8] ss:$8 sps:$4 sm:$0xff]  }
   0x9   :  { %625 = vmatprep.subr.bf16.mxu1 %v8723_v9  ;;  %v8745_v24 = vld [vmem:[%s12105_s1 + $0x14] ss:$8 sps:$4 sm:$0xff]   ;;  %v8749_v26 = vld [vmem:[%s12105_s1 + $0x10] ss:$8 sps:$4 sm:$0xff]   ;;  %v8751_v28 = vld [vmem:[%s12105_s1 + $0x4] ss:$8 sps:$4 sm:$0xff]  }
   0xa   :  { %v8747_v25 = vld [vmem:[%s12105_s1 + $0xbc] ss:$8 sps:$4 sm:$0xff]   ;;  %v8750_v27 = vld [vmem:[%s12105_s1 + $0xb8] ss:$8 sps:$4 sm:$0xff]   ;;  %v8753_v29 = vld [vmem:[%s12105_s1 + $0xac] ss:$8 sps:$4 sm:$0xff]  }
   0xb   :  { %340 = vmatpush1.bf16.msra.mxu0 %v8725_v10  ;;  %v77_v30 = vld [vmem:[%s12105_s1 + $0xa0] sm:$0xff]  ;;  %v6701_v31 = vld [vmem:[%s12105_s1 + $0x148] sm:$0xff]  ;;  %v8761_v39 = vld [vmem:[%s12105_s1 + $0x94] ss:$8 sps:$4 sm:$0xff]   ;;  %vm1750_vm5 = vcmask 1043968   ;;  %vm1751_vm6 = vcmask 1047556  }
   0xc   :  { %626 = vmatpush1.bf16.msra.mxu1 %v8726_v11  ;;  %341 = vmatprep.subr.bf16.mxu0 %v8727_v12  ;;  %v8755_v32 = vld [vmem:[%s12105_s1] ss:$8 sps:$4 sm:$0xff]   ;;  %v6667_v34 = vcombine.high %v77_v30, %v77_v30  ;;  %v9447_v35 = vld [vmem:[%s12106_s0 + $0x4] ss:$8 sps:$4 sm:$0xff]   ;;  %v6723_v36 = vcombine.high %v6701_v31, %v6701_v31  ;;  %v6666_v37 = vcombine.low %v77_v30, %v77_v30  ;;  %v8765_v43 = vld [vmem:[%s12105_s1 + $0x90] ss:$8 sps:$4 sm:$0xff]  }
   0xd   :  { %627 = vmatprep.subr.bf16.mxu1 %v8729_v13  ;;  %v8756_v33 = vld [vmem:[%s12105_s1 + $0xa8] ss:$8 sps:$4 sm:$0xff]   ;;  %v6722_v38 = vcombine.low %v6701_v31, %v6701_v31  ;;  %6669 = vmatprep.mubr.msk.bf16.mxu0 %vm291_vm0, %v9447_v35  ;;  %v8763_v42 = vld [vmem:[%s12105_s1 + $0x13c] ss:$8 sps:$4 sm:$0xff]   ;;  %v8766_v44 = vld [vmem:[%s12105_s1 + $0x138] ss:$8 sps:$4 sm:$0xff]  }
   0xe   :  { %6725 = vmatprep.mubr.msk.bf16.mxu1 %vm291_vm0, %v9447_v35  ;;  %v330_v40 = vsel %vm328_vm1, %v6666_v37, 0  ;;  %v8767_v45 = vld [vmem:[%s12105_s1 + $0x84] ss:$8 sps:$4 sm:$0xff]   ;;  %v8771_v47 = vld [vmem:[%s12105_s1 + $0x80] ss:$8 sps:$4 sm:$0xff]   ;;  %vm10175_vm4 = vmor %vm1663_vm2, %vm328_vm1  ;;  %vm9291_vm8 = vmmov 0  }
   0xf   :  { %342 = vmatpush1.bf16.msra.mxu0 %v8731_v14  ;;  %v616_v41 = vsel %vm328_vm1, %v6722_v38, 0  ;;  %v8769_v46 = vld [vmem:[%s12105_s1 + $0x12c] ss:$8 sps:$4 sm:$0xff]   ;;  %v8772_v48 = vld [vmem:[%s12105_s1 + $0x128] ss:$8 sps:$4 sm:$0xff]   ;;  %vm10542_vm7 = vmor %vm1751_vm6, %vm1750_vm5 }
  0x10   :  { %628 = vmatpush1.bf16.msra.mxu1 %v8732_v15  ;;  %343 = vmatprep.subr.bf16.mxu0 %v8733_v16  ;;  %v8778_v49 = vld [vmem:[%s12105_s1 + $0x1c4] ss:$8 sps:$4 sm:$0xff]   ;;  %v9490_v51 = vld [vmem:[%s12106_s0] ss:$8 sps:$4 sm:$0xff]   ;;  %v9501_v54 = vld [vmem:[%s12106_s0 + $0x14] ss:$8 sps:$4 sm:$0xff]  }
  0x11   :  { %629 = vmatprep.subr.bf16.mxu1 %v8735_v17  ;;  %v8781_v50 = vld [vmem:[%s12105_s1 + $0x26c] ss:$8 sps:$4 sm:$0xff]   ;;  %v8776_v52 = vld [vmem:[%s12105_s1 + $0x1c0] ss:$8 sps:$4 sm:$0xff]   ;;  %v8790_v56 = vld [vmem:[%s12105_s1 + $0x25c] ss:$8 sps:$4 sm:$0xff]  }
  0x12   :  { %v8779_v53 = vld [vmem:[%s12105_s1 + $0x268] ss:$8 sps:$4 sm:$0xff]   ;;  %v8787_v55 = vld [vmem:[%s12105_s1 + $0x1b4] ss:$8 sps:$4 sm:$0xff]   ;;  %v8788_v58 = vld [vmem:[%s12105_s1 + $0x258] ss:$8 sps:$4 sm:$0xff]  }
  0x13   :  { %344 = vmatpush1.bf16.msra.mxu0 %v8737_v18  ;;  %v8785_v57 = vld [vmem:[%s12105_s1 + $0x1b0] ss:$8 sps:$4 sm:$0xff]   ;;  %v8796_v59 = vld [vmem:[%s12105_s1 + $0x1a4] ss:$8 sps:$4 sm:$0xff]   ;;  %v8794_v63 = vld [vmem:[%s12105_s1 + $0x1a0] ss:$8 sps:$4 sm:$0xff]  }
  0x14   :  { %630 = vmatpush1.bf16.msra.mxu1 %v8738_v19  ;;  %345 = vmatprep.subr.bf16.mxu0 %v8739_v20  ;;  %v8799_v60 = vld [vmem:[%s12105_s1 + $0x24c] ss:$8 sps:$4 sm:$0xff]   ;;  %v9530_v61 = vld [vmem:[%s12106_s0 + $0x10] ss:$8 sps:$4 sm:$0xff]   ;;  %v8808_v2 = vld [vmem:[%s12105_s1 + $0x23c] ss:$8 sps:$4 sm:$0xff]  }
  0x15   :  { %631 = vmatprep.subr.bf16.mxu1 %v8741_v21  ;;  %v9535_v62 = vld [vmem:[%s12106_s0 + $0x24] ss:$8 sps:$4 sm:$0xff]   ;;  %v8797_v0 = vld [vmem:[%s12105_s1 + $0x248] ss:$8 sps:$4 sm:$0xff]   ;;  %v8805_v1 = vld [vmem:[%s12105_s1 + $0x194] ss:$8 sps:$4 sm:$0xff]  }
  0x16   :  { %v8803_v3 = vld [vmem:[%s12105_s1 + $0x190] ss:$8 sps:$4 sm:$0xff]   ;;  %v8814_v5 = vld [vmem:[%s12105_s1 + $0x184] ss:$8 sps:$4 sm:$0xff]   ;;  %v9570_v7 = vld [vmem:[%s12106_s0 + $0x20] ss:$8 sps:$4 sm:$0xff]  }
  0x17   :  { %346 = vmatpush1.bf16.msra.mxu0 %v8743_v22  ;;  %v8806_v4 = vld [vmem:[%s12105_s1 + $0x238] ss:$8 sps:$4 sm:$0xff]   ;;  %v8817_v6 = vld [vmem:[%s12105_s1 + $0x22c] ss:$8 sps:$4 sm:$0xff]   ;;  %v8815_v10 = vld [vmem:[%s12105_s1 + $0x228] ss:$8 sps:$4 sm:$0xff]  }
  0x18   :  { %632 = vmatpush1.bf16.msra.mxu1 %v8744_v23  ;;  %347 = vmatprep.subr.bf16.mxu0 %v8745_v24  ;;  %v9575_v8 = vld [vmem:[%s12106_s0 + $0x34] ss:$8 sps:$4 sm:$0xff]   ;;  %v8812_v9 = vld [vmem:[%s12105_s1 + $0x180] ss:$8 sps:$4 sm:$0xff]   ;;  %v9598_v13 = vld [vmem:[%s12106_s0 + $0x30] ss:$8 sps:$4 sm:$0xff]  }
  0x19   :  { %633 = vmatprep.subr.bf16.mxu1 %v8747_v25  ;;  %v8823_v11 = vld [vmem:[%s12105_s1 + $0x174] ss:$8 sps:$4 sm:$0xff]   ;;  %v8821_v14 = vld [vmem:[%s12105_s1 + $0x170] ss:$8 sps:$4 sm:$0xff]   ;;  %v8832_v16 = vld [vmem:[%s12105_s1 + $0x164] ss:$8 sps:$4 sm:$0xff]  }
  0x1a   :  { %v8826_v12 = vld [vmem:[%s12105_s1 + $0x21c] ss:$8 sps:$4 sm:$0xff]   ;;  %v8824_v15 = vld [vmem:[%s12105_s1 + $0x218] ss:$8 sps:$4 sm:$0xff]   ;;  %v8837_v17 = vld [vmem:[%s12105_s1 + $0x20c] ss:$8 sps:$4 sm:$0xff]  }
  0x1b   :  { %348 = vmatpush1.bf16.msra.mxu0 %v8749_v26  ;;  %v9615_v18 = vld [vmem:[%s12106_s0 + $0x44] ss:$8 sps:$4 sm:$0xff]   ;;  %v8830_v19 = vld [vmem:[%s12105_s1 + $0x160] ss:$8 sps:$4 sm:$0xff]   ;;  %v8841_v21 = vld [vmem:[%s12105_s1 + $0x154] ss:$8 sps:$4 sm:$0xff]  }
  0x1c   :  { %634 = vmatpush1.bf16.msra.mxu1 %v8750_v27  ;;  %349 = vmatprep.subr.bf16.mxu0 %v8751_v28  ;;  %v8835_v20 = vld [vmem:[%s12105_s1 + $0x208] ss:$8 sps:$4 sm:$0xff]   ;;  %v8847_v22 = vld [vmem:[%s12105_s1 + $0x1fc] ss:$8 sps:$4 sm:$0xff]   ;;  %v8845_v26 = vld [vmem:[%s12105_s1 + $0x1f8] ss:$8 sps:$4 sm:$0xff]  }
  0x1d   :  { %635 = vmatprep.subr.bf16.mxu1 %v8753_v29  ;;  %v6757_v23 = vld [vmem:[%s12105_s1 + $0x1f0] sm:$0xff]  ;;  %v6813_v24 = vld [vmem:[%s12105_s1 + $0x298] sm:$0xff]  ;;  %v9650_v31 = vld [vmem:[%s12106_s0 + $0x40] ss:$8 sps:$4 sm:$0xff]  }
  0x1e   :  { %v8839_v25 = vld [vmem:[%s12105_s1 + $0x150] ss:$8 sps:$4 sm:$0xff]   ;;  %v6779_v27 = vcombine.high %v6757_v23, %v6757_v23  ;;  %v6778_v28 = vcombine.low %v6757_v23, %v6757_v23  ;;  %v6835_v29 = vcombine.high %v6813_v24, %v6813_v24  ;;  %v6834_v30 = vcombine.low %v6813_v24, %v6813_v24  ;;  %v8863_v37 = vld [vmem:[%s12105_s1 + $0x28c] ss:$8 sps:$4 sm:$0xff]   ;;  %v8857_v38 = vld [vmem:[%s12105_s1 + $0x1e0] ss:$8 sps:$4 sm:$0xff]  }
  0x1f   :  { %350 = vmatpush1.bf16.msra.mxu0 %v8755_v32  ;;  %v9655_v32 = vld [vmem:[%s12106_s0 + $0x54] ss:$8 sps:$4 sm:$0xff]  }
  0x20   :  { %636 = vmatpush1.bf16.msra.mxu1 %v8756_v33  ;;  %6668 = vmatprep.subr.msk.bf16.mxu0 %vm328_vm1, %v6667_v34  ;;  %v950_v33 = vsel %vm328_vm1, %v6778_v28, 0  ;;  %v1284_v34 = vsel %vm328_vm1, %v6834_v30, 0 }
  0x21   :  { %6724 = vmatprep.subr.msk.bf16.mxu1 %vm328_vm1, %v6723_v36  ;;  %v8859_v36 = vld [vmem:[%s12105_s1 + $0x1e4] ss:$8 sps:$4 sm:$0xff]  }
  0x23   :  { %362 = vmatpush2.bf16.msra.mxu0 %v330_v40  ;;  %v8869_v40 = vld [vmem:[%s12105_s1 + $0x1d4] ss:$8 sps:$4 sm:$0xff]  }
  0x24   :  { %648 = vmatpush2.bf16.msra.mxu1 %v616_v41  ;;  %363 = vmatprep.subr.bf16.mxu0 %v8761_v39  ;;  %v8861_v39 = vld [vmem:[%s12105_s1 + $0x288] ss:$8 sps:$4 sm:$0xff]   ;;  %v8872_v41 = vld [vmem:[%s12105_s1 + $0x27c] ss:$8 sps:$4 sm:$0xff]  }
  0x25   :  { %649 = vmatprep.subr.bf16.mxu1 %v8763_v42  ;;  %v9688_v42 = vld [vmem:[%s12106_s0 + $0x50] ss:$8 sps:$4 sm:$0xff]  }
  0x27   :  { %364 = vmatpush2.bf16.msra.mxu0 %v8765_v43  ;;  %v9693_v43 = vld [vmem:[%s12106_s0 + $0x64] ss:$8 sps:$4 sm:$0xff]  }
  0x28   :  { %650 = vmatpush2.bf16.msra.mxu1 %v8766_v44  ;;  %365 = vmatprep.subr.bf16.mxu0 %v8767_v45  ;;  %v8867_v44 = vld [vmem:[%s12105_s1 + $0x1d0] ss:$8 sps:$4 sm:$0xff]  }
  0x29   :  { %651 = vmatprep.subr.bf16.mxu1 %v8769_v46  ;;  %v8870_v45 = vld [vmem:[%s12105_s1 + $0x278] ss:$8 sps:$4 sm:$0xff]  }
  0x2a   :  { %v8829_v46 = vld [vmem:[%s12106_s0 + $0x60] ss:$8 sps:$4 sm:$0xff]  }
  0x2b   :  { %366 = vmatpush2.bf16.msra.mxu0 %v8771_v47  ;;  %v8833_v47 = vld [vmem:[%s12106_s0 + $0x74] ss:$8 sps:$4 sm:$0xff]  }
  0x2c   :  { %652 = vmatpush2.bf16.msra.mxu1 %v8772_v48  ;;  %955 = vmatprep.subr.bf16.mxu0 %v8778_v49  ;;  %v8838_v48 = vld [vmem:[%s12106_s0 + $0x70] ss:$8 sps:$4 sm:$0xff]   ;;  %v8842_v49 = vld [vmem:[%s12106_s0 + $0x84] ss:$8 sps:$4 sm:$0xff]  }
  0x2d   :  { %1289 = vmatprep.subr.bf16.mxu1 %v8781_v50  ;;  %v8844_v50 = vld [vmem:[%s12106_s0 + $0x80] ss:$8 sps:$4 sm:$0xff]  }
  0x2e   :  { %368 = vmatmul.mubr.bf16.vlgmr.msra.gmra.mxu0 %v9490_v51 }
  0x2f   :  { %654 = vmatmul.mubr.bf16.vlgmr.msra.gmra.mxu1 %v9490_v51  ;;  %956 = vmatpush1.bf16.msra.mxu0 %v8776_v52  ;;  %v8849_v52 = vld [vmem:[%s12106_s0 + $0x94] ss:$8 sps:$4 sm:$0xff]  }
  0x30   :  { %1290 = vmatpush1.bf16.msra.mxu1 %v8779_v53  ;;  %6670 = vmatprep.mubr.msk.bf16.mxu0 %vm291_vm0, %v9501_v54  ;;  %v8852_v53 = vld [vmem:[%s12106_s0 + $0x90] ss:$8 sps:$4 sm:$0xff]  }
  0x31   :  { %6726 = vmatprep.mubr.msk.bf16.mxu1 %vm291_vm0, %v9501_v54  ;;  %957 = vmatprep.subr.bf16.mxu0 %v8787_v55  ;;  %v8855_v55 = vld [vmem:[%s12106_s0 + $0xa4] ss:$8 sps:$4 sm:$0xff]  }
  0x32   :  { %1291 = vmatprep.subr.bf16.mxu1 %v8790_v56  ;;  %v8860_v56 = vld [vmem:[%s12106_s0 + $0xa0] ss:$8 sps:$4 sm:$0xff]  }
  0x33   :  { %958 = vmatpush1.bf16.msra.mxu0 %v8785_v57  ;;  %v8864_v57 = vld [vmem:[%s12106_s0 + $0xb4] ss:$8 sps:$4 sm:$0xff]  }
  0x34   :  { %1292 = vmatpush1.bf16.msra.mxu1 %v8788_v58  ;;  %959 = vmatprep.subr.bf16.mxu0 %v8796_v59  ;;  %v8866_v58 = vld [vmem:[%s12106_s0 + $0xb0] ss:$8 sps:$4 sm:$0xff]  }
  0x35   :  { %1293 = vmatprep.subr.bf16.mxu1 %v8799_v60 }
  0x36   :  { %378 = vmatmul.mubr.bf16.gmra.mxu0 %v9530_v61 }
  0x37   :  { %664 = vmatmul.mubr.bf16.gmra.mxu1 %v9530_v61  ;;  %6671 = vmatprep.mubr.msk.bf16.mxu0 %vm291_vm0, %v9535_v62 }
  0x38   :  { %6727 = vmatprep.mubr.msk.bf16.mxu1 %vm291_vm0, %v9535_v62  ;;  %960 = vmatpush1.bf16.msra.mxu0 %v8794_v63 }
  0x39   :  { %1294 = vmatpush1.bf16.msra.mxu1 %v8797_v0  ;;  %961 = vmatprep.subr.bf16.mxu0 %v8805_v1 }
  0x3a   :  { %1295 = vmatprep.subr.bf16.mxu1 %v8808_v2 }
  0x3c   :  { %962 = vmatpush1.bf16.msra.mxu0 %v8803_v3 }
  0x3d   :  { %1296 = vmatpush1.bf16.msra.mxu1 %v8806_v4  ;;  %963 = vmatprep.subr.bf16.mxu0 %v8814_v5 }
  0x3e   :  { %1297 = vmatprep.subr.bf16.mxu1 %v8817_v6  ;;  %388 = vmatmul.mubr.bf16.gmra.mxu0 %v9570_v7 }
  0x3f   :  { %674 = vmatmul.mubr.bf16.gmra.mxu1 %v9570_v7  ;;  %6672 = vmatprep.mubr.msk.bf16.mxu0 %vm291_vm0, %v9575_v8 }
  0x40   :  { %6728 = vmatprep.mubr.msk.bf16.mxu1 %vm291_vm0, %v9575_v8  ;;  %964 = vmatpush1.bf16.msra.mxu0 %v8812_v9 }
  0x41   :  { %1298 = vmatpush1.bf16.msra.mxu1 %v8815_v10  ;;  %965 = vmatprep.subr.bf16.mxu0 %v8823_v11 }
  0x42   :  { %1299 = vmatprep.subr.bf16.mxu1 %v8826_v12 }
  0x44   :  { %966 = vmatpush1.bf16.msra.mxu0 %v8821_v14 }
  0x45   :  { %1300 = vmatpush1.bf16.msra.mxu1 %v8824_v15  ;;  %967 = vmatprep.subr.bf16.mxu0 %v8832_v16 }
  0x46   :  { %1301 = vmatprep.subr.bf16.mxu1 %v8837_v17  ;;  %398 = vmatmul.mubr.bf16.gmra.mxu0 %v9598_v13 }
  0x47   :  { %684 = vmatmul.mubr.bf16.gmra.mxu1 %v9598_v13  ;;  %6673 = vmatprep.mubr.msk.bf16.mxu0 %vm291_vm0, %v9615_v18 }
  0x48   :  { %6729 = vmatprep.mubr.msk.bf16.mxu1 %vm291_vm0, %v9615_v18  ;;  %968 = vmatpush1.bf16.msra.mxu0 %v8830_v19 }
  0x49   :  { %1302 = vmatpush1.bf16.msra.mxu1 %v8835_v20  ;;  %969 = vmatprep.subr.bf16.mxu0 %v8841_v21 }
  0x4a   :  { %1303 = vmatprep.subr.bf16.mxu1 %v8847_v22 }
  0x4c   :  { %970 = vmatpush1.bf16.msra.mxu0 %v8839_v25 }
  0x4d   :  { %1304 = vmatpush1.bf16.msra.mxu1 %v8845_v26  ;;  %6780 = vmatprep.subr.msk.bf16.mxu0 %vm328_vm1, %v6779_v27 }
  0x4e   :  { %6836 = vmatprep.subr.msk.bf16.mxu1 %vm328_vm1, %v6835_v29  ;;  %408 = vmatmul.mubr.bf16.gmra.mxu0 %v9650_v31 }
  0x4f   :  { %694 = vmatmul.mubr.bf16.gmra.mxu1 %v9650_v31  ;;  %6674 = vmatprep.mubr.msk.bf16.mxu0 %vm291_vm0, %v9655_v32 }
  0x50   :  { %6730 = vmatprep.mubr.msk.bf16.mxu1 %vm291_vm0, %v9655_v32  ;;  %982 = vmatpush2.bf16.msra.mxu0 %v950_v33 }
  0x51   :  { %1316 = vmatpush2.bf16.msra.mxu1 %v1284_v34  ;;  %983 = vmatprep.subr.bf16.mxu0 %v8859_v36 }
  0x52   :  { %1317 = vmatprep.subr.bf16.mxu1 %v8863_v37 }
  0x54   :  { %984 = vmatpush2.bf16.msra.mxu0 %v8857_v38 }
  0x55   :  { %1318 = vmatpush2.bf16.msra.mxu1 %v8861_v39  ;;  %985 = vmatprep.subr.bf16.mxu0 %v8869_v40 }
  0x56   :  { %1319 = vmatprep.subr.bf16.mxu1 %v8872_v41  ;;  %418 = vmatmul.mubr.bf16.gmra.mxu0 %v9688_v42 }
  0x57   :  { %704 = vmatmul.mubr.bf16.gmra.mxu1 %v9688_v42  ;;  %6675 = vmatprep.mubr.msk.bf16.mxu0 %vm291_vm0, %v9693_v43 }
  0x58   :  { %6731 = vmatprep.mubr.msk.bf16.mxu1 %vm291_vm0, %v9693_v43  ;;  %986 = vmatpush2.bf16.msra.mxu0 %v8867_v44 }
  0x59   :  { %1320 = vmatpush2.bf16.msra.mxu1 %v8870_v45 }
  0x5e   :  { %428 = vmatmul.mubr.bf16.gmra.mxu0 %v8829_v46 }
  0x5f   :  { %714 = vmatmul.mubr.bf16.gmra.mxu1 %v8829_v46  ;;  %6676 = vmatprep.mubr.msk.bf16.mxu0 %vm291_vm0, %v8833_v47 }
  0x60   :  { %6732 = vmatprep.mubr.msk.bf16.mxu1 %vm291_vm0, %v8833_v47 }
  0x66   :  { %438 = vmatmul.mubr.bf16.gmra.mxu0 %v8838_v48 }
  0x67   :  { %724 = vmatmul.mubr.bf16.gmra.mxu1 %v8838_v48  ;;  %6677 = vmatprep.mubr.msk.bf16.mxu0 %vm291_vm0, %v8842_v49 }
  0x68   :  { %6733 = vmatprep.mubr.msk.bf16.mxu1 %vm291_vm0, %v8842_v49 }
  0x6e   :  { %448 = vmatmul.mubr.bf16.gmra.mxu0 %v8844_v50 }
  0x6f   :  { %734 = vmatmul.mubr.bf16.gmra.mxu1 %v8844_v50  ;;  %6678 = vmatprep.mubr.msk.bf16.mxu0 %vm291_vm0, %v8849_v52 }
  0x70   :  { %6734 = vmatprep.mubr.msk.bf16.mxu1 %vm291_vm0, %v8849_v52 }
  0x76   :  { %458 = vmatmul.mubr.bf16.gmra.mxu0 %v8852_v53 }
  0x77   :  { %744 = vmatmul.mubr.bf16.gmra.mxu1 %v8852_v53  ;;  %6679 = vmatprep.mubr.msk.bf16.mxu0 %vm291_vm0, %v8855_v55 }
  0x78   :  { %6735 = vmatprep.mubr.msk.bf16.mxu1 %vm291_vm0, %v8855_v55 }
  0x7e   :  { %468 = vmatmul.mubr.bf16.gmra.mxu0 %v8860_v56 }
  0x7f   :  { %754 = vmatmul.mubr.bf16.gmra.mxu1 %v8860_v56  ;;  %6680 = vmatprep.mubr.msk.bf16.mxu0 %vm291_vm0, %v8864_v57 }
  0x80   :  { %6736 = vmatprep.mubr.msk.bf16.mxu1 %vm291_vm0, %v8864_v57 }
  0x86   :  { %478 = vmatmul.mubr.bf16.gmra.mxu0 %v8866_v58 }
  0x87   :  { %764 = vmatmul.mubr.bf16.gmra.mxu1 %v8866_v58  ;;  %6781 = vmatprep.mubr.msk.bf16.mxu0 %vm291_vm0, %v9447_v35 }
  0x88   :  { %6837 = vmatprep.mubr.msk.bf16.mxu1 %vm291_vm0, %v9447_v35 }
  0x8e   :  { %988 = vmatmul.mubr.bf16.vlgmr.msra.gmra.mxu0 %v9490_v51 }
  0x8f   :  { %1322 = vmatmul.mubr.bf16.vlgmr.msra.gmra.mxu1 %v9490_v51  ;;  %6782 = vmatprep.mubr.msk.bf16.mxu0 %vm291_vm0, %v9501_v54 }
  0x90   :  { %6838 = vmatprep.mubr.msk.bf16.mxu1 %vm291_vm0, %v9501_v54 }
  0x96   :  { %998 = vmatmul.mubr.bf16.gmra.mxu0 %v9530_v61 }
  0x97   :  { %1332 = vmatmul.mubr.bf16.gmra.mxu1 %v9530_v61  ;;  %6783 = vmatprep.mubr.msk.bf16.mxu0 %vm291_vm0, %v9535_v62 }
  0x98   :  { %6839 = vmatprep.mubr.msk.bf16.mxu1 %vm291_vm0, %v9535_v62 }
  0x9e   :  { %1008 = vmatmul.mubr.bf16.gmra.mxu0 %v9570_v7 }
  0x9f   :  { %1342 = vmatmul.mubr.bf16.gmra.mxu1 %v9570_v7  ;;  %6784 = vmatprep.mubr.msk.bf16.mxu0 %vm291_vm0, %v9575_v8 }
  0xa0   :  { %6840 = vmatprep.mubr.msk.bf16.mxu1 %vm291_vm0, %v9575_v8 }
  0xa6   :  { %1018 = vmatmul.mubr.bf16.gmra.mxu0 %v9598_v13 }
  0xa7   :  { %1352 = vmatmul.mubr.bf16.gmra.mxu1 %v9598_v13  ;;  %6785 = vmatprep.mubr.msk.bf16.mxu0 %vm291_vm0, %v9615_v18 }
  0xa8   :  { %6841 = vmatprep.mubr.msk.bf16.mxu1 %vm291_vm0, %v9615_v18 }
  0xae   :  { %1028 = vmatmul.mubr.bf16.gmra.mxu0 %v9650_v31 }
  0xaf   :  { %1362 = vmatmul.mubr.bf16.gmra.mxu1 %v9650_v31  ;;  %6786 = vmatprep.mubr.msk.bf16.mxu0 %vm291_vm0, %v9655_v32 }
  0xb0   :  { %6842 = vmatprep.mubr.msk.bf16.mxu1 %vm291_vm0, %v9655_v32 }
  0xb6   :  { %1038 = vmatmul.mubr.bf16.gmra.mxu0 %v9688_v42 }
  0xb7   :  { %1372 = vmatmul.mubr.bf16.gmra.mxu1 %v9688_v42  ;;  %6787 = vmatprep.mubr.msk.bf16.mxu0 %vm291_vm0, %v9693_v43 }
  0xb8   :  { %6843 = vmatprep.mubr.msk.bf16.mxu1 %vm291_vm0, %v9693_v43 }
  0xbe   :  { %1048 = vmatmul.mubr.bf16.gmra.mxu0 %v8829_v46 }
  0xbf   :  { %1382 = vmatmul.mubr.bf16.gmra.mxu1 %v8829_v46  ;;  %6788 = vmatprep.mubr.msk.bf16.mxu0 %vm291_vm0, %v8833_v47 }
  0xc0   :  { %6844 = vmatprep.mubr.msk.bf16.mxu1 %vm291_vm0, %v8833_v47 }
  0xc6   :  { %1058 = vmatmul.mubr.bf16.gmra.mxu0 %v8838_v48 }
  0xc7   :  { %1392 = vmatmul.mubr.bf16.gmra.mxu1 %v8838_v48  ;;  %6789 = vmatprep.mubr.msk.bf16.mxu0 %vm291_vm0, %v8842_v49 }
  0xc8   :  { %6845 = vmatprep.mubr.msk.bf16.mxu1 %vm291_vm0, %v8842_v49 }
  0xce   :  { %1068 = vmatmul.mubr.bf16.gmra.mxu0 %v8844_v50 }
  0xcf   :  { %1402 = vmatmul.mubr.bf16.gmra.mxu1 %v8844_v50  ;;  %6790 = vmatprep.mubr.msk.bf16.mxu0 %vm291_vm0, %v8849_v52 }
  0xd0   :  { %6846 = vmatprep.mubr.msk.bf16.mxu1 %vm291_vm0, %v8849_v52 }
  0xd6   :  { %1078 = vmatmul.mubr.bf16.gmra.mxu0 %v8852_v53 }
  0xd7   :  { %1412 = vmatmul.mubr.bf16.gmra.mxu1 %v8852_v53  ;;  %6791 = vmatprep.mubr.msk.bf16.mxu0 %vm291_vm0, %v8855_v55 }
  0xd8   :  { %6847 = vmatprep.mubr.msk.bf16.mxu1 %vm291_vm0, %v8855_v55 }
  0xde   :  { %1088 = vmatmul.mubr.bf16.gmra.mxu0 %v8860_v56 }
  0xdf   :  { %1422 = vmatmul.mubr.bf16.gmra.mxu1 %v8860_v56  ;;  %6792 = vmatprep.mubr.msk.bf16.mxu0 %vm291_vm0, %v8864_v57 }
  0xe0   :  { %6848 = vmatprep.mubr.msk.bf16.mxu1 %vm291_vm0, %v8864_v57 }
  0xe6   :  { %1098 = vmatmul.mubr.bf16.gmra.mxu0 %v8866_v58 }
  0xe7   :  { %1432 = vmatmul.mubr.bf16.gmra.mxu1 %v8866_v58 }
  0xee   :  { %v9800_v35 = vpop.f32.mrf.mxu0 }
  0xef   :  { %v9802_v51 = vpop.f32.mrf.mxu1 }
  0xf0   :  { %v9806_v59 = vpop.f32.mrf.mxu0 }
  0xf1   :  { %v9808_v60 = vpop.f32.mrf.mxu1 }
  0xf2   :  { %v9812_v62 = vpop.f32.mrf.mxu0 }
  0xf3   :  { %v9814_v63 = vpop.f32.mrf.mxu1 }
  0xf4   :  { %v9818_v1 = vpop.f32.mrf.mxu0 }
  0xf5   :  { %v9820_v2 = vpop.f32.mrf.mxu1 }
  0xf6   :  { %v9822_v3 = vpop.f32.mrf.mxu0 }
  0xf7   :  { %v9824_v4 = vpop.f32.mrf.mxu1 }
  0xf8   :  { %v9828_v6 = vpop.f32.mrf.mxu0 }
  0xf9   :  { %v9830_v7 = vpop.f32.mrf.mxu1 }
  0xfa   :  { %v9834_v9 = vpop.f32.mrf.mxu0 }
  0xfb   :  { %v9836_v10 = vpop.f32.mrf.mxu1 }
  0xfc   :  { %v9840_v12 = vpop.f32.mrf.mxu0 }
  0xfd   :  { %v9842_v13 = vpop.f32.mrf.mxu1 }
  0xfe   :  { %v9844_v14 = vpop.f32.mrf.mxu0 }
  0xff   :  { %v9846_v15 = vpop.f32.mrf.mxu1 }
 0x100   :  { %v9850_v17 = vpop.f32.mrf.mxu0 }
 0x101   :  { %v9852_v18 = vpop.f32.mrf.mxu1 }
 0x102   :  { %v9856_v20 = vpop.f32.mrf.mxu0 }
 0x103   :  { %v9858_v21 = vpop.f32.mrf.mxu1 }
 0x104   :  { %v9862_v23 = vpop.f32.mrf.mxu0 }
 0x105   :  { %v9864_v24 = vpop.f32.mrf.mxu1 }
 0x106   :  { %v9866_v25 = vpop.f32.mrf.mxu0 }
 0x107   :  { %v9868_v26 = vpop.f32.mrf.mxu1 }
 0x108   :  { %v9872_v28 = vpop.f32.mrf.mxu0 }
 0x109   :  { %v9874_v29 = vpop.f32.mrf.mxu1 }
 0x10a   :  { %v9878_v31 = vpop.f32.mrf.mxu0 }
 0x10b   :  { %v9880_v32 = vpop.f32.mrf.mxu1 }
 0x10c   :  { %v9884_v34 = vpop.f32.mrf.mxu0 }
 0x10d   :  { %v9886_v36 = vpop.f32.mrf.mxu1 }
 0x10e   :  { %v9888_v37 = vpop.f32.mrf.mxu0 }
 0x10f   :  { %v9890_v38 = vpop.f32.mrf.mxu1 }
 0x110   :  { %v9894_v40 = vpop.f32.mrf.mxu0 }
 0x111   :  { %v9896_v41 = vpop.f32.mrf.mxu1 }
 0x112   :  { %v9900_v43 = vpop.f32.mrf.mxu0 }
 0x113   :  { %v9902_v44 = vpop.f32.mrf.mxu1 }
 0x114   :  { %v9906_v46 = vpop.f32.mrf.mxu0 }
 0x115   :  { %v9908_v47 = vpop.f32.mrf.mxu1 }
 0x116   :  { %v9910_v48 = vpop.f32.mrf.mxu0 }
 0x117   :  { %v9912_v49 = vpop.f32.mrf.mxu1 }
 0x118   :  { %v9916_v52 = vpop.f32.mrf.mxu0 }
 0x119   :  { %v9918_v53 = vpop.f32.mrf.mxu1 }
 0x11a   :  { %v9922_v56 = vpop.f32.mrf.mxu0 }
 0x11b   :  { %v9924_v57 = vpop.f32.mrf.mxu1 }
 0x11c   :  { %v9928_v45 = vpop.f32.mrf.mxu0 }
 0x11d   :  { %12153 = vst [vmem:[#allocation4_spill] sm:$0xff] %v9928_v45  ;;  %v9930_v42 = vpop.f32.mrf.mxu1 }
 0x11e   :  { %v9932_v39 = vpop.f32.mrf.mxu0 }
 0x11f   :  { %12154 = vst [vmem:[#allocation5_spill] sm:$0xff] %v9932_v39  ;;  %v9934_v50 = vpop.f32.mrf.mxu1  ;;  %v8879_v39 = vld [vmem:[%s12107_s3 + $0x68] sm:$0xff]  }
 0x120   :  { %12155 = vst [vmem:[#allocation6_spill] sm:$0xff] %v9934_v50  ;;  %v9938_v30 = vpop.f32.mrf.mxu0 }
 0x121   :  { %12156 = vst [vmem:[#allocation7_spill] sm:$0xff] %v9938_v30  ;;  %v9940_v55 = vpop.f32.mrf.mxu1 }
 0x122   :  { %12157 = vst [vmem:[#allocation8_spill] sm:$0xff] %v9940_v55  ;;  %v9944_v22 = vpop.f32.mrf.mxu0 }
 0x123   :  { %12158 = vst [vmem:[#allocation9_spill] sm:$0xff] %v9944_v22  ;;  %v9946_v58 = vpop.f32.mrf.mxu1 }
 0x124   :  { %12159 = vst [vmem:[#allocation10_spill] sm:$0xff] %v9946_v58  ;;  %v9950_v16 = vpop.f32.mrf.mxu0 }
 0x125   :  { %12160 = vst [vmem:[#allocation11_spill] sm:$0xff] %v9950_v16  ;;  %v9952_v11 = vpop.f32.mrf.mxu1 }
 0x126   :  { %12161 = vst [vmem:[#allocation12_spill] sm:$0xff] %v9952_v11  ;;  %v9954_v8 = vpop.f32.mrf.mxu0 }
 0x127   :  { %12162 = vst [vmem:[#allocation13_spill] sm:$0xff] %v9954_v8  ;;  %v9956_v33 = vpop.f32.mrf.mxu1 }
 0x128   :  { %12163 = vst [vmem:[#allocation14_spill] sm:$0xff] %v9956_v33  ;;  %v9960_v0 = vpop.f32.mrf.mxu0 }
 0x129   :  { %12164 = vst [vmem:[#allocation15_spill] sm:$0xff] %v9960_v0  ;;  %v9962_v27 = vpop.f32.mrf.mxu1 }
 0x12a   :  { %12165 = vst [vmem:[#allocation16_spill] sm:$0xff] %v9962_v27  ;;  %v9966_v54 = vpop.f32.mrf.mxu0 }
 0x12b   :  { %12166 = vst [vmem:[#allocation17_spill] sm:$0xff] %v9966_v54  ;;  %v9968_v19 = vpop.f32.mrf.mxu1 }
 0x12c   :  { %12167 = vst [vmem:[#allocation18_spill] sm:$0xff] %v9968_v19  ;;  %v9972_v11 = vpop.f32.mrf.mxu0  ;;  %v8873_v19 = vld [vmem:[%s12107_s3 + $0x78] sm:$0xff]  }
 0x12d   :  { %12168 = vst [vmem:[#allocation19_spill] sm:$0xff] %v9972_v11  ;;  %v9974_v58 = vpop.f32.mrf.mxu1  ;;  %7789 = vmatprep.subr.bf16.mxu0 %v8873_v19 }
 0x12e   :  { %12169 = vst [vmem:[#allocation20_spill] sm:$0xff] %v9974_v58  ;;  %v9976_v22 = vpop.f32.mrf.mxu0 }
 0x12f   :  { %12170 = vst [vmem:[#allocation21_spill] sm:$0xff] %v9976_v22  ;;  %v9978_v5 = vpop.f32.mrf.mxu1  ;;  %v8874_v22 = vld [vmem:[%s12107_s3 + $0x38] sm:$0xff]  }
 0x130   :  { %12171 = vst [vmem:[#allocation22_spill] sm:$0xff] %v9978_v5  ;;  %v9982_v8 = vpop.f32.mrf.mxu0  ;;  %v1492_v5 = vlaneseq  ;;  %7790 = vmatpush3.bf16.msra.mxu0 %v8874_v22  ;;  %v8878_v22 = vld [vmem:[%s12107_s3 + $0xb8] sm:$0xff]  }
 0x131   :  { %12172 = vst [vmem:[#allocation23_spill] sm:$0xff] %v9982_v8  ;;  %v9984_v61 = vpop.f32.mrf.mxu1 }
 0x132   :  { %12173 = vst [vmem:[#allocation24_spill] sm:$0xff] %v9984_v61  ;;  %v9988_v0 = vpop.f32.mrf.mxu0 }
 0x133   :  { %12174 = vst [vmem:[#allocation25_spill] sm:$0xff] %v9988_v0  ;;  %v9990_v16 = vpop.f32.mrf.mxu1 }
 0x134   :  { %12175 = vst [vmem:[#allocation26_spill] sm:$0xff] %v9990_v16  ;;  %v9994_v54 = vpop.f32.mrf.mxu0 }
 0x135   :  { %12176 = vst [vmem:[#allocation27_spill] sm:$0xff] %v9994_v54  ;;  %v9996_v11 = vpop.f32.mrf.mxu1  ;;  %v1493_v54 = vshrl.u32 %v1492_v5, 7  ;;  %v8875_v5 = vld [vmem:[%s12107_s3 + $0x70] sm:$0xff]  }
 0x136   :  { %12177 = vst [vmem:[#allocation28_spill] sm:$0xff] %v9996_v11  ;;  %v9998_v58 = vpop.f32.mrf.mxu0  ;;  %7791 = vmatprep.subr.bf16.mxu0 %v8875_v5  ;;  %v8880_v5 = vld [vmem:[%s12107_s3 + $0x28] sm:$0xff]  }
 0x137   :  { %12178 = vst [vmem:[#allocation29_spill] sm:$0xff] %v9998_v58  ;;  %v10000_v33 = vpop.f32.mrf.mxu1 }
 0x138   :  { %12179 = vst [vmem:[#allocation30_spill] sm:$0xff] %v10000_v33  ;;  %v10004_v27 = vpop.f32.mrf.mxu0  ;;  %v8876_v33 = vld [vmem:[%s12107_s3 + $0x30] sm:$0xff]  }
 0x139   :  { %12180 = vst [vmem:[#allocation31_spill] sm:$0xff] %v10004_v27  ;;  %v10006_v61 = vpop.f32.mrf.mxu1  ;;  %7792 = vmatpush3.bf16.msra.mxu0 %v8876_v33 }
 0x13a   :  { %12181 = vst [vmem:[#allocation32_spill] sm:$0xff] %v10006_v61  ;;  %v10013_v16 = vpop.f32.mrf.mxu0  ;;  %7793 = vmatprep.subr.bf16.mxu0 %v8879_v39 }
 0x13b   :  { %12182 = vst [vmem:[#allocation33_spill] sm:$0xff] %v10013_v16  ;;  %v10015_v0 = vpop.f32.mrf.mxu1 }
 0x13c   :  { %12183 = vst [vmem:[#allocation34_spill] sm:$0xff] %v10015_v0  ;;  %v10022_v58 = vpop.f32.mrf.mxu0 }
 0x13d   :  { %12184 = vst [vmem:[#allocation35_spill] sm:$0xff] %v10022_v58  ;;  %v10024_v8 = vpop.f32.mrf.mxu1  ;;  %7794 = vmatpush3.bf16.msra.mxu0 %v8880_v5 }
 0x13e   :  { %12185 = vst [vmem:[#allocation36_spill] sm:$0xff] %v10024_v8  ;;  %v10026_v61 = vpop.f32.mrf.mxu0  ;;  %v1494_v8 = vsub.s32 0, %v1493_v54 }
 0x13f   :  { %12186 = vst [vmem:[#allocation37_spill] sm:$0xff] %v10026_v61  ;;  %v10028_v27 = vpop.f32.mrf.mxu1 }
 0x140   :  { %12187 = vst [vmem:[#allocation38_spill] sm:$0xff] %v10028_v27  ;;  %v10032_v11 = vpop.f32.mrf.mxu0 }
 0x141   :  { %12188 = vst [vmem:[#allocation39_spill] sm:$0xff] %v10032_v11  ;;  %v10034_v55 = vpop.f32.mrf.mxu1  ;;  %v1498_v11 = vsub.s32 1, %v1493_v54  ;;  %v12202_v54 = vmax.f32 %v9800_v35, %v9802_v51  ;;  %v12203_v35 = vmax.f32 %v9806_v59, %v9808_v60  ;;  %v8885_v59 = vld [vmem:[%s12107_s3 + $0xe8] sm:$0xff]  }
 0x142   :  { %12189 = vst [vmem:[#allocation40_spill] sm:$0xff] %v10034_v55  ;;  %v10038_v19 = vpop.f32.mrf.mxu0  ;;  %v8877_v55 = vld [vmem:[%s12107_s3 + $0xf8] sm:$0xff]  }
 0x143   :  { %12190 = vst [vmem:[#allocation41_spill] sm:$0xff] %v10038_v19  ;;  %v10040_v0 = vpop.f32.mrf.mxu1  ;;  %7829 = vmatprep.subr.bf16.mxu1 %v8877_v55  ;;  %v1490_v55 = vld [vmem:[%s12108_s2] sm:$0x3] }
 0x144   :  { %12191 = vst [vmem:[#allocation42_spill] sm:$0xff] %v10040_v0  ;;  %v10044_v16 = vpop.f32.mrf.mxu0  ;;  %7830 = vmatpush3.bf16.msra.mxu1 %v8878_v22 }
 0x145   :  { %12192 = vst [vmem:[#allocation43_spill] sm:$0xff] %v10044_v16  ;;  %v10046_v58 = vpop.f32.mrf.mxu1 }
 0x146   :  { %12193 = vst [vmem:[#allocation44_spill] sm:$0xff] %v10046_v58  ;;  %v10060_v0 = vpop.f32.mrf.mxu0 }
 0x147   :  { %12194 = vst [vmem:[#allocation45_spill] sm:$0xff] %v10060_v0  ;;  %v10062_v19 = vpop.f32.mrf.mxu1 }
 0x148   :  { %12195 = vst [vmem:[#allocation46_spill] sm:$0xff] %v10062_v19  ;;  %v10066_v58 = vpop.f32.mrf.mxu0 }
 0x149   :  { %12196 = vst [vmem:[#allocation47_spill] sm:$0xff] %v10066_v58  ;;  %v10068_v27 = vpop.f32.mrf.mxu1  ;;  %v10088_v58 = vrot.slane %v1490_v55, %v1494_v8  ;;  %v10102_v8 = vrot.slane %v1490_v55, %v1498_v11  ;;  %v12204_v11 = vmax.f32 %v9812_v62, %v9814_v63  ;;  %v8889_v62 = vld [vmem:[%s12107_s3 + $0xe0] sm:$0xff]  }
 0x14a   :  { %12197 = vst [vmem:[#allocation48_spill] sm:$0xff] %v10068_v27  ;;  %v10072_v61 = vpop.f32.mrf.mxu0 }
 0x14b   :  { %12198 = vst [vmem:[#allocation49_spill] sm:$0xff] %v10072_v61  ;;  %v10074_v30 = vpop.f32.mrf.mxu1 }
 0x14c   :  { %12199 = vst [vmem:[#allocation50_spill] sm:$0xff] %v10074_v30  ;;  %v10081_v33 = vpop.f32.mrf.mxu0  ;;  %v8881_v30 = vld [vmem:[%s12107_s3 + $0xf0] sm:$0xff]  }
 0x14d   :  { %12200 = vst [vmem:[#allocation51_spill] sm:$0xff] %v10081_v33  ;;  %v10083_v22 = vpop.f32.mrf.mxu1  ;;  %v777_v33 = vmax.f32 %v9818_v1, %v9820_v2  ;;  %7831 = vmatprep.subr.bf16.mxu1 %v8881_v30  ;;  %v8884_v1 = vld [vmem:[%s12107_s3 + $0x20] sm:$0xff]   ;;  %v8886_v2 = vld [vmem:[%s12107_s3 + $0xa8] sm:$0xff]  }
 0x14e   :  { %12201 = vst [vmem:[#allocation52_spill] sm:$0xff] %v10083_v22  ;;  %v989_v16 = vpop.f32.mrf.mxu0 }
 0x14f   :  { %v1323_v19 = vpop.f32.mrf.mxu1  ;;  %v1108_v27 = vmax.f32 %v12202_v54, %v989_v16  ;;  %v8882_v16 = vld [vmem:[%s12107_s3 + $0xb0] sm:$0xff]   ;;  %v8883_v54 = vld [vmem:[%s12107_s3 + $0x60] sm:$0xff]  }
 0x150   :  { %v991_v0 = vpop.f32.mrf.mxu0  ;;  %7832 = vmatpush3.bf16.msra.mxu1 %v8882_v16  ;;  %7795 = vmatprep.subr.bf16.mxu0 %v8883_v54  ;;  %v8891_v16 = vld [vmem:[%s12107_s3 + $0x50] sm:$0xff]  }
 0x151   :  { %v1325_v50 = vpop.f32.mrf.mxu1  ;;  %v1442_v61 = vmax.f32 %v1108_v27, %v1323_v19  ;;  %v1109_v51 = vmax.f32 %v12203_v35, %v991_v0  ;;  %7833 = vmatprep.subr.bf16.mxu1 %v8885_v59  ;;  %v8888_v35 = vld [vmem:[%s12107_s3 + $0x18] sm:$0xff]   ;;  %v12205_v59 = vmax.f32 %v9822_v3, %v9824_v4  ;;  %7796 = vmatpush3.bf16.msra.mxu0 %v8884_v1  ;;  %v8892_v1 = vld [vmem:[%s12107_s3 + $0x10] sm:$0xff]  }
 0x152   :  { %v993_v22 = vpop.f32.mrf.mxu0  ;;  %v12206_v3 = vmax.f32 %v9828_v6, %v9830_v7 }
 0x153   :  { %v1327_v45 = vpop.f32.mrf.mxu1  ;;  %v1502_v60 = vadd.f32 %v10088_v58, %v1442_v61  ;;  %v1443_v0 = vmax.f32 %v1109_v51, %v1325_v50  ;;  %v1110_v27 = vmax.f32 %v12204_v11, %v993_v22  ;;  %v8887_v61 = vld [vmem:[%s12107_s3 + $0x58] sm:$0xff]   ;;  %v8890_v51 = vld [vmem:[%s12107_s3 + $0xa0] sm:$0xff]  }
 0x154   :  { %v995_v30 = vpop.f32.mrf.mxu0  ;;  %7834 = vmatpush3.bf16.msra.mxu1 %v8886_v2  ;;  %7797 = vmatprep.subr.bf16.mxu0 %v8887_v61  ;;  %v8894_v2 = vld [vmem:[%s12107_s3 + $0x98] sm:$0xff]   ;;  %v781_v61 = vmax.f32 %v9840_v12, %v9842_v13  ;;  %v8897_v12 = vld [vmem:[%s12107_s3 + $0xd0] sm:$0xff]  }
 0x155   :  { %v1329_v39 = vpop.f32.mrf.mxu1  ;;  %v1550_v63 = vmax.f32 %v1502_v60, 0.0  ;;  %v1503_v50 = vadd.f32 %v10102_v8, %v1443_v0  ;;  %v1444_v19 = vmax.f32 %v1110_v27, %v1327_v45  ;;  %v1111_v55 = vmax.f32 %v777_v33, %v995_v30  ;;  %v8893_v0 = vld [vmem:[%s12107_s3 + $0xd8] sm:$0xff]   ;;  %7835 = vmatprep.subr.bf16.mxu1 %v8889_v62  ;;  %7798 = vmatpush3.bf16.msra.mxu0 %v8888_v35 }
 0x156   :  { %v999_v5 = vpop.f32.mrf.mxu0  ;;  %7799 = vmatprep.subr.bf16.mxu0 %v8891_v16  ;;  %v8896_v16 = vld [vmem:[%s12107_s3 + $0x8] sm:$0xff]  }
 0x157   :  { %v1333_v22 = vpop.f32.mrf.mxu1  ;;  %1598 = vst [vmem:[#allocation2] sm:$0xff] %v1550_v63  ;;  %v1551_v54 = vmax.f32 %v1503_v50, 0.0  ;;  %v1504_v45 = vadd.f32 %v10088_v58, %v1444_v19  ;;  %v1445_v33 = vmax.f32 %v1111_v55, %v1329_v39  ;;  %v1112_v60 = vmax.f32 %v12205_v59, %v999_v5  ;;  %v8895_v19 = vld [vmem:[%s12107_s3 + $0x48] sm:$0xff]  }
 0x158   :  { %v1001_v11 = vpop.f32.mrf.mxu0  ;;  %v12207_v5 = vmax.f32 %v9834_v9, %v9836_v10  ;;  %7836 = vmatpush3.bf16.msra.mxu1 %v8890_v51 }
 0x159   :  { %v1335_v27 = vpop.f32.mrf.mxu1  ;;  %1600 = vst.msk [vmem:[#allocation2 + $0x8] sm:$0xff] %vm1599_vm3, %v1551_v54  ;;  %v1552_v30 = vmax.f32 %v1504_v45, 0.0  ;;  %v1505_v63 = vadd.f32 %v10102_v8, %v1445_v33  ;;  %v1446_v39 = vmax.f32 %v1112_v60, %v1333_v22  ;;  %v1113_v4 = vmax.f32 %v12206_v3, %v1001_v11  ;;  %7837 = vmatprep.subr.bf16.mxu1 %v8893_v0 }
 0x15a   :  { %v1003_v62 = vpop.f32.mrf.mxu0  ;;  %7800 = vmatpush3.bf16.msra.mxu0 %v8892_v1 }
 0x15b   :  { %v1337_v50 = vpop.f32.mrf.mxu1  ;;  %1601 = vst [vmem:[#allocation2 + $0x10] sm:$0xff] %v1552_v30  ;;  %v1553_v6 = vmax.f32 %v1505_v63, 0.0  ;;  %v10165_v7 = vadd.f32 %v10088_v58, %v1446_v39  ;;  %v1447_v55 = vmax.f32 %v1113_v4, %v1335_v27  ;;  %v1114_v22 = vmax.f32 %v12207_v5, %v1003_v62  ;;  %v8898_v63 = vld [vmem:[%s12107_s3 + $0x90] sm:$0xff]   ;;  %7801 = vmatprep.subr.bf16.mxu0 %v8895_v19 }
 0x15c   :  { %v1005_v13 = vpop.f32.mrf.mxu0  ;;  %v12210_v27 = vmax.f32 %v9844_v14, %v9846_v15  ;;  %7838 = vmatpush3.bf16.msra.mxu1 %v8894_v2  ;;  %v12211_v14 = vmax.f32 %v9850_v17, %v9852_v18  ;;  %v785_v2 = vmax.f32 %v9862_v23, %v9864_v24 }
 0x15d   :  { %v1339_v54 = vpop.f32.mrf.mxu1  ;;  %1602 = vst.msk [vmem:[#allocation2 + $0x18] sm:$0xff] %vm1599_vm3, %v1553_v6  ;;  %v1554_v9 = vmax.f32 %v10165_v7, 0.0  ;;  %v1507_v10 = vadd.f32 %v10102_v8, %v1447_v55  ;;  %v1448_v35 = vmax.f32 %v1114_v22, %v1337_v50  ;;  %v1115_v51 = vmax.f32 %v781_v61, %v1005_v13  ;;  %7839 = vmatprep.subr.bf16.mxu1 %v8897_v12 }
 0x15e   :  { %v1009_v33 = vpop.f32.mrf.mxu0  ;;  %v1647_v1 = vld [vmem:[#allocation2] sm:$0xff]  ;;  %v12212_v12 = vmax.f32 %v9856_v20, %v9858_v21  ;;  %7802 = vmatpush3.bf16.msra.mxu0 %v8896_v16 }
 0x15f   :  { %v1343_v59 = vpop.f32.mrf.mxu1  ;;  %1603 = vst [vmem:[#allocation2 + $0x20] sm:$0xff] %v1554_v9  ;;  %v1555_v60 = vmax.f32 %v1507_v10, 0.0  ;;  %v10186_v0 = vadd.f32 %v10088_v58, %v1448_v35  ;;  %v1449_v11 = vmax.f32 %v1115_v51, %v1339_v54  ;;  %v1116_v30 = vmax.f32 %v12210_v27, %v1009_v33 }
 0x160   :  { %v1011_v39 = vpop.f32.mrf.mxu0  ;;  %v1648_v4 = vld [vmem:[#allocation2 + $0x8] sm:$0xff]  ;;  %7840 = vmatpush3.bf16.msra.mxu1 %v8898_v63 }
 0x161   :  { %v1345_v3 = vpop.f32.mrf.mxu1  ;;  %1604 = vst.msk [vmem:[#allocation2 + $0x28] sm:$0xff] %vm1599_vm3, %v1555_v60  ;;  %v1556_v61 = vmax.f32 %v10186_v0, 0.0  ;;  %v1509_v62 = vadd.f32 %v10102_v8, %v1449_v11  ;;  %v1450_v50 = vmax.f32 %v1116_v30, %v1343_v59  ;;  %v1117_v15 = vmax.f32 %v12211_v14, %v1011_v39 }
 0x162   :  { %v1013_v6 = vpop.f32.mrf.mxu0  ;;  %v7741_v19 = vpack.c.bf16 %v1648_v4, %v1647_v1  ;;  %v1649_v51 = vld [vmem:[#allocation2 + $0x10] sm:$0xff]  ;;  %v12213_v0 = vmax.f32 %v9866_v25, %v9868_v26  ;;  %v12214_v25 = vmax.f32 %v9872_v28, %v9874_v29  ;;  %v12215_v28 = vmax.f32 %v9878_v31, %v9880_v32 }
 0x163   :  { %v1347_v7 = vpop.f32.mrf.mxu1  ;;  %1605 = vst [vmem:[#allocation2 + $0x30] sm:$0xff] %v1556_v61  ;;  %v1557_v55 = vmax.f32 %v1509_v62, 0.0  ;;  %v10203_v5 = vadd.f32 %v10088_v58, %v1450_v50  ;;  %v1451_v22 = vmax.f32 %v1117_v15, %v1345_v3  ;;  %v1118_v13 = vmax.f32 %v12212_v12, %v1013_v6 }
 0x164   :  { %v1015_v17 = vpop.f32.mrf.mxu0  ;;  %1665 = vst.msk [vmem:[#allocation3] sm:$0xff] %vm10175_vm4, %v7741_v19  ;;  %v1650_v23 = vld [vmem:[#allocation2 + $0x18] sm:$0xff]  ;;  %v789_v6 = vmax.f32 %v9884_v34, %v9886_v36 }
 0x165   :  { %v1349_v18 = vpop.f32.mrf.mxu1  ;;  %1606 = vst.msk [vmem:[#allocation2 + $0x38] sm:$0xff] %vm1599_vm3, %v1557_v55  ;;  %v1558_v24 = vmax.f32 %v10203_v5, 0.0  ;;  %v1511_v54 = vadd.f32 %v10102_v8, %v1451_v22  ;;  %v1452_v10 = vmax.f32 %v1118_v13, %v1347_v7  ;;  %v1119_v35 = vmax.f32 %v785_v2, %v1015_v17 }
 0x166   :  { %v1019_v33 = vpop.f32.mrf.mxu0  ;;  %v7742_v21 = vpack.c.bf16 %v1650_v23, %v1649_v51  ;;  %v1668_v14 = vld [vmem:[#allocation2 + $0x20] sm:$0xff] }
 0x167   :  { %v1353_v20 = vpop.f32.mrf.mxu1  ;;  %1607 = vst [vmem:[#allocation2 + $0x40] sm:$0xff] %v1558_v24  ;;  %v1559_v59 = vmax.f32 %v1511_v54, 0.0  ;;  %v10214_v16 = vadd.f32 %v10088_v58, %v1452_v10  ;;  %v1453_v60 = vmax.f32 %v1119_v35, %v1349_v18  ;;  %v1120_v11 = vmax.f32 %v12213_v0, %v1019_v33 }
 0x168   :  { %v1837_v27 = vld [vmem:[#allocation2 + $0x28] sm:$0xff]  ;;  %v1021_v30 = vpop.f32.mrf.mxu0  ;;  %1666 = vst.msk [vmem:[#allocation3 + $0x24] sm:$0xff] %vm10175_vm4, %v7742_v21  ;;  %v12216_v35 = vmax.f32 %v9888_v37, %v9890_v38  ;;  %v12217_v37 = vmax.f32 %v9894_v40, %v9896_v41  ;;  %v12218_v40 = vmax.f32 %v9900_v43, %v9902_v44 }
 0x169   :  { %v1355_v63 = vpop.f32.mrf.mxu1  ;;  %v1669_v39 = vld [vmem:[#allocation2 + $0x28] sm:$0xff]  ;;  %v7757_v3 = vpack.c.bf16 %v1837_v27, %v1554_v9  ;;  %1608 = vst.msk [vmem:[#allocation2 + $0x48] sm:$0xff] %vm1599_vm3, %v1559_v59  ;;  %v1560_v4 = vmax.f32 %v10214_v16, 0.0  ;;  %v1513_v62 = vadd.f32 %v10102_v8, %v1453_v60  ;;  %v1454_v50 = vmax.f32 %v1120_v11, %v1353_v20 }
 0x16a   :  { %v1121_v26 = vmax.f32 %v12214_v25, %v1021_v30  ;;  %v1023_v15 = vpop.f32.mrf.mxu0  ;;  %v7743_v2 = vpack.c.bf16 %v1669_v39, %v1668_v14  ;;  %v1670_v18 = vld [vmem:[#allocation2 + $0x30] sm:$0xff] }
 0x16b   :  { %v1357_v1 = vpop.f32.mrf.mxu1  ;;  %1852 = vst.msk [vmem:[#allocation3 + $0xc] sm:$0xff] %vm10175_vm4, %v7757_v3  ;;  %1609 = vst [vmem:[#allocation2 + $0x50] sm:$0xff] %v1560_v4  ;;  %v1561_v9 = vmax.f32 %v1513_v62, 0.0  ;;  %v10234_v7 = vadd.f32 %v10088_v58, %v1454_v50  ;;  %v1122_v29 = vmax.f32 %v12215_v28, %v1023_v15  ;;  %v793_v50 = vmax.f32 %v9906_v46, %v9908_v47 }
 0x16c   :  { %v1839_v19 = vld [vmem:[#allocation2 + $0x38] sm:$0xff]  ;;  %v1455_v55 = vmax.f32 %v1121_v26, %v1355_v63  ;;  %v1025_v5 = vpop.f32.mrf.mxu0  ;;  %1684 = vst.msk [vmem:[#allocation3 + $0x48] sm:$0xff] %vm10175_vm4, %v7743_v2 }
 0x16d   :  { %v1359_v22 = vpop.f32.mrf.mxu1  ;;  %v1671_v34 = vld [vmem:[#allocation2 + $0x38] sm:$0xff]  ;;  %v7758_v36 = vpack.c.bf16 %v1839_v19, %v1556_v61  ;;  %1610 = vst.msk [vmem:[#allocation2 + $0x58] sm:$0xff] %vm1599_vm3, %v1561_v9  ;;  %v1562_v12 = vmax.f32 %v10234_v7, 0.0  ;;  %v1456_v13 = vmax.f32 %v1122_v29, %v1357_v1  ;;  %v1123_v17 = vmax.f32 %v789_v6, %v1025_v5 }
 0x16e   :  { %v1515_v23 = vadd.f32 %v10102_v8, %v1455_v55  ;;  %v1029_v31 = vpop.f32.mrf.mxu0  ;;  %v7744_v54 = vpack.c.bf16 %v1671_v34, %v1670_v18  ;;  %v1687_v63 = vld [vmem:[#allocation2 + $0x40] sm:$0xff]  ;;  %v12219_v55 = vmax.f32 %v9910_v48, %v9912_v49  ;;  %v12220_v48 = vmax.f32 %v9916_v52, %v9918_v53 }
 0x16f   :  { %v1363_v32 = vpop.f32.mrf.mxu1  ;;  %1853 = vst.msk [vmem:[#allocation3 + $0x30] sm:$0xff] %vm10175_vm4, %v7758_v36  ;;  %1611 = vst [vmem:[#allocation2 + $0x60] sm:$0xff] %v1562_v12  ;;  %v10249_v61 = vadd.f32 %v10088_v58, %v1456_v13  ;;  %v1457_v10 = vmax.f32 %v1123_v17, %v1359_v22  ;;  %v1124_v51 = vmax.f32 %v12216_v35, %v1029_v31 }
 0x170   :  { %v1855_v33 = vld [vmem:[#allocation2 + $0x48] sm:$0xff]  ;;  %v1563_v20 = vmax.f32 %v1515_v23, 0.0  ;;  %v1031_v21 = vpop.f32.mrf.mxu0  ;;  %1685 = vst.msk [vmem:[#allocation3 + $0x6c] sm:$0xff] %vm10175_vm4, %v7744_v54  ;;  %v12221_v52 = vmax.f32 %v9922_v56, %v9924_v57 }
 0x171   :  { %v1365_v59 = vpop.f32.mrf.mxu1  ;;  %v1688_v60 = vld [vmem:[#allocation2 + $0x48] sm:$0xff]  ;;  %v7759_v0 = vpack.c.bf16 %v1855_v33, %v1558_v24  ;;  %v1564_v11 = vmax.f32 %v10249_v61, 0.0  ;;  %v1517_v27 = vadd.f32 %v10102_v8, %v1457_v10  ;;  %v1458_v30 = vmax.f32 %v1124_v51, %v1363_v32 }
 0x172   :  { %1612 = vst.msk [vmem:[#allocation2 + $0x68] sm:$0xff] %vm1599_vm3, %v1563_v20  ;;  %v1125_v38 = vmax.f32 %v12217_v37, %v1031_v21  ;;  %v1033_v39 = vpop.f32.mrf.mxu0  ;;  %v7745_v62 = vpack.c.bf16 %v1688_v60, %v1687_v63  ;;  %v1689_v6 = vld [vmem:[#allocation2 + $0x50] sm:$0xff]  ;;  %v12223_v61 = vld [vmem:[#allocation5_spill] sm:$0xff] }
 0x173   :  { %v1367_v3 = vpop.f32.mrf.mxu1  ;;  %1870 = vst.msk [vmem:[#allocation3 + $0x54] sm:$0xff] %vm10175_vm4, %v7759_v0  ;;  %1613 = vst [vmem:[#allocation2 + $0x70] sm:$0xff] %v1564_v11  ;;  %v1565_v24 = vmax.f32 %v1517_v27, 0.0  ;;  %v10269_v14 = vadd.f32 %v10088_v58, %v1458_v30  ;;  %v1126_v41 = vmax.f32 %v12218_v40, %v1033_v39 }
 0x174   :  { %v1857_v25 = vld [vmem:[#allocation2 + $0x58] sm:$0xff]  ;;  %v1459_v26 = vmax.f32 %v1125_v38, %v1365_v59  ;;  %v1035_v15 = vpop.f32.mrf.mxu0  ;;  %1703 = vst.msk [vmem:[#allocation3 + $0x90] sm:$0xff] %vm10175_vm4, %v7745_v62  ;;  %2030 = vst.msk [vmem:[#allocation3 + $0x18] sm:$0xff] %vm10175_vm4, %v7745_v62  ;;  %v12222_v59 = vld [vmem:[#allocation4_spill] sm:$0xff] }
 0x175   :  { %v1369_v1 = vpop.f32.mrf.mxu1  ;;  %v1690_v46 = vld [vmem:[#allocation2 + $0x58] sm:$0xff]  ;;  %v7760_v47 = vpack.c.bf16 %v1857_v25, %v1560_v4  ;;  %1614 = vst.msk [vmem:[#allocation2 + $0x78] sm:$0xff] %vm1599_vm3, %v1565_v24  ;;  %v1566_v2 = vmax.f32 %v10269_v14, 0.0  ;;  %v1460_v43 = vmax.f32 %v1126_v41, %v1367_v3  ;;  %v1127_v44 = vmax.f32 %v793_v50, %v1035_v15 }
 0x176   :  { %v1519_v9 = vadd.f32 %v10102_v8, %v1459_v26  ;;  %v1039_v28 = vpop.f32.mrf.mxu0  ;;  %v7746_v19 = vpack.c.bf16 %v1690_v46, %v1689_v6  ;;  %v1706_v13 = vld [vmem:[#allocation2 + $0x60] sm:$0xff]  ;;  %v797_v7 = vmax.f32 %v12222_v59, %v9930_v42 }
 0x177   :  { %v1373_v29 = vpop.f32.mrf.mxu1  ;;  %1871 = vst.msk [vmem:[#allocation3 + $0x78] sm:$0xff] %vm10175_vm4, %v7760_v47  ;;  %1615 = vst [vmem:[#allocation2 + $0x80] sm:$0xff] %v1566_v2  ;;  %v10288_v16 = vadd.f32 %v10088_v58, %v1460_v43  ;;  %v1461_v4 = vmax.f32 %v1127_v44, %v1369_v1  ;;  %v1128_v5 = vmax.f32 %v12219_v55, %v1039_v28  ;;  %v12226_v43 = vld [vmem:[#allocation7_spill] sm:$0xff]  ;;  %v12227_v44 = vld [vmem:[#allocation8_spill] sm:$0xff] }
 0x178   :  { %v1567_v22 = vmax.f32 %v1519_v9, 0.0  ;;  %v1041_v34 = vpop.f32.mrf.mxu0  ;;  %1704 = vst.msk [vmem:[#allocation3 + $0xb4] sm:$0xff] %vm10175_vm4, %v7746_v19  ;;  %2031 = vst.msk [vmem:[#allocation3 + $0x3c] sm:$0xff] %vm10175_vm4, %v7746_v19  ;;  %v12228_v6 = vmax.f32 %v12226_v43, %v12227_v44 }
 0x179   :  { %v1375_v36 = vpop.f32.mrf.mxu1  ;;  %v1873_v17 = vld [vmem:[#allocation2 + $0x68] sm:$0xff]  ;;  %v1568_v18 = vmax.f32 %v10288_v16, 0.0  ;;  %v1521_v23 = vadd.f32 %v10102_v8, %v1461_v4  ;;  %v1462_v31 = vmax.f32 %v1128_v5, %v1373_v29  ;;  %v1129_v49 = vmax.f32 %v12220_v48, %v1041_v34  ;;  %v12233_v48 = vld [vmem:[#allocation11_spill] sm:$0xff] }
 0x17a   :  { %v1707_v32 = vld [vmem:[#allocation2 + $0x68] sm:$0xff]  ;;  %v7761_v54 = vpack.c.bf16 %v1873_v17, %v1562_v12  ;;  %1616 = vst.msk [vmem:[#allocation2 + $0x88] sm:$0xff] %vm1599_vm3, %v1567_v22  ;;  %v1043_v10 = vpop.f32.mrf.mxu0  ;;  %v1708_v63 = vld [vmem:[#allocation2 + $0x70] sm:$0xff] }
 0x17b   :  { %v1377_v35 = vpop.f32.mrf.mxu1  ;;  %v7747_v51 = vpack.c.bf16 %v1707_v32, %v1706_v13  ;;  %1617 = vst [vmem:[#allocation2 + $0x90] sm:$0xff] %v1568_v18  ;;  %v1569_v33 = vmax.f32 %v1521_v23, 0.0  ;;  %v1522_v20 = vadd.f32 %v10088_v58, %v1462_v31  ;;  %v1463_v21 = vmax.f32 %v1129_v49, %v1375_v36  ;;  %v12229_v36 = vld [vmem:[#allocation9_spill] sm:$0xff]  ;;  %v12230_v13 = vld [vmem:[#allocation10_spill] sm:$0xff]  ;;  %v12232_v31 = vld [vmem:[#allocation12_spill] sm:$0xff] }
 0x17c   :  { %v1130_v53 = vmax.f32 %v12221_v52, %v1043_v10  ;;  %1888 = vst.msk [vmem:[#allocation3 + $0x9c] sm:$0xff] %vm10175_vm4, %v7761_v54  ;;  %v1875_v12 = vld [vmem:[#allocation2 + $0x78] sm:$0xff]  ;;  %v1045_v60 = vpop.f32.mrf.mxu0  ;;  %v12231_v17 = vmax.f32 %v12229_v36, %v12230_v13  ;;  %v801_v49 = vmax.f32 %v12233_v48, %v12232_v31  ;;  %v12234_v16 = vld [vmem:[#allocation13_spill] sm:$0xff] }
 0x17d   :  { %v1379_v0 = vpop.f32.mrf.mxu1  ;;  %1722 = vst.msk [vmem:[#allocation3 + $0xd8] sm:$0xff] %vm10175_vm4, %v7747_v51  ;;  %v1709_v27 = vld [vmem:[#allocation2 + $0x78] sm:$0xff]  ;;  %2048 = vst.msk [vmem:[#allocation3 + $0x60] sm:$0xff] %vm10175_vm4, %v7747_v51  ;;  %v7762_v56 = vpack.c.bf16 %v1875_v12, %v1564_v11  ;;  %v1570_v57 = vmax.f32 %v1522_v20, 0.0  ;;  %v1523_v42 = vadd.f32 %v10102_v8, %v1463_v21  ;;  %v1131_v37 = vmax.f32 %v797_v7, %v1045_v60  ;;  %v12224_v11 = vld [vmem:[#allocation6_spill] sm:$0xff] }
 0x17e   :  { %1618 = vst.msk [vmem:[#allocation2 + $0x98] sm:$0xff] %vm1599_vm3, %v1569_v33  ;;  %v1464_v30 = vmax.f32 %v1130_v53, %v1377_v35  ;;  %v1049_v38 = vpop.f32.mrf.mxu0  ;;  %v7748_v3 = vpack.c.bf16 %v1709_v27, %v1708_v63  ;;  %v12225_v24 = vmax.f32 %v12223_v61, %v12224_v11  ;;  %v2050_v41 = vld [vmem:[#allocation2 + $0x80] sm:$0xff]  ;;  %v8901_v31 = vld [vmem:[%s12107_s3 + $0xc8] sm:$0xff]  }
 0x17f   :  { %v1383_v39 = vpop.f32.mrf.mxu1  ;;  %1889 = vst.msk [vmem:[#allocation3 + $0xc0] sm:$0xff] %vm10175_vm4, %v7762_v56  ;;  %1619 = vst [vmem:[#allocation2 + $0xa0] sm:$0xff] %v1570_v57  ;;  %v1571_v62 = vmax.f32 %v1523_v42, 0.0  ;;  %v1465_v25 = vmax.f32 %v1131_v37, %v1379_v0  ;;  %7841 = vmatprep.subr.bf16.mxu1 %v8901_v31  ;;  %v12260_v31 = vld [vmem:[#allocation32_spill] sm:$0xff] }
 0x180   :  { %v1524_v50 = vadd.f32 %v10088_v58, %v1464_v30  ;;  %v1132_v40 = vmax.f32 %v12225_v24, %v1049_v38  ;;  %v1051_v26 = vpop.f32.mrf.mxu0  ;;  %1723 = vst.msk [vmem:[#allocation3 + $0xfc] sm:$0xff] %vm10175_vm4, %v7748_v3  ;;  %2049 = vst.msk [vmem:[#allocation3 + $0x84] sm:$0xff] %vm10175_vm4, %v7748_v3  ;;  %v12238_v3 = vld [vmem:[#allocation16_spill] sm:$0xff] }
 0x181   :  { %v1385_v15 = vpop.f32.mrf.mxu1  ;;  %v1892_v1 = vld [vmem:[#allocation2 + $0x88] sm:$0xff]  ;;  %1620 = vst.msk [vmem:[#allocation2 + $0xa8] sm:$0xff] %vm1599_vm3, %v1571_v62  ;;  %v1133_v9 = vmax.f32 %v12228_v6, %v1051_v26  ;;  %v1525_v19 = vadd.f32 %v10102_v8, %v1465_v25  ;;  %v12241_v25 = vld [vmem:[#allocation19_spill] sm:$0xff] }
 0x182   :  { %v1572_v46 = vmax.f32 %v1524_v50, 0.0  ;;  %v1466_v47 = vmax.f32 %v1132_v40, %v1383_v39  ;;  %v2051_v28 = vld [vmem:[#allocation2 + $0x88] sm:$0xff]  ;;  %v7763_v29 = vpack.c.bf16 %v1892_v1, %v1566_v2  ;;  %v1053_v4 = vpop.f32.mrf.mxu0  ;;  %v2052_v21 = vld [vmem:[#allocation2 + $0x90] sm:$0xff]  ;;  %v12237_v39 = vld [vmem:[#allocation15_spill] sm:$0xff] }
 0x183   :  { %v1387_v55 = vpop.f32.mrf.mxu1  ;;  %v7777_v5 = vpack.c.bf16 %v2051_v28, %v2050_v41  ;;  %v1467_v34 = vmax.f32 %v1133_v9, %v1385_v15  ;;  %v1134_v23 = vmax.f32 %v12231_v17, %v1053_v4  ;;  %v1573_v2 = vmax.f32 %v1525_v19, 0.0  ;;  %v12240_v41 = vld [vmem:[#allocation20_spill] sm:$0xff] }
 0x184   :  { %1621 = vst [vmem:[#allocation2 + $0xb0] sm:$0xff] %v1572_v46  ;;  %v10341_v22 = vadd.f32 %v10088_v58, %v1466_v47  ;;  %1907 = vst.msk [vmem:[#allocation3 + $0xe4] sm:$0xff] %vm10175_vm4, %v7763_v29  ;;  %v1055_v32 = vpop.f32.mrf.mxu0  ;;  %v12239_v62 = vmax.f32 %v12237_v39, %v12238_v3  ;;  %v805_v26 = vmax.f32 %v12241_v25, %v12240_v41  ;;  %v12242_v46 = vld [vmem:[#allocation17_spill] sm:$0xff]  ;;  %v12243_v47 = vld [vmem:[#allocation18_spill] sm:$0xff] }
 0x185   :  { %v1894_v14 = vld [vmem:[#allocation2 + $0x98] sm:$0xff]  ;;  %v1389_v54 = vpop.f32.mrf.mxu1  ;;  %2066 = vst.msk [vmem:[#allocation3 + $0xa8] sm:$0xff] %vm10175_vm4, %v7777_v5  ;;  %v1527_v33 = vadd.f32 %v10102_v8, %v1467_v34  ;;  %v1468_v20 = vmax.f32 %v1134_v23, %v1387_v55  ;;  %v1135_v52 = vmax.f32 %v801_v49, %v1055_v32  ;;  %v12244_v43 = vmax.f32 %v12242_v46, %v12243_v47  ;;  %v8899_v17 = vld [vmem:[%s12107_s3 + $0x40] sm:$0xff]   ;;  %v12245_v32 = vld [vmem:[#allocation21_spill] sm:$0xff] }
 0x186   :  { %v2053_v10 = vld [vmem:[#allocation2 + $0x98] sm:$0xff]  ;;  %v7764_v35 = vpack.c.bf16 %v1894_v14, %v1568_v18  ;;  %v1574_v51 = vmax.f32 %v10341_v22, 0.0  ;;  %1622 = vst.msk [vmem:[#allocation2 + $0xb8] sm:$0xff] %vm1599_vm3, %v1573_v2  ;;  %v1059_v53 = vpop.f32.mrf.mxu0  ;;  %v12235_v18 = vld [vmem:[#allocation14_spill] sm:$0xff]  ;;  %v2069_v56 = vld [vmem:[#allocation2 + $0xa0] sm:$0xff]  ;;  %7803 = vmatprep.subr.bf16.mxu0 %v8899_v17 }
 0x187   :  { %v1393_v59 = vpop.f32.mrf.mxu1  ;;  %v7778_v7 = vpack.c.bf16 %v2053_v10, %v2052_v21  ;;  %v1575_v12 = vmax.f32 %v1527_v33, 0.0  ;;  %v10360_v60 = vadd.f32 %v10088_v58, %v1468_v20  ;;  %v12236_v0 = vmax.f32 %v12234_v16, %v12235_v18  ;;  %v8900_v23 = vld [vmem:[%s12107_s3] sm:$0xff]   ;;  %v8902_v33 = vld [vmem:[%s12107_s3 + $0x88] sm:$0xff]  }
 0x188   :  { %1908 = vst.msk [vmem:[#allocation3 + $0x108] sm:$0xff] %vm10175_vm4, %v7764_v35  ;;  %v1469_v57 = vmax.f32 %v1135_v52, %v1389_v54  ;;  %v1061_v42 = vpop.f32.mrf.mxu0  ;;  %v2070_v63 = vld [vmem:[#allocation2 + $0xa8] sm:$0xff]  ;;  %v12246_v54 = vld [vmem:[#allocation22_spill] sm:$0xff]  ;;  %v12249_v16 = vld [vmem:[#allocation24_spill] sm:$0xff]  ;;  %7804 = vmatpush3.bf16.msra.mxu0 %v8900_v23  ;;  %7842 = vmatpush3.bf16.msra.mxu1 %v8902_v33 }
 0x189   :  { %v1136_v27 = vmax.f32 %v12236_v0, %v1059_v53  ;;  %v1395_v30 = vpop.f32.mrf.mxu1  ;;  %2067 = vst.msk [vmem:[#allocation3 + $0xcc] sm:$0xff] %vm10175_vm4, %v7778_v7  ;;  %v1576_v37 = vmax.f32 %v10360_v60, 0.0  ;;  %v1137_v50 = vmax.f32 %v12239_v62, %v1061_v42  ;;  %v7779_v61 = vpack.c.bf16 %v2070_v63, %v2069_v56  ;;  %v12252_v56 = vld [vmem:[#allocation27_spill] sm:$0xff]  ;;  %v8903_v63 = vld [vmem:[%s12107_s3 + $0xc0] sm:$0xff]   ;;  %v12253_v62 = vld [vmem:[#allocation25_spill] sm:$0xff] }
 0x18a   :  { %1624 = vst.msk [vmem:[#allocation2 + $0xc8] sm:$0xff] %vm1599_vm3, %v1575_v12  ;;  %v1529_v11 = vadd.f32 %v10102_v8, %v1469_v57  ;;  %v1063_v24 = vpop.f32.mrf.mxu0  ;;  %v12247_v10 = vmax.f32 %v12245_v32, %v12246_v54  ;;  %v12248_v12 = vld [vmem:[#allocation23_spill] sm:$0xff]  ;;  %7843 = vmatprep.subr.bf16.mxu1 %v8903_v63 }
 0x18b   :  { %v1470_v38 = vmax.f32 %v1136_v27, %v1393_v59  ;;  %v1397_v40 = vpop.f32.mrf.mxu1  ;;  %v1471_v1 = vmax.f32 %v1137_v50, %v1395_v30  ;;  %v1138_v44 = vmax.f32 %v12244_v43, %v1063_v24  ;;  %2085 = vst.msk [vmem:[#allocation3 + $0xf0] sm:$0xff] %vm10175_vm4, %v7779_v61  ;;  %v2071_v29 = vld [vmem:[#allocation2 + $0xb0] sm:$0xff]  ;;  %v12250_v18 = vmax.f32 %v12248_v12, %v12249_v16  ;;  %v12251_v27 = vld [vmem:[#allocation28_spill] sm:$0xff]  ;;  %v12259_v23 = vld [vmem:[#allocation31_spill] sm:$0xff] }
 0x18c   :  { %v1577_v6 = vmax.f32 %v1529_v11, 0.0  ;;  %v1065_v9 = vpop.f32.mrf.mxu0  ;;  %v809_v57 = vmax.f32 %v12252_v56, %v12251_v27  ;;  %v12254_v50 = vld [vmem:[#allocation26_spill] sm:$0xff]  ;;  %v8904_v24 = vld [vmem:[%s12107_s3 + $0x80] sm:$0xff]   ;;  %v12263_v32 = vld [vmem:[#allocation35_spill] sm:$0xff] }
 0x18d   :  { %v10376_v15 = vadd.f32 %v10088_v58, %v1470_v38  ;;  %v1399_v28 = vpop.f32.mrf.mxu1  ;;  %v1531_v4 = vadd.f32 %v10102_v8, %v1471_v1  ;;  %v1472_v55 = vmax.f32 %v1138_v44, %v1397_v40  ;;  %v1139_v5 = vmax.f32 %v805_v26, %v1065_v9  ;;  %v2072_v34 = vld [vmem:[#allocation2 + $0xb8] sm:$0xff]  ;;  %7844 = vmatpush3.bf16.msra.mxu1 %v8904_v24  ;;  %v12265_v12 = vld [vmem:[#allocation34_spill] sm:$0xff] }
 0x18e   :  { %1626 = vst.msk [vmem:[#allocation2 + $0xd8] sm:$0xff] %vm1599_vm3, %v1577_v6  ;;  %v1069_v36 = vpop.f32.mrf.mxu0  ;;  %v7780_v48 = vpack.c.bf16 %v2072_v34, %v2071_v29  ;;  %v12255_v61 = vmax.f32 %v12253_v62, %v12254_v50  ;;  %v8911_v44 = vld [vmem:[%s12107_s3 + $0x178] sm:$0xff]   ;;  %v12256_v29 = vld [vmem:[#allocation29_spill] sm:$0xff]  ;;  %v12268_v50 = vld [vmem:[#allocation38_spill] sm:$0xff] }
 0x18f   :  { %v1578_v19 = vmax.f32 %v10376_v15, 0.0  ;;  %v1403_v13 = vpop.f32.mrf.mxu1  ;;  %v1579_v49 = vmax.f32 %v1531_v4, 0.0  ;;  %v10396_v14 = vadd.f32 %v10088_v58, %v1472_v55  ;;  %v1473_v2 = vmax.f32 %v1139_v5, %v1399_v28  ;;  %v12257_v4 = vld [vmem:[#allocation30_spill] sm:$0xff]  ;;  %7869 = vmatprep.subr.bf16.mxu0 %v8911_v44  ;;  %v12267_v62 = vld [vmem:[#allocation37_spill] sm:$0xff] }
 0x190   :  { %v1140_v35 = vmax.f32 %v12247_v10, %v1069_v36  ;;  %v1071_v20 = vpop.f32.mrf.mxu0  ;;  %2086 = vst.msk [vmem:[#allocation3 + $0x114] sm:$0xff] %vm10175_vm4, %v7780_v48  ;;  %v12258_v55 = vmax.f32 %v12256_v29, %v12257_v4  ;;  %v12261_v48 = vmax.f32 %v12259_v23, %v12260_v31 }
 0x191   :  { %v1405_v21 = vpop.f32.mrf.mxu1  ;;  %v1726_v52 = vld [vmem:[#allocation2 + $0xc8] sm:$0xff]  ;;  %1628 = vst.msk [vmem:[#allocation2 + $0xe8] sm:$0xff] %vm1599_vm3, %v1579_v49  ;;  %v1580_v53 = vmax.f32 %v10396_v14, 0.0  ;;  %v1533_v59 = vadd.f32 %v10102_v8, %v1473_v2  ;;  %v1141_v0 = vmax.f32 %v12250_v18, %v1071_v20  ;;  %v12262_v2 = vld [vmem:[#allocation36_spill] sm:$0xff]  ;;  %v8914_v20 = vld [vmem:[%s12107_s3 + $0x1f8] sm:$0xff]  }
 0x192   :  { %v1474_v7 = vmax.f32 %v1140_v35, %v1403_v13  ;;  %v1073_v42 = vpop.f32.mrf.mxu0  ;;  %v7749_v45 = vpack.c.bf16 %v1726_v52, %v1574_v51  ;;  %v813_v54 = vmax.f32 %v12263_v32, %v12262_v2  ;;  %7909 = vmatprep.subr.bf16.mxu1 %v8914_v20  ;;  %v12278_v20 = vld [vmem:[#allocation45_spill] sm:$0xff] }
 0x193   :  { %v1407_v30 = vpop.f32.mrf.mxu1  ;;  %v1581_v38 = vmax.f32 %v1533_v59, 0.0  ;;  %v1475_v3 = vmax.f32 %v1141_v0, %v1405_v21  ;;  %v1142_v11 = vmax.f32 %v12255_v61, %v1073_v42  ;;  %v12269_v61 = vmax.f32 %v12267_v62, %v12268_v50 }
 0x194   :  { %v10420_v39 = vadd.f32 %v10088_v58, %v1474_v7  ;;  %1739 = vrot.lane.b32.xlu0 %v7749_v45, %s9289_s29  ;;  %v1075_v22 = vpop.f32.mrf.mxu0  ;;  %v12264_v7 = vld [vmem:[#allocation33_spill] sm:$0xff] }
 0x195   :  { %v1409_v51 = vpop.f32.mrf.mxu1  ;;  %1630 = vst.msk [vmem:[#allocation2 + $0xf8] sm:$0xff] %vm1599_vm3, %v1581_v38  ;;  %v1535_v41 = vadd.f32 %v10102_v8, %v1475_v3  ;;  %v1476_v25 = vmax.f32 %v1142_v11, %v1407_v30  ;;  %v1143_v26 = vmax.f32 %v809_v57, %v1075_v22  ;;  %v1728_v1 = vld [vmem:[#allocation2 + $0xd8] sm:$0xff]  ;;  %v12266_v16 = vmax.f32 %v12264_v7, %v12265_v12 }
 0x196   :  { %v1582_v40 = vmax.f32 %v10420_v39, 0.0  ;;  %v1079_v46 = vpop.f32.mrf.mxu0  ;;  %v7750_v43 = vpack.c.bf16 %v1728_v1, %v1576_v37 }
 0x197   :  { %v1413_v47 = vpop.f32.mrf.mxu1  ;;  %v1583_v6 = vmax.f32 %v1535_v41, 0.0  ;;  %v10438_v9 = vadd.f32 %v10088_v58, %v1476_v25  ;;  %v1477_v28 = vmax.f32 %v1143_v26, %v1409_v51  ;;  %v1144_v5 = vmax.f32 %v12258_v55, %v1079_v46  ;;  %v12270_v41 = vld [vmem:[#allocation39_spill] sm:$0xff]  ;;  %v12271_v25 = vld [vmem:[#allocation40_spill] sm:$0xff]  ;;  %v12275_v55 = vld [vmem:[#allocation41_spill] sm:$0xff] }
 0x198   :  { %1741 = vrot.lane.b32.xlu0 %v7750_v43, %s9289_s29  ;;  %v1081_v34 = vpop.f32.mrf.mxu0  ;;  %v1757_v13 = vld [vmem:[#allocation2 + $0xe8] sm:$0xff]  ;;  %v12272_v26 = vmax.f32 %v12270_v41, %v12271_v25  ;;  %v12274_v43 = vld [vmem:[#allocation43_spill] sm:$0xff] }
 0x199   :  { %v1415_v36 = vpop.f32.mrf.mxu1  ;;  %1632 = vst.msk [vmem:[#allocation2 + $0x108] sm:$0xff] %vm1599_vm3, %v1583_v6  ;;  %v1584_v60 = vmax.f32 %v10438_v9, 0.0  ;;  %v1537_v37 = vadd.f32 %v10102_v8, %v1477_v28  ;;  %v1478_v17 = vmax.f32 %v1144_v5, %v1413_v47  ;;  %v1145_v49 = vmax.f32 %v12261_v48, %v1081_v34  ;;  %v12273_v47 = vld [vmem:[#allocation44_spill] sm:$0xff]  ;;  %v12276_v5 = vld [vmem:[#allocation42_spill] sm:$0xff] }
 0x19a   :  { %v1083_v10 = vpop.f32.mrf.mxu0  ;;  %v10454_v33 = vpack.c.bf16 %v1757_v13, %v1578_v19  ;;  %v817_v44 = vmax.f32 %v12274_v43, %v12273_v47  ;;  %v12277_v34 = vmax.f32 %v12275_v55, %v12276_v5 }
 0x19b   :  { %v1417_v35 = vpop.f32.mrf.mxu1  ;;  %v1585_v21 = vmax.f32 %v1537_v37, 0.0  ;;  %v10460_v52 = vadd.f32 %v10088_v58, %v1478_v17  ;;  %v1479_v59 = vmax.f32 %v1145_v49, %v1415_v36  ;;  %v1146_v18 = vmax.f32 %v12266_v16, %v1083_v10 }
 0x19c   :  { %1770 = vrot.lane.b32.xlu1 %v10454_v33, %s9289_s29  ;;  %v1085_v0 = vpop.f32.mrf.mxu0  ;;  %v1759_v19 = vld [vmem:[#allocation2 + $0xf8] sm:$0xff] }
 0x19d   :  { %v1419_v15 = vpop.f32.mrf.mxu1  ;;  %1634 = vst.msk [vmem:[#allocation2 + $0x118] sm:$0xff] %vm1599_vm3, %v1585_v21  ;;  %v1586_v27 = vmax.f32 %v10460_v52, 0.0  ;;  %v1539_v56 = vadd.f32 %v10102_v8, %v1479_v59  ;;  %v1480_v57 = vmax.f32 %v1146_v18, %v1417_v35  ;;  %v1147_v42 = vmax.f32 %v813_v54, %v1085_v0  ;;  %v12279_v21 = vld [vmem:[#allocation46_spill] sm:$0xff] }
 0x19e   :  { %v1089_v30 = vpop.f32.mrf.mxu0  ;;  %v10472_v45 = vpack.c.bf16 %v1759_v19, %v1580_v53  ;;  %v12280_v52 = vmax.f32 %v12278_v20, %v12279_v21  ;;  %v12282_v19 = vld [vmem:[#allocation48_spill] sm:$0xff]  ;;  %v8916_v20 = vld [vmem:[%s12107_s3 + $0x1b8] sm:$0xff]  }
 0x19f   :  { %v1423_v63 = vpop.f32.mrf.mxu1  ;;  %v1587_v38 = vmax.f32 %v1539_v56, 0.0  ;;  %v10475_v39 = vadd.f32 %v10088_v58, %v1480_v57  ;;  %v1481_v3 = vmax.f32 %v1147_v42, %v1419_v15  ;;  %v1148_v11 = vmax.f32 %v12269_v61, %v1089_v30  ;;  %v12284_v30 = vld [vmem:[#allocation52_spill] sm:$0xff] }
 0x1a0   :  { %1772 = vrot.lane.b32.xlu1 %v10472_v45, %s9289_s29  ;;  %v1091_v24 = vpop.f32.mrf.mxu0  ;;  %v1784_v51 = vld [vmem:[#allocation2 + $0x108] sm:$0xff] }
 0x1a1   :  { %v1425_v22 = vpop.f32.mrf.mxu1  ;;  %1636 = vst.msk [vmem:[#allocation2 + $0x128] sm:$0xff] %vm1599_vm3, %v1587_v38  ;;  %v1588_v14 = vmax.f32 %v10475_v39, 0.0  ;;  %v1541_v53 = vadd.f32 %v10102_v8, %v1481_v3  ;;  %v1149_v1 = vmax.f32 %v12272_v26, %v1091_v24  ;;  %v1482_v46 = vmax.f32 %v1148_v11, %v1423_v63  ;;  %v12285_v63 = vld [vmem:[#allocation51_spill] sm:$0xff]  ;;  %v12286_v11 = vld [vmem:[#allocation49_spill] sm:$0xff]  ;;  %v12287_v24 = vld [vmem:[#allocation50_spill] sm:$0xff] }
 0x1a2   :  { %v1093_v6 = vpop.f32.mrf.mxu0  ;;  %v7753_v9 = vpack.c.bf16 %v1784_v51, %v1582_v40  ;;  %v821_v38 = vmax.f32 %v12285_v63, %v12284_v30  ;;  %v8925_v30 = vld [vmem:[%s12107_s3 + $0x128] sm:$0xff]  }
 0x1a3   :  { %v1427_v28 = vpop.f32.mrf.mxu1  ;;  %v1589_v29 = vmax.f32 %v1541_v53, 0.0  ;;  %v10491_v4 = vadd.f32 %v10088_v58, %v1482_v46  ;;  %v1150_v36 = vmax.f32 %v12277_v34, %v1093_v6  ;;  %v1483_v13 = vmax.f32 %v1149_v1, %v1425_v22  ;;  %v8928_v63 = vld [vmem:[%s12107_s3 + $0x1e8] sm:$0xff]  }
 0x1a4   :  { %1797 = vrot.lane.b32.xlu0 %v7753_v9, %s9289_s29  ;;  %v1095_v37 = vpop.f32.mrf.mxu0  ;;  %v1786_v23 = vld [vmem:[#allocation2 + $0x118] sm:$0xff]  ;;  %v12288_v22 = vmax.f32 %v12286_v11, %v12287_v24  ;;  %v10613_v11 = vld [vmem:[#allocation3 + $0x48] ss:$36 sps:$4 sm:$0xff]  }
 0x1a5   :  { %v1429_v17 = vpop.f32.mrf.mxu1  ;;  %1638 = vst.msk [vmem:[#allocation2 + $0x138] sm:$0xff] %vm1599_vm3, %v1589_v29  ;;  %v1590_v31 = vmax.f32 %v10491_v4, 0.0  ;;  %v1543_v40 = vadd.f32 %v10102_v8, %v1483_v13  ;;  %v1151_v48 = vmax.f32 %v817_v44, %v1095_v37  ;;  %v1484_v49 = vmax.f32 %v1150_v36, %v1427_v28 }
 0x1a6   :  { %v1099_v2 = vpop.f32.mrf.mxu0  ;;  %v7754_v32 = vpack.c.bf16 %v1786_v23, %v1584_v60  ;;  %v12281_v60 = vld [vmem:[#allocation47_spill] sm:$0xff] }
 0x1a7   :  { %v1433_v54 = vpop.f32.mrf.mxu1  ;;  %v1591_v10 = vmax.f32 %v1543_v40, 0.0  ;;  %v1544_v35 = vadd.f32 %v10088_v58, %v1484_v49  ;;  %v1152_v59 = vmax.f32 %v12280_v52, %v1099_v2  ;;  %v1485_v7 = vmax.f32 %v1151_v48, %v1429_v17  ;;  %v10565_v52 = vld [vmem:[#allocation3] ss:$36 sps:$4 sm:$0xff]  }
 0x1a8   :  { %1799 = vrot.lane.b32.xlu1 %v7754_v32, %s9289_s29  ;;  %v1101_v12 = vpop.f32.mrf.mxu0  ;;  %v1811_v18 = vld [vmem:[#allocation2 + $0x128] sm:$0xff]  ;;  %v12283_v56 = vmax.f32 %v12281_v60, %v12282_v19 }
 0x1a9   :  { %v1435_v16 = vpop.f32.mrf.mxu1  ;;  %1640 = vst.msk [vmem:[#allocation2 + $0x148] sm:$0xff] %vm1599_vm3, %v1591_v10  ;;  %v1592_v0 = vmax.f32 %v1544_v35, 0.0  ;;  %v1545_v15 = vadd.f32 %v10102_v8, %v1485_v7  ;;  %v1486_v42 = vmax.f32 %v1152_v59, %v1433_v54  ;;  %v7755_v3 = vpack.c.bf16 %v1811_v18, %v1586_v27  ;;  %v8912_v10 = vld [vmem:[%s12107_s3 + $0x138] sm:$0xff]   ;;  %v8913_v35 = vld [vmem:[%s12107_s3 + $0x170] sm:$0xff]   ;;  %v8921_v60 = vld [vmem:[%s12107_s3 + $0x168] sm:$0xff]  }
 0x1aa   :  { %v1153_v57 = vmax.f32 %v12283_v56, %v1101_v12  ;;  %v1103_v39 = vpop.f32.mrf.mxu0 }
 0x1ab   :  { %v1437_v62 = vpop.f32.mrf.mxu1  ;;  %v1593_v50 = vmax.f32 %v1545_v15, 0.0  ;;  %v1546_v61 = vadd.f32 %v10088_v58, %v1486_v42  ;;  %v1154_v51 = vmax.f32 %v12288_v22, %v1103_v39  ;;  %1824 = vrot.lane.b32.xlu0 %v7755_v3, %s9289_s29  ;;  %v8922_v15 = vld [vmem:[%s12107_s3 + $0x1f0] sm:$0xff]   ;;  %v8930_v39 = vld [vmem:[%s12107_s3 + $0x1a8] sm:$0xff]  }
 0x1ac   :  { %v1487_v53 = vmax.f32 %v1153_v57, %v1435_v16  ;;  %v1105_v41 = vpop.f32.mrf.mxu0  ;;  %v1813_v26 = vld [vmem:[#allocation2 + $0x138] sm:$0xff]  ;;  %v10573_v16 = vld [vmem:[#allocation3 + $0xc] ss:$36 sps:$4 sm:$0xff]  }
 0x1ad   :  { %v1439_v25 = vpop.f32.mrf.mxu1  ;;  %1642 = vst.msk [vmem:[#allocation2 + $0x158] sm:$0xff] %vm1599_vm3, %v1593_v50  ;;  %v1594_v1 = vmax.f32 %v1546_v61, 0.0  ;;  %v1155_v27 = vmax.f32 %v821_v38, %v1105_v41  ;;  %v1488_v47 = vmax.f32 %v1154_v51, %v1437_v62  ;;  %v7756_v43 = vpack.c.bf16 %v1813_v26, %v1588_v14  ;;  %3089 = vmatprep.mubr.bf16.mxu1 %v10573_v16  ;;  %v8926_v57 = vld [vmem:[%s12107_s3 + $0x1b0] sm:$0xff]   ;;  %v8927_v38 = vld [vmem:[%s12107_s3 + $0x160] sm:$0xff]   ;;  %v8935_v41 = vld [vmem:[%s12107_s3 + $0x158] sm:$0xff]  }
 0x1ae   :  { %v1547_v46 = vadd.f32 %v10102_v8, %v1487_v53  ;;  %v10611_v61 = vld [vmem:[#allocation3 + $0x54] ss:$36 sps:$4 sm:$0xff]   ;;  %v8936_v51 = vld [vmem:[%s12107_s3 + $0x1e0] sm:$0xff]  }
 0x1af   :  { %v1548_v6 = vadd.f32 %v10088_v58, %v1488_v47  ;;  %v1489_v28 = vmax.f32 %v1155_v27, %v1439_v25  ;;  %1923 = vrot.lane.b32.xlu0 %v10454_v33, %s9289_s29  ;;  %1826 = vrot.lane.b32.xlu1 %v7756_v43, %s9289_s29  ;;  %v8929_v53 = vld [vmem:[%s12107_s3 + $0x120] sm:$0xff]  }
 0x1b0   :  { %v1595_v44 = vmax.f32 %v1547_v46, 0.0  ;;  %v1989_v58 = vld [vmem:[#allocation2 + $0x148] sm:$0xff]  ;;  %v8940_v46 = vld [vmem:[%s12107_s3 + $0x1a0] sm:$0xff]  }
 0x1b1   :  { %v1596_v29 = vmax.f32 %v1548_v6, 0.0  ;;  %v1549_v4 = vadd.f32 %v10102_v8, %v1489_v28  ;;  %v7771_v8 = vpack.c.bf16 %v1989_v58, %v1590_v31  ;;  %v8941_v6 = vld [vmem:[%s12107_s3 + $0x150] sm:$0xff]   ;;  %v8944_v28 = vld [vmem:[%s12107_s3 + $0x198] sm:$0xff]  }
 0x1b2   :  { %1644 = vst.msk [vmem:[#allocation2 + $0x168] sm:$0xff] %vm1599_vm3, %v1595_v44  ;;  %v8942_v44 = vld [vmem:[%s12107_s3 + $0x1d8] sm:$0xff]  }
 0x1b3   :  { %v1597_v55 = vmax.f32 %v1549_v4, 0.0  ;;  %1949 = vrot.lane.b32.xlu0 %v7753_v9, %s9289_s29  ;;  %1925 = vrot.lane.b32.xlu1 %v10472_v45, %s9289_s29 }
 0x1b4   :  { %v1991_v33 = vld [vmem:[#allocation2 + $0x158] sm:$0xff] }
 0x1b5   :  { %1646 = vst.msk [vmem:[#allocation2 + $0x178] sm:$0xff] %vm1599_vm3, %v1597_v55  ;;  %v7772_v45 = vpack.c.bf16 %v1991_v33, %v1592_v0  ;;  %v8915_v0 = vld [vmem:[%s12107_s3 + $0x130] sm:$0xff]   ;;  %v10656_v33 = vld [vmem:[#allocation3 + $0x9c] ss:$36 sps:$4 sm:$0xff]  }
 0x1b7   :  { %2101 = vrot.lane.b32.xlu0 %v7753_v9, %s9289_s29  ;;  %1951 = vrot.lane.b32.xlu1 %v7754_v32, %s9289_s29 }
 0x1b9   :  { %v2167_v14 = vld [vmem:[#allocation2 + $0x168] sm:$0xff] }
 0x1ba   :  { %v7787_v9 = vpack.c.bf16 %v2167_v14, %v1594_v1 }
 0x1bb   :  { %1975 = vrot.lane.b32.xlu0 %v7755_v3, %s9289_s29  ;;  %2103 = vrot.lane.b32.xlu1 %v7754_v32, %s9289_s29 }
 0x1bc   :  { %v2169_v5 = vld [vmem:[#allocation2 + $0x178] sm:$0xff] }
 0x1bd   :  { %v7788_v34 = vpack.c.bf16 %v2169_v5, %v1596_v29 }
 0x1bf   :  { %2127 = vrot.lane.b32.xlu0 %v7755_v3, %s9289_s29  ;;  %1977 = vrot.lane.b32.xlu1 %v7756_v43, %s9289_s29 }
 0x1c3   :  { %2129 = vrot.lane.b32.xlu1 %v7756_v43, %s9289_s29  ;;  %2002 = vrot.lane.b32.xlu0 %v7771_v8, %s9289_s29  ;;  %v8939_v43 = vld [vmem:[%s12107_s3 + $0x118] sm:$0xff]  }
 0x1c7   :  { %2153 = vrot.lane.b32.xlu0 %v7771_v8, %s9289_s29  ;;  %2004 = vrot.lane.b32.xlu1 %v7772_v45, %s9289_s29 }
 0x1cb   :  { %2155 = vrot.lane.b32.xlu1 %v7772_v45, %s9289_s29  ;;  %2180 = vrot.lane.b32.xlu0 %v7787_v9, %s9289_s29  ;;  %v10658_v45 = vld [vmem:[#allocation3 + $0x90] ss:$36 sps:$4 sm:$0xff]  }
 0x1cf   :  { %2182 = vrot.lane.b32.xlu1 %v7788_v34, %s9289_s29  ;;  %v8950_v34 = vld [vmem:[%s12107_s3 + $0x1d0] sm:$0xff]  }
 0x206   :  { %v1740_v36 = vpop.permute.xlu0 %1739 }
 0x207   :  { %v1743_v37 = vrot.slane %v1740_v36, 4 }
 0x209   :  { %v1746_v17 = vsel %vm1599_vm3, %v1743_v37, %v1740_v36  ;;  %v8943_v36 = vld [vmem:[%s12107_s3 + $0x110] sm:$0xff]   ;;  %v8949_v37 = vld [vmem:[%s12107_s3 + $0x148] sm:$0xff]  }
 0x20a   :  { %1753 = vst.msk [vmem:[#allocation3 + $0x4] sm:$0xff] %vm10542_vm7, %v1746_v17  ;;  %v1742_v23 = vpop.permute.xlu0 %1741 }
 0x20b   :  { %v1744_v31 = vrot.slane %v1742_v23, 4 }
 0x20d   :  { %v1747_v40 = vsel %vm1599_vm3, %v1744_v31, %v1742_v23 }
 0x20e   :  { %1754 = vst.msk [vmem:[#allocation3 + $0x28] sm:$0xff] %vm10542_vm7, %v1747_v40  ;;  %v1771_v48 = vpop.permute.xlu1 %1770 }
 0x20f   :  { %v1774_v49 = vrot.slane %v1771_v48, 4 }
 0x211   :  { %v1776_v2 = vsel %vm1599_vm3, %v1774_v49, %v1771_v48  ;;  %v8954_v48 = vld [vmem:[%s12107_s3 + $0x190] sm:$0xff]  }
 0x212   :  { %1780 = vst.msk [vmem:[#allocation3 + $0x4c] sm:$0xff] %vm10542_vm7, %v1776_v2  ;;  %v1773_v32 = vpop.permute.xlu1 %1772 }
 0x213   :  { %v1775_v54 = vrot.slane %v1773_v32, 4 }
 0x215   :  { %v1777_v21 = vsel %vm1599_vm3, %v1775_v54, %v1773_v32  ;;  %v10567_v59 = vld [vmem:[#allocation3 + $0x4] ss:$36 sps:$4 sm:$0xff]  }
 0x216   :  { %1781 = vst.msk [vmem:[#allocation3 + $0x70] sm:$0xff] %vm10542_vm7, %v1777_v21  ;;  %v1798_v7 = vpop.permute.xlu0 %1797  ;;  %v10571_v12 = vld [vmem:[#allocation3 + $0x8] ss:$36 sps:$4 sm:$0xff]   ;;  %3024 = vmatprep.mubr.bf16.mxu0 %v10567_v59 }
 0x217   :  { %v1801_v18 = vrot.slane %v1798_v7, 4  ;;  %3025 = vmatmul.mubr.bf16.vlgmr.msra.gmra.mxu0 %v10565_v52  ;;  %3090 = vmatmul.mubr.bf16.vlgmr.msra.gmra.mxu1 %v10571_v12  ;;  %v8953_v32 = vld [vmem:[%s12107_s3 + $0x108] sm:$0xff]  }
 0x218   :  { %7870 = vmatpush3.bf16.msra.mxu0 %v8912_v10  ;;  %7910 = vmatpush3.bf16.msra.mxu1 %v8916_v20  ;;  %v8959_v54 = vld [vmem:[%s12107_s3 + $0x1c8] sm:$0xff]   ;;  %v8955_v10 = vld [vmem:[%s12107_s3 + $0x140] sm:$0xff]  }
 0x219   :  { %v1803_v19 = vsel %vm1599_vm3, %v1801_v18, %v1798_v7  ;;  %7871 = vmatprep.subr.bf16.mxu0 %v8913_v35  ;;  %7911 = vmatprep.subr.bf16.mxu1 %v8922_v15  ;;  %v8961_v35 = vld [vmem:[%s12107_s3 + $0x188] sm:$0xff]  }
 0x21a   :  { %1807 = vst.msk [vmem:[#allocation3 + $0x94] sm:$0xff] %vm10542_vm7, %v1803_v19  ;;  %v1800_v56 = vpop.permute.xlu1 %1799  ;;  %3097 = vmatprep.mubr.bf16.mxu1 %v10611_v61  ;;  %v10704_v15 = vld [vmem:[#allocation3 + $0xe4] ss:$36 sps:$4 sm:$0xff]  }
 0x21b   :  { %v1802_v42 = vrot.slane %v1800_v56, 4 }
 0x21c   :  { %7872 = vmatpush3.bf16.msra.mxu0 %v8915_v0  ;;  %7912 = vmatpush3.bf16.msra.mxu1 %v8926_v57 }
 0x21d   :  { %v1804_v3 = vsel %vm1599_vm3, %v1802_v42, %v1800_v56  ;;  %v10607_v62 = vld [vmem:[#allocation3 + $0x4c] ss:$36 sps:$4 sm:$0xff]   ;;  %v1825_v50 = vpop.permute.xlu0 %1824  ;;  %7873 = vmatprep.subr.bf16.mxu0 %v8921_v60  ;;  %7913 = vmatprep.subr.bf16.mxu1 %v8928_v63  ;;  %v10706_v60 = vld [vmem:[#allocation3 + $0xd8] ss:$36 sps:$4 sm:$0xff]   ;;  %v8962_v42 = vld [vmem:[%s12107_s3 + $0x1c0] sm:$0xff]  }
 0x21e   :  { %1808 = vst.msk [vmem:[#allocation3 + $0xb8] sm:$0xff] %vm10542_vm7, %v1804_v3  ;;  %v10615_v24 = vld [vmem:[#allocation3 + $0x50] ss:$36 sps:$4 sm:$0xff]   ;;  %v1828_v22 = vrot.slane %v1825_v50, 4  ;;  %3032 = vmatprep.mubr.bf16.mxu0 %v10607_v62 }
 0x21f   :  { %3033 = vmatmul.mubr.bf16.gmra.mxu0 %v10613_v11  ;;  %3098 = vmatmul.mubr.bf16.gmra.mxu1 %v10615_v24 }
 0x220   :  { %v1830_v25 = vsel %vm1599_vm3, %v1828_v22, %v1825_v50  ;;  %7874 = vmatpush3.bf16.msra.mxu0 %v8925_v30  ;;  %7914 = vmatpush3.bf16.msra.mxu1 %v8930_v39  ;;  %v8960_v39 = vld [vmem:[%s12107_s3 + $0x100] sm:$0xff]   ;;  %v8963_v22 = vld [vmem:[%s12107_s3 + $0x238] sm:$0xff]  }
 0x221   :  { %1834 = vst.msk [vmem:[#allocation3 + $0xdc] sm:$0xff] %vm10542_vm7, %v1830_v25  ;;  %v1924_v26 = vpop.permute.xlu0 %1923  ;;  %v1827_v1 = vpop.permute.xlu1 %1826  ;;  %7875 = vmatprep.subr.bf16.mxu0 %v8927_v38  ;;  %7915 = vmatprep.subr.bf16.mxu1 %v8936_v51  ;;  %v8964_v51 = vld [vmem:[%s12107_s3 + $0x180] sm:$0xff]   ;;  %v8971_v25 = vld [vmem:[%s12107_s3 + $0x2b8] sm:$0xff]  }
 0x222   :  { %v1927_v27 = vrot.slane %v1924_v26, 4  ;;  %v1829_v47 = vrot.slane %v1827_v1, 4  ;;  %3105 = vmatprep.mubr.bf16.mxu1 %v10656_v33 }
 0x224   :  { %v1929_v29 = vsel %vm1599_vm3, %v1927_v27, %v1924_v26  ;;  %v1831_v4 = vsel %vm1599_vm3, %v1829_v47, %v1827_v1  ;;  %7876 = vmatpush3.bf16.msra.mxu0 %v8929_v53  ;;  %7916 = vmatpush3.bf16.msra.mxu1 %v8940_v46  ;;  %v8970_v27 = vld [vmem:[%s12107_s3 + $0x230] sm:$0xff]  }
 0x225   :  { %v10650_v55 = vld [vmem:[#allocation3 + $0x94] ss:$36 sps:$4 sm:$0xff]   ;;  %1933 = vst.msk [vmem:[#allocation3 + $0x10] sm:$0xff] %vm10542_vm7, %v1929_v29  ;;  %1835 = vst.msk [vmem:[#allocation3 + $0x100] sm:$0xff] %vm10542_vm7, %v1831_v4  ;;  %v1950_v58 = vpop.permute.xlu0 %1949  ;;  %v1926_v8 = vpop.permute.xlu1 %1925  ;;  %7877 = vmatprep.subr.bf16.mxu0 %v8935_v41  ;;  %7917 = vmatprep.subr.bf16.mxu1 %v8942_v44 }
 0x226   :  { %v10660_v14 = vld [vmem:[#allocation3 + $0x98] ss:$36 sps:$4 sm:$0xff]   ;;  %v1953_v9 = vrot.slane %v1950_v58, 4  ;;  %v1928_v5 = vrot.slane %v1926_v8, 4  ;;  %3040 = vmatprep.mubr.bf16.mxu0 %v10650_v55 }
 0x227   :  { %3041 = vmatmul.mubr.bf16.gmra.mxu0 %v10658_v45  ;;  %3106 = vmatmul.mubr.bf16.gmra.mxu1 %v10660_v14  ;;  %v8972_v29 = vld [vmem:[%s12107_s3 + $0x278] sm:$0xff]  }
 0x228   :  { %v1955_v17 = vsel %vm1599_vm3, %v1953_v9, %v1950_v58  ;;  %v1930_v23 = vsel %vm1599_vm3, %v1928_v5, %v1926_v8  ;;  %7878 = vmatpush3.bf16.msra.mxu0 %v8939_v43  ;;  %7918 = vmatpush3.bf16.msra.mxu1 %v8944_v28  ;;  %v10758_v8 = vld [vmem:[#allocation3 + $0x18] ss:$36 sps:$4 sm:$0xff]  }
 0x229   :  { %1959 = vst.msk [vmem:[#allocation3 + $0x58] sm:$0xff] %vm10542_vm7, %v1955_v17  ;;  %1934 = vst.msk [vmem:[#allocation3 + $0x34] sm:$0xff] %vm10542_vm7, %v1930_v23  ;;  %v2102_v31 = vpop.permute.xlu0 %2101  ;;  %v1952_v40 = vpop.permute.xlu1 %1951  ;;  %7879 = vmatprep.subr.bf16.mxu0 %v8941_v6  ;;  %7919 = vmatprep.subr.bf16.mxu1 %v8950_v34 }
 0x22a   :  { %v2105_v49 = vrot.slane %v2102_v31, 4  ;;  %v1954_v2 = vrot.slane %v1952_v40, 4  ;;  %3113 = vmatprep.mubr.bf16.mxu1 %v10704_v15 }
 0x22c   :  { %v2107_v20 = vsel %vm1599_vm3, %v2105_v49, %v2102_v31  ;;  %v1956_v21 = vsel %vm1599_vm3, %v1954_v2, %v1952_v40  ;;  %7880 = vmatpush3.bf16.msra.mxu0 %v8943_v36  ;;  %v10698_v7 = vld [vmem:[#allocation3 + $0xdc] ss:$36 sps:$4 sm:$0xff]   ;;  %7920 = vmatpush3.bf16.msra.mxu1 %v8954_v48  ;;  %v8973_v36 = vld [vmem:[%s12107_s3 + $0x228] sm:$0xff]   ;;  %v8975_v40 = vld [vmem:[%s12107_s3 + $0x270] sm:$0xff]  }
 0x22d   :  { %2111 = vst.msk [vmem:[#allocation3 + $0x1c] sm:$0xff] %vm10542_vm7, %v2107_v20  ;;  %1960 = vst.msk [vmem:[#allocation3 + $0x7c] sm:$0xff] %vm10542_vm7, %v1956_v21  ;;  %v1976_v18 = vpop.permute.xlu0 %1975  ;;  %v2104_v0 = vpop.permute.xlu1 %2103  ;;  %7881 = vmatprep.subr.bf16.mxu0 %v8949_v37  ;;  %v10708_v19 = vld [vmem:[#allocation3 + $0xe0] ss:$36 sps:$4 sm:$0xff]   ;;  %3048 = vmatprep.mubr.bf16.mxu0 %v10698_v7  ;;  %v8974_v37 = vld [vmem:[%s12107_s3 + $0x2b0] sm:$0xff]  }
 0x22e   :  { %v1979_v56 = vrot.slane %v1976_v18, 4  ;;  %v2106_v57 = vrot.slane %v2104_v0, 4  ;;  %7921 = vmatprep.subr.bf16.mxu1 %v8959_v54 }
 0x22f   :  { %3049 = vmatmul.mubr.bf16.gmra.mxu0 %v10706_v60  ;;  %3114 = vmatmul.mubr.bf16.gmra.mxu1 %v10708_v19 }
 0x230   :  { %v1981_v30 = vsel %vm1599_vm3, %v1979_v56, %v1976_v18  ;;  %v2108_v63 = vsel %vm1599_vm3, %v2106_v57, %v2104_v0  ;;  %7882 = vmatpush3.bf16.msra.mxu0 %v8953_v32  ;;  %v10719_v38 = vld [vmem:[#allocation3 + $0x14] ss:$36 sps:$4 sm:$0xff]   ;;  %7922 = vmatpush3.bf16.msra.mxu1 %v8961_v35  ;;  %v8980_v32 = vld [vmem:[%s12107_s3 + $0x220] sm:$0xff]   ;;  %v8981_v18 = vld [vmem:[%s12107_s3 + $0x2a8] sm:$0xff]  }
 0x231   :  { %1985 = vst.msk [vmem:[#allocation3 + $0xa0] sm:$0xff] %vm10542_vm7, %v1981_v30  ;;  %2112 = vst.msk [vmem:[#allocation3 + $0x40] sm:$0xff] %vm10542_vm7, %v2108_v63  ;;  %v2128_v3 = vpop.permute.xlu0 %2127  ;;  %v1978_v50 = vpop.permute.xlu1 %1977  ;;  %7883 = vmatprep.subr.bf16.mxu0 %v8955_v10  ;;  %3154 = vmatprep.mubr.bf16.mxu0 %v10719_v38  ;;  %v10740_v46 = vld [vmem:[#allocation3 + $0x10] ss:$36 sps:$4 sm:$0xff]   ;;  %v2204_v48 = vld [vmem:[#allocation3 + $0x58] sm:$0xff] }
 0x232   :  { %v2131_v53 = vrot.slane %v2128_v3, 4  ;;  %v1980_v41 = vrot.slane %v1978_v50, 4  ;;  %7923 = vmatprep.subr.bf16.mxu1 %v8962_v42  ;;  %v8983_v0 = vld [vmem:[%s12107_s3 + $0x268] sm:$0xff]   ;;  %v8984_v57 = vld [vmem:[%s12107_s3 + $0x218] sm:$0xff]  }
 0x234   :  { %v2133_v26 = vsel %vm1599_vm3, %v2131_v53, %v2128_v3  ;;  %v1982_v1 = vsel %vm1599_vm3, %v1980_v41, %v1978_v50  ;;  %7884 = vmatpush3.bf16.msra.mxu0 %v8960_v39  ;;  %7924 = vmatpush3.bf16.msra.mxu1 %v8964_v51  ;;  %v10749_v28 = vld [vmem:[#allocation3 + $0x5c] ss:$36 sps:$4 sm:$0xff]  }
 0x235   :  { %2137 = vst.msk [vmem:[#allocation3 + $0x64] sm:$0xff] %vm10542_vm7, %v2133_v26  ;;  %1986 = vst.msk [vmem:[#allocation3 + $0xc4] sm:$0xff] %vm10542_vm7, %v1982_v1  ;;  %v2130_v47 = vpop.permute.xlu1 %2129  ;;  %v2003_v43 = vpop.permute.xlu0 %2002  ;;  %8518 = vmatprep.subr.bf16.mxu0 %v8963_v22  ;;  %7961 = vmatprep.subr.bf16.mxu1 %v8971_v25  ;;  %v2209_v17 = vld [vmem:[#allocation3 + $0x7c] sm:$0xff]  ;;  %v8991_v1 = vld [vmem:[%s12107_s3 + $0x210] sm:$0xff]  }
 0x236   :  { %v2132_v44 = vrot.slane %v2130_v47, 4  ;;  %v2006_v6 = vrot.slane %v2003_v43, 4  ;;  %v10786_v35 = vcombine.low %v2204_v48, %v2209_v17  ;;  %v10804_v39 = vld [vmem:[#allocation3 + $0x60] ss:$36 sps:$4 sm:$0xff]  }
 0x237   :  { %3155 = vmatmul.mubr.bf16.vlgmr.msra.gmra.mxu0 %v10740_v46  ;;  %v8985_v50 = vld [vmem:[%s12107_s3 + $0x2a0] sm:$0xff]  }
 0x238   :  { %v2134_v4 = vsel %vm1599_vm3, %v2132_v44, %v2130_v47  ;;  %v2008_v58 = vsel %vm1599_vm3, %v2006_v6, %v2003_v43  ;;  %8519 = vmatpush3.bf16.msra.mxu0 %v8963_v22  ;;  %3162 = vmatprep.mubr.bf16.mxu0 %v10749_v28  ;;  %v10760_v9 = vld [vmem:[#allocation3 + $0x1c] ss:$36 sps:$4 sm:$0xff]   ;;  %v8997_v43 = vld [vmem:[%s12107_s3 + $0x208] sm:$0xff]  }
 0x239   :  { %2138 = vst.msk [vmem:[#allocation3 + $0x88] sm:$0xff] %vm10542_vm7, %v2134_v4  ;;  %2012 = vst.msk [vmem:[#allocation3 + $0xe8] sm:$0xff] %vm10542_vm7, %v2008_v58  ;;  %v2154_v5 = vpop.permute.xlu0 %2153  ;;  %v2005_v34 = vpop.permute.xlu1 %2004  ;;  %8520 = vmatprep.subr.bf16.mxu0 %v8970_v27  ;;  %3219 = vmatprep.mubr.bf16.mxu1 %v10760_v9  ;;  %v8986_v53 = vld [vmem:[%s12107_s3 + $0x260] sm:$0xff]   ;;  %v8994_v47 = vld [vmem:[%s12107_s3 + $0x258] sm:$0xff]  }
 0x23a   :  { %v2157_v23 = vrot.slane %v2154_v5, 4  ;;  %v2007_v31 = vrot.slane %v2005_v34, 4  ;;  %3220 = vmatmul.mubr.bf16.vlgmr.msra.gmra.mxu1 %v10758_v8  ;;  %v2214_v41 = vld [vmem:[#allocation3 + $0xa0] sm:$0xff]  ;;  %v10841_v6 = vld [vmem:[#allocation3 + $0xa8] ss:$36 sps:$4 sm:$0xff]   ;;  %v9000_v4 = vld [vmem:[%s12107_s3 + $0x250] sm:$0xff]  }
 0x23b   :  { %7962 = vmatpush3.bf16.msra.mxu1 %v8972_v29  ;;  %v8998_v29 = vld [vmem:[%s12107_s3 + $0x290] sm:$0xff]   ;;  %v10867_v17 = vld [vmem:[#allocation3 + $0x20] ss:$36 sps:$4 sm:$0xff]  }
 0x23c   :  { %v2159_v49 = vsel %vm1599_vm3, %v2157_v23, %v2154_v5  ;;  %v2009_v2 = vsel %vm1599_vm3, %v2007_v31, %v2005_v34  ;;  %8521 = vmatpush3.bf16.msra.mxu0 %v8970_v27  ;;  %7963 = vmatprep.subr.bf16.mxu1 %v8974_v37  ;;  %v10795_v56 = vld [vmem:[#allocation3 + $0xa4] ss:$36 sps:$4 sm:$0xff]   ;;  %v8992_v27 = vld [vmem:[%s12107_s3 + $0x298] sm:$0xff]   ;;  %v10869_v23 = vld [vmem:[#allocation3 + $0xf0] ss:$36 sps:$4 sm:$0xff]  }
 0x23d   :  { %2163 = vst.msk [vmem:[#allocation3 + $0xac] sm:$0xff] %vm10542_vm7, %v2159_v49  ;;  %2013 = vst.msk [vmem:[#allocation3 + $0x10c] sm:$0xff] %vm10542_vm7, %v2009_v2  ;;  %v2156_v54 = vpop.permute.xlu1 %2155  ;;  %v2181_v10 = vpop.permute.xlu0 %2180  ;;  %8522 = vmatprep.subr.bf16.mxu0 %v8973_v36  ;;  %v2219_v22 = vld [vmem:[#allocation3 + $0xc4] sm:$0xff]  ;;  %v9010_v49 = vld [vmem:[%s12107_s3 + $0x2f8] sm:$0xff]  }
 0x23e   :  { %v2158_v20 = vrot.slane %v2156_v54, 4  ;;  %v2184_v21 = vrot.slane %v2181_v10, 4  ;;  %v10822_v26 = vcombine.low %v2214_v41, %v2219_v22  ;;  %v9002_v5 = vld [vmem:[%s12107_s3 + $0x200] sm:$0xff]   ;;  %v9005_v37 = vld [vmem:[%s12107_s3 + $0x248] sm:$0xff]   ;;  %v9025_v22 = vld [vmem:[%s12107_s3 + $0x318] sm:$0xff]  }
 0x23f   :  { %3163 = vmatmul.mubr.bf16.gmra.mxu0 %v10786_v35  ;;  %7964 = vmatpush3.bf16.msra.mxu1 %v8975_v40  ;;  %v9006_v31 = vld [vmem:[%s12107_s3 + $0x280] sm:$0xff]   ;;  %v9007_v40 = vld [vmem:[%s12107_s3 + $0x338] sm:$0xff]   ;;  %v9029_v41 = vld [vmem:[%s12107_s3 + $0x310] sm:$0xff]  }
 0x240   :  { %v2160_v42 = vsel %vm1599_vm3, %v2158_v20, %v2156_v54  ;;  %v2186_v30 = vsel %vm1599_vm3, %v2184_v21, %v2181_v10  ;;  %8523 = vmatpush3.bf16.msra.mxu0 %v8973_v36  ;;  %v10802_v63 = vld [vmem:[#allocation3 + $0x64] ss:$36 sps:$4 sm:$0xff]   ;;  %3170 = vmatprep.mubr.bf16.mxu0 %v10795_v56  ;;  %v9013_v54 = vld [vmem:[%s12107_s3 + $0x3b8] sm:$0xff]   ;;  %v9014_v10 = vld [vmem:[%s12107_s3 + $0x2f0] sm:$0xff]  }
 0x241   :  { %2164 = vst.msk [vmem:[#allocation3 + $0xd0] sm:$0xff] %vm10542_vm7, %v2160_v42  ;;  %2190 = vst.msk [vmem:[#allocation3 + $0xf4] sm:$0xff] %vm10542_vm7, %v2186_v30  ;;  %v2183_v3 = vpop.permute.xlu1 %2182  ;;  %8524 = vmatprep.subr.bf16.mxu0 %v8980_v32  ;;  %3227 = vmatprep.mubr.bf16.mxu1 %v10802_v63  ;;  %v9003_v36 = vld [vmem:[%s12107_s3 + $0x288] sm:$0xff]   ;;  %v9009_v48 = vld [vmem:[%s12107_s3 + $0x240] sm:$0xff]  }
 0x242   :  { %v2185_v51 = vrot.slane %v2183_v3, 4  ;;  %7965 = vmatprep.subr.bf16.mxu1 %v8981_v18  ;;  %3228 = vmatmul.mubr.bf16.gmra.mxu1 %v10804_v39  ;;  %v10885_v2 = vld [vmem:[#allocation3 + $0x68] ss:$36 sps:$4 sm:$0xff]   ;;  %v9015_v20 = vld [vmem:[%s12107_s3 + $0x378] sm:$0xff]   ;;  %v9021_v30 = vld [vmem:[%s12107_s3 + $0x320] sm:$0xff]  }
 0x243   :  { %7966 = vmatpush3.bf16.msra.mxu1 %v8983_v0  ;;  %v9016_v18 = vld [vmem:[%s12107_s3 + $0x328] sm:$0xff]  }
 0x244   :  { %v2187_v25 = vsel %vm1599_vm3, %v2185_v51, %v2183_v3  ;;  %8525 = vmatpush3.bf16.msra.mxu0 %v8980_v32  ;;  %7967 = vmatprep.subr.bf16.mxu1 %v8985_v50  ;;  %v10834_v13 = vld [vmem:[#allocation3 + $0xec] ss:$36 sps:$4 sm:$0xff]   ;;  %v9027_v51 = vld [vmem:[%s12107_s3 + $0x2d8] sm:$0xff]  }
 0x245   :  { %2191 = vst.msk [vmem:[#allocation3 + $0x118] sm:$0xff] %vm10542_vm7, %v2187_v25  ;;  %8526 = vmatprep.subr.bf16.mxu0 %v8984_v57  ;;  %v10857_v34 = vld [vmem:[#allocation3 + $0xe8] ss:$36 sps:$4 sm:$0xff]   ;;  %v9012_v32 = vld [vmem:[%s12107_s3 + $0x330] sm:$0xff]  }
 0x246   :  { %v9019_v0 = vld [vmem:[%s12107_s3 + $0x2e8] sm:$0xff]   ;;  %v9031_v25 = vld [vmem:[%s12107_s3 + $0x2d0] sm:$0xff]  }
 0x247   :  { %3171 = vmatmul.mubr.bf16.gmra.mxu0 %v10822_v26  ;;  %7968 = vmatpush3.bf16.msra.mxu1 %v8986_v53  ;;  %v9022_v3 = vld [vmem:[%s12107_s3 + $0x3a8] sm:$0xff]   ;;  %v9028_v53 = vld [vmem:[%s12107_s3 + $0x360] sm:$0xff]  }
 0x248   :  { %8527 = vmatpush3.bf16.msra.mxu0 %v8984_v57  ;;  %v10839_v44 = vld [vmem:[#allocation3 + $0xac] ss:$36 sps:$4 sm:$0xff]   ;;  %3178 = vmatprep.mubr.bf16.mxu0 %v10834_v13 }
 0x249   :  { %8528 = vmatprep.subr.bf16.mxu0 %v8991_v1  ;;  %3235 = vmatprep.mubr.bf16.mxu1 %v10839_v44  ;;  %v10901_v21 = vld [vmem:[#allocation3 + $0xb0] ss:$36 sps:$4 sm:$0xff]   ;;  %v9024_v50 = vld [vmem:[%s12107_s3 + $0x368] sm:$0xff]  }
 0x24a   :  { %7969 = vmatprep.subr.bf16.mxu1 %v8992_v27  ;;  %3236 = vmatmul.mubr.bf16.gmra.mxu1 %v10841_v6  ;;  %v9020_v57 = vld [vmem:[%s12107_s3 + $0x370] sm:$0xff]   ;;  %v9035_v27 = vld [vmem:[%s12107_s3 + $0x2c8] sm:$0xff]  }
 0x24b   :  { %7970 = vmatpush3.bf16.msra.mxu1 %v8994_v47  ;;  %v9036_v47 = vld [vmem:[%s12107_s3 + $0x350] sm:$0xff]  }
 0x24c   :  { %8529 = vmatpush3.bf16.msra.mxu0 %v8991_v1  ;;  %v10852_v58 = vld [vmem:[#allocation3 + $0xf4] ss:$36 sps:$4 sm:$0xff]   ;;  %7971 = vmatprep.subr.bf16.mxu1 %v8998_v29  ;;  %v9033_v1 = vld [vmem:[%s12107_s3 + $0x308] sm:$0xff]  }
 0x24d   :  { %8530 = vmatprep.subr.bf16.mxu0 %v8997_v43  ;;  %3243 = vmatprep.mubr.bf16.mxu1 %v10852_v58  ;;  %v10917_v42 = vld [vmem:[#allocation3 + $0xf8] ss:$36 sps:$4 sm:$0xff]   ;;  %v9038_v29 = vld [vmem:[%s12107_s3 + $0x388] sm:$0xff]  }
 0x24f   :  { %3179 = vmatmul.mubr.bf16.gmra.mxu0 %v10857_v34  ;;  %7972 = vmatpush3.bf16.msra.mxu1 %v9000_v4  ;;  %v9039_v4 = vld [vmem:[%s12107_s3 + $0x2c0] sm:$0xff]  }
 0x250   :  { %8531 = vmatpush3.bf16.msra.mxu0 %v8997_v43  ;;  %8534 = vmatprep.mubr.bf16.mxu0 %v10867_v17  ;;  %v9037_v43 = vld [vmem:[%s12107_s3 + $0x300] sm:$0xff]  }
 0x251   :  { %8532 = vmatprep.subr.bf16.mxu0 %v9002_v5  ;;  %7973 = vmatprep.subr.bf16.mxu1 %v9003_v36  ;;  %v9043_v36 = vld [vmem:[%s12107_s3 + $0x340] sm:$0xff]  }
 0x252   :  { %3244 = vmatmul.mubr.bf16.gmra.mxu1 %v10869_v23 }
 0x253   :  { %7974 = vmatpush3.bf16.msra.mxu1 %v9005_v37  ;;  %3926 = vmatprep.mubr.bf16.mxu1 %v10567_v59  ;;  %v9017_v59 = vld [vmem:[%s12107_s3 + $0x3b0] sm:$0xff]   ;;  %v9044_v37 = vld [vmem:[%s12107_s3 + $0x3f8] sm:$0xff]  }
 0x254   :  { %8533 = vmatpush3.bf16.msra.mxu0 %v9002_v5  ;;  %7975 = vmatprep.subr.bf16.mxu1 %v9006_v31  ;;  %v9041_v5 = vld [vmem:[%s12107_s3 + $0x380] sm:$0xff]   ;;  %v9046_v31 = vld [vmem:[%s12107_s3 + $0x478] sm:$0xff]  }
 0x255   :  { %8001 = vmatprep.subr.bf16.mxu0 %v9007_v40  ;;  %v9045_v40 = vld [vmem:[%s12107_s3 + $0x430] sm:$0xff]  }
 0x257   :  { %8535 = vmatmul.mubr.bf16.vlgmr.msra.gmra.mxu0 %v10885_v2  ;;  %7976 = vmatpush3.bf16.msra.mxu1 %v9009_v48  ;;  %v9048_v48 = vld [vmem:[%s12107_s3 + $0x428] sm:$0xff]  }
 0x258   :  { %8002 = vmatpush3.bf16.msra.mxu0 %v9010_v49  ;;  %8538 = vmatprep.mubr.bf16.mxu0 %v10901_v21  ;;  %v9051_v49 = vld [vmem:[%s12107_s3 + $0x420] sm:$0xff]  }
 0x259   :  { %8003 = vmatprep.subr.bf16.mxu0 %v9012_v32  ;;  %8041 = vmatprep.subr.bf16.mxu1 %v9013_v54  ;;  %v9054_v32 = vld [vmem:[%s12107_s3 + $0x418] sm:$0xff]   ;;  %v9057_v54 = vld [vmem:[%s12107_s3 + $0x410] sm:$0xff]  }
 0x25a   :  { %3927 = vmatmul.mubr.bf16.vlgmr.msra.gmra.mxu1 %v10565_v52  ;;  %v9023_v52 = vld [vmem:[%s12107_s3 + $0x2e0] sm:$0xff]  }
 0x25b   :  { %8042 = vmatpush3.bf16.msra.mxu1 %v9015_v20  ;;  %3934 = vmatprep.mubr.bf16.mxu1 %v10607_v62  ;;  %v9026_v62 = vld [vmem:[%s12107_s3 + $0x3a0] sm:$0xff]   ;;  %v9060_v20 = vld [vmem:[%s12107_s3 + $0x408] sm:$0xff]  }
 0x25c   :  { %8004 = vmatpush3.bf16.msra.mxu0 %v9014_v10  ;;  %8043 = vmatprep.subr.bf16.mxu1 %v9017_v59  ;;  %v9061_v10 = vld [vmem:[%s12107_s3 + $0x450] sm:$0xff]   ;;  %v9066_v59 = vld [vmem:[%s12107_s3 + $0x440] sm:$0xff]  }
 0x25d   :  { %8005 = vmatprep.subr.bf16.mxu0 %v9016_v18  ;;  %v9063_v18 = vld [vmem:[%s12107_s3 + $0x400] sm:$0xff]  }
 0x25f   :  { %8539 = vmatmul.mubr.bf16.gmra.mxu0 %v10917_v42  ;;  %8044 = vmatpush3.bf16.msra.mxu1 %v9020_v57  ;;  %v9070_v57 = vld [vmem:[%s12107_s3 + $0x578] sm:$0xff]  }
 0x260   :  { %8006 = vmatpush3.bf16.msra.mxu0 %v9019_v0  ;;  %3991 = vmatprep.mubr.bf16.mxu0 %v10573_v16  ;;  %v9030_v16 = vld [vmem:[%s12107_s3 + $0x398] sm:$0xff]  }
 0x261   :  { %8007 = vmatprep.subr.bf16.mxu0 %v9021_v30  ;;  %8045 = vmatprep.subr.bf16.mxu1 %v9022_v3  ;;  %v9067_v0 = vld [vmem:[%s12107_s3 + $0x4f8] sm:$0xff]   ;;  %v9074_v30 = vld [vmem:[%s12107_s3 + $0x570] sm:$0xff]  }
 0x262   :  { %3935 = vmatmul.mubr.bf16.gmra.mxu1 %v10613_v11  ;;  %v9032_v11 = vld [vmem:[%s12107_s3 + $0x358] sm:$0xff]   ;;  %v9076_v3 = vld [vmem:[%s12107_s3 + $0x530] sm:$0xff]  }
 0x263   :  { %8046 = vmatpush3.bf16.msra.mxu1 %v9024_v50  ;;  %3942 = vmatprep.mubr.bf16.mxu1 %v10650_v55  ;;  %v9034_v55 = vld [vmem:[%s12107_s3 + $0x390] sm:$0xff]   ;;  %v9077_v50 = vld [vmem:[%s12107_s3 + $0x4e0] sm:$0xff]  }
 0x264   :  { %8008 = vmatpush3.bf16.msra.mxu0 %v9023_v52  ;;  %8047 = vmatprep.subr.bf16.mxu1 %v9026_v62  ;;  %v9075_v52 = vld [vmem:[%s12107_s3 + $0x4a8] sm:$0xff]   ;;  %v9082_v62 = vld [vmem:[%s12107_s3 + $0x560] sm:$0xff]  }
 0x265   :  { %8009 = vmatprep.subr.bf16.mxu0 %v9025_v22  ;;  %v9079_v22 = vld [vmem:[%s12107_s3 + $0x4a0] sm:$0xff]  }
 0x267   :  { %8048 = vmatpush3.bf16.msra.mxu1 %v9028_v53  ;;  %v9084_v53 = vld [vmem:[%s12107_s3 + $0x520] sm:$0xff]  }
 0x268   :  { %8010 = vmatpush3.bf16.msra.mxu0 %v9027_v51  ;;  %8049 = vmatprep.subr.bf16.mxu1 %v9030_v16  ;;  %v11137_v51 = vld [vmem:[#allocation3 + $0xc] ss:$36 sps:$4 sm:$0xff]   ;;  %v9086_v16 = vld [vmem:[%s12107_s3 + $0x558] sm:$0xff]  }
 0x269   :  { %8011 = vmatprep.subr.bf16.mxu0 %v9029_v41  ;;  %v9083_v41 = vld [vmem:[%s12107_s3 + $0x498] sm:$0xff]  }
 0x26a   :  { %3943 = vmatmul.mubr.bf16.gmra.mxu1 %v10658_v45  ;;  %v9040_v45 = vld [vmem:[%s12107_s3 + $0x348] sm:$0xff]  }
 0x26b   :  { %8050 = vmatpush3.bf16.msra.mxu1 %v9032_v11  ;;  %3950 = vmatprep.mubr.bf16.mxu1 %v10698_v7  ;;  %v9042_v7 = vld [vmem:[%s12107_s3 + $0x438] sm:$0xff]   ;;  %v9087_v11 = vld [vmem:[%s12107_s3 + $0x490] sm:$0xff]  }
 0x26c   :  { %8012 = vmatpush3.bf16.msra.mxu0 %v9031_v25  ;;  %8051 = vmatprep.subr.bf16.mxu1 %v9034_v55  ;;  %v9088_v25 = vld [vmem:[%s12107_s3 + $0x518] sm:$0xff]   ;;  %v9091_v55 = vld [vmem:[%s12107_s3 + $0x488] sm:$0xff]  }
 0x26d   :  { %8013 = vmatprep.subr.bf16.mxu0 %v9033_v1  ;;  %v9090_v1 = vld [vmem:[%s12107_s3 + $0x550] sm:$0xff]  }
 0x26f   :  { %8052 = vmatpush3.bf16.msra.mxu1 %v9036_v47  ;;  %v9094_v47 = vld [vmem:[%s12107_s3 + $0x548] sm:$0xff]  }
 0x270   :  { %8014 = vmatpush3.bf16.msra.mxu0 %v9035_v27  ;;  %8053 = vmatprep.subr.bf16.mxu1 %v9038_v29  ;;  %v9093_v27 = vld [vmem:[%s12107_s3 + $0x4c0] sm:$0xff]  }
 0x271   :  { %8015 = vmatprep.subr.bf16.mxu0 %v9037_v43  ;;  %v9096_v43 = vld [vmem:[%s12107_s3 + $0x508] sm:$0xff]  }
 0x272   :  { %3951 = vmatmul.mubr.bf16.gmra.mxu1 %v10706_v60  ;;  %v9047_v60 = vld [vmem:[%s12107_s3 + $0x3f0] sm:$0xff]   ;;  %v11182_v29 = vld [vmem:[#allocation3 + $0x4] ss:$36 sps:$4 sm:$0xff]  }
 0x273   :  { %8054 = vmatpush3.bf16.msra.mxu1 %v9040_v45  ;;  %4056 = vmatprep.mubr.bf16.mxu1 %v10719_v38  ;;  %v9049_v38 = vld [vmem:[%s12107_s3 + $0x470] sm:$0xff]   ;;  %v9097_v45 = vld [vmem:[%s12107_s3 + $0x540] sm:$0xff]  }
 0x274   :  { %8016 = vmatpush3.bf16.msra.mxu0 %v9039_v4  ;;  %8055 = vmatprep.subr.bf16.mxu1 %v9041_v5  ;;  %v9095_v4 = vld [vmem:[%s12107_s3 + $0x480] sm:$0xff]  }
 0x275   :  { %8081 = vmatprep.subr.bf16.mxu0 %v9042_v7  ;;  %v9099_v5 = vld [vmem:[%s12107_s3 + $0x500] sm:$0xff]   ;;  %v9100_v7 = vld [vmem:[%s12107_s3 + $0x5b8] sm:$0xff]  }
 0x277   :  { %3992 = vmatmul.mubr.bf16.vlgmr.msra.gmra.mxu0 %v10571_v12  ;;  %8056 = vmatpush3.bf16.msra.mxu1 %v9043_v36  ;;  %v9050_v12 = vld [vmem:[%s12107_s3 + $0x3e8] sm:$0xff]   ;;  %v9101_v36 = vld [vmem:[%s12107_s3 + $0x5f0] sm:$0xff]  }
 0x278   :  { %3999 = vmatprep.mubr.bf16.mxu0 %v10611_v61  ;;  %8082 = vmatpush3.bf16.msra.mxu0 %v9044_v37  ;;  %v9052_v61 = vld [vmem:[%s12107_s3 + $0x468] sm:$0xff]   ;;  %v9102_v37 = vld [vmem:[%s12107_s3 + $0x678] sm:$0xff]  }
 0x279   :  { %8542 = vmatprep.subr.bf16.mxu1 %v9046_v31  ;;  %8083 = vmatprep.subr.bf16.mxu0 %v9045_v40  ;;  %v9104_v40 = vld [vmem:[%s12107_s3 + $0x638] sm:$0xff]  }
 0x27a   :  { %4057 = vmatmul.mubr.bf16.vlgmr.msra.gmra.mxu1 %v10740_v46  ;;  %v9053_v46 = vld [vmem:[%s12107_s3 + $0x3e0] sm:$0xff]  }
 0x27b   :  { %8543 = vmatpush3.bf16.msra.mxu1 %v9046_v31  ;;  %4064 = vmatprep.mubr.bf16.mxu1 %v10749_v28  ;;  %v9055_v28 = vld [vmem:[%s12107_s3 + $0x460] sm:$0xff]  }
 0x27c   :  { %8084 = vmatpush3.bf16.msra.mxu0 %v9047_v60  ;;  %8544 = vmatprep.subr.bf16.mxu1 %v9049_v38  ;;  %v11206_v31 = vld [vmem:[#allocation3] ss:$36 sps:$4 sm:$0xff]   ;;  %v11212_v60 = vld [vmem:[#allocation3 + $0x4c] ss:$36 sps:$4 sm:$0xff]  }
 0x27d   :  { %8085 = vmatprep.subr.bf16.mxu0 %v9048_v48  ;;  %v9106_v48 = vld [vmem:[%s12107_s3 + $0x670] sm:$0xff]  }
 0x27f   :  { %4000 = vmatmul.mubr.bf16.gmra.mxu0 %v10615_v24  ;;  %8545 = vmatpush3.bf16.msra.mxu1 %v9049_v38  ;;  %v9056_v24 = vld [vmem:[%s12107_s3 + $0x3d8] sm:$0xff]   ;;  %v9103_v38 = vld [vmem:[%s12107_s3 + $0x5b0] sm:$0xff]  }
 0x280   :  { %4007 = vmatprep.mubr.bf16.mxu0 %v10656_v33  ;;  %8086 = vmatpush3.bf16.msra.mxu0 %v9050_v12  ;;  %v9058_v33 = vld [vmem:[%s12107_s3 + $0x458] sm:$0xff]   ;;  %v9105_v12 = vld [vmem:[%s12107_s3 + $0x5e8] sm:$0xff]  }
 0x281   :  { %8546 = vmatprep.subr.bf16.mxu1 %v9052_v61  ;;  %8087 = vmatprep.subr.bf16.mxu0 %v9051_v49  ;;  %v11227_v49 = vld [vmem:[#allocation3 + $0x54] ss:$36 sps:$4 sm:$0xff]  }
 0x282   :  { %4065 = vmatmul.mubr.bf16.gmra.mxu1 %v10786_v35 }
 0x283   :  { %8547 = vmatpush3.bf16.msra.mxu1 %v9052_v61  ;;  %4072 = vmatprep.mubr.bf16.mxu1 %v10795_v56  ;;  %v9059_v56 = vld [vmem:[%s12107_s3 + $0x3d0] sm:$0xff]   ;;  %v11224_v61 = vld [vmem:[#allocation3 + $0x8] ss:$36 sps:$4 sm:$0xff]  }
 0x284   :  { %8088 = vmatpush3.bf16.msra.mxu0 %v9053_v46  ;;  %8548 = vmatprep.subr.bf16.mxu1 %v9055_v28  ;;  %v9108_v46 = vld [vmem:[%s12107_s3 + $0x630] sm:$0xff]  }
 0x285   :  { %8089 = vmatprep.subr.bf16.mxu0 %v9054_v32  ;;  %v9109_v32 = vld [vmem:[%s12107_s3 + $0x5e0] sm:$0xff]  }
 0x287   :  { %4008 = vmatmul.mubr.bf16.gmra.mxu0 %v10660_v14  ;;  %8549 = vmatpush3.bf16.msra.mxu1 %v9055_v28  ;;  %v9062_v14 = vld [vmem:[%s12107_s3 + $0x3c8] sm:$0xff]  }
 0x288   :  { %4015 = vmatprep.mubr.bf16.mxu0 %v10704_v15  ;;  %8090 = vmatpush3.bf16.msra.mxu0 %v9056_v24  ;;  %v9064_v15 = vld [vmem:[%s12107_s3 + $0x448] sm:$0xff]  }
 0x289   :  { %8550 = vmatprep.subr.bf16.mxu1 %v9058_v33  ;;  %8091 = vmatprep.subr.bf16.mxu0 %v9057_v54  ;;  %v9107_v28 = vld [vmem:[%s12107_s3 + $0x5a8] sm:$0xff]  }
 0x28a   :  { %4073 = vmatmul.mubr.bf16.gmra.mxu1 %v10822_v26  ;;  %v9110_v24 = vld [vmem:[%s12107_s3 + $0x668] sm:$0xff]  }
 0x28b   :  { %8551 = vmatpush3.bf16.msra.mxu1 %v9058_v33  ;;  %4080 = vmatprep.mubr.bf16.mxu1 %v10834_v13  ;;  %v9065_v13 = vld [vmem:[%s12107_s3 + $0x3c0] sm:$0xff]   ;;  %v11242_v33 = vld [vmem:[#allocation3 + $0x48] ss:$36 sps:$4 sm:$0xff]  }
 0x28c   :  { %8092 = vmatpush3.bf16.msra.mxu0 %v9059_v56  ;;  %8552 = vmatprep.subr.bf16.mxu1 %v9061_v10  ;;  %v9112_v54 = vld [vmem:[%s12107_s3 + $0x628] sm:$0xff]   ;;  %v11248_v56 = vld [vmem:[#allocation3 + $0x94] ss:$36 sps:$4 sm:$0xff]  }
 0x28d   :  { %8093 = vmatprep.subr.bf16.mxu0 %v9060_v20  ;;  %v9114_v20 = vld [vmem:[%s12107_s3 + $0x660] sm:$0xff]  }
 0x28f   :  { %4016 = vmatmul.mubr.bf16.gmra.mxu0 %v10708_v19  ;;  %8553 = vmatpush3.bf16.msra.mxu1 %v9061_v10  ;;  %v9068_v19 = vld [vmem:[%s12107_s3 + $0x4b8] sm:$0xff]   ;;  %v9111_v10 = vld [vmem:[%s12107_s3 + $0x5a0] sm:$0xff]  }
 0x290   :  { %4121 = vmatprep.mubr.bf16.mxu0 %v10760_v9  ;;  %8094 = vmatpush3.bf16.msra.mxu0 %v9062_v14  ;;  %v9069_v9 = vld [vmem:[%s12107_s3 + $0x4f0] sm:$0xff]   ;;  %v9113_v14 = vld [vmem:[%s12107_s3 + $0x5d8] sm:$0xff]  }
 0x291   :  { %8554 = vmatprep.subr.bf16.mxu1 %v9064_v15  ;;  %8095 = vmatprep.subr.bf16.mxu0 %v9063_v18  ;;  %v11263_v18 = vld [vmem:[#allocation3 + $0x9c] ss:$36 sps:$4 sm:$0xff]  }
 0x292   :  { %4081 = vmatmul.mubr.bf16.gmra.mxu1 %v10857_v34  ;;  %v9072_v34 = vld [vmem:[%s12107_s3 + $0x538] sm:$0xff]  }
 0x293   :  { %8555 = vmatpush3.bf16.msra.mxu1 %v9064_v15  ;;  %8558 = vmatprep.mubr.bf16.mxu1 %v10867_v17  ;;  %v9071_v17 = vld [vmem:[%s12107_s3 + $0x4b0] sm:$0xff]  }
 0x294   :  { %8096 = vmatpush3.bf16.msra.mxu0 %v9065_v13  ;;  %8556 = vmatprep.subr.bf16.mxu1 %v9066_v59  ;;  %v11260_v15 = vld [vmem:[#allocation3 + $0x50] ss:$36 sps:$4 sm:$0xff]   ;;  %v9116_v13 = vld [vmem:[%s12107_s3 + $0x620] sm:$0xff]  }
 0x295   :  { %8133 = vmatprep.subr.bf16.mxu0 %v9067_v0  ;;  %v9117_v0 = vld [vmem:[%s12107_s3 + $0x5d0] sm:$0xff]  }
 0x297   :  { %4122 = vmatmul.mubr.bf16.vlgmr.msra.gmra.mxu0 %v10758_v8  ;;  %8557 = vmatpush3.bf16.msra.mxu1 %v9066_v59  ;;  %v9073_v8 = vld [vmem:[%s12107_s3 + $0x4e8] sm:$0xff]   ;;  %v9115_v59 = vld [vmem:[%s12107_s3 + $0x598] sm:$0xff]  }
 0x298   :  { %4129 = vmatprep.mubr.bf16.mxu0 %v10802_v63  ;;  %8134 = vmatpush3.bf16.msra.mxu0 %v9068_v19  ;;  %v9118_v19 = vld [vmem:[%s12107_s3 + $0x658] sm:$0xff]  }
 0x299   :  { %8135 = vmatprep.subr.bf16.mxu0 %v9069_v9  ;;  %8173 = vmatprep.subr.bf16.mxu1 %v9070_v57  ;;  %v11278_v9 = vld [vmem:[#allocation3 + $0x90] ss:$36 sps:$4 sm:$0xff]   ;;  %v9120_v57 = vld [vmem:[%s12107_s3 + $0x618] sm:$0xff]  }
 0x29a   :  { %8559 = vmatmul.mubr.bf16.vlgmr.msra.gmra.mxu1 %v10885_v2  ;;  %v9078_v2 = vld [vmem:[%s12107_s3 + $0x568] sm:$0xff]  }
 0x29b   :  { %8174 = vmatpush3.bf16.msra.mxu1 %v9072_v34  ;;  %8562 = vmatprep.mubr.bf16.mxu1 %v10901_v21  ;;  %v9080_v21 = vld [vmem:[%s12107_s3 + $0x528] sm:$0xff]   ;;  %v11284_v34 = vld [vmem:[#allocation3 + $0xdc] ss:$36 sps:$4 sm:$0xff]  }
 0x29c   :  { %8136 = vmatpush3.bf16.msra.mxu0 %v9071_v17  ;;  %8175 = vmatprep.subr.bf16.mxu1 %v9074_v30  ;;  %v9119_v17 = vld [vmem:[%s12107_s3 + $0x590] sm:$0xff]  }
 0x29d   :  { %8137 = vmatprep.subr.bf16.mxu0 %v9073_v8  ;;  %v9122_v30 = vld [vmem:[%s12107_s3 + $0x650] sm:$0xff]   ;;  %v9121_v8 = vld [vmem:[%s12107_s3 + $0x5c8] sm:$0xff]  }
 0x29f   :  { %4130 = vmatmul.mubr.bf16.gmra.mxu0 %v10804_v39  ;;  %8176 = vmatpush3.bf16.msra.mxu1 %v9076_v3  ;;  %v9081_v39 = vld [vmem:[%s12107_s3 + $0x4d8] sm:$0xff]  }
 0x2a0   :  { %4137 = vmatprep.mubr.bf16.mxu0 %v10839_v44  ;;  %8138 = vmatpush3.bf16.msra.mxu0 %v9075_v52  ;;  %v11296_v3 = vld [vmem:[#allocation3 + $0x98] ss:$36 sps:$4 sm:$0xff]   ;;  %v11299_v52 = vld [vmem:[#allocation3 + $0xe4] ss:$36 sps:$4 sm:$0xff]  }
 0x2a1   :  { %8139 = vmatprep.subr.bf16.mxu0 %v9077_v50  ;;  %8177 = vmatprep.subr.bf16.mxu1 %v9078_v2  ;;  %v9124_v50 = vld [vmem:[%s12107_s3 + $0x610] sm:$0xff]   ;;  %v9123_v2 = vld [vmem:[%s12107_s3 + $0x588] sm:$0xff]  }
 0x2a2   :  { %8563 = vmatmul.mubr.bf16.gmra.mxu1 %v10917_v42  ;;  %v9085_v42 = vld [vmem:[%s12107_s3 + $0x4d0] sm:$0xff]  }
 0x2a3   :  { %8178 = vmatpush3.bf16.msra.mxu1 %v9080_v21  ;;  %4901 = vmatprep.mubr.bf16.mxu1 %v11137_v51  ;;  %v9125_v21 = vld [vmem:[%s12107_s3 + $0x5c0] sm:$0xff]  }
 0x2a4   :  { %8140 = vmatpush3.bf16.msra.mxu0 %v9079_v22  ;;  %8179 = vmatprep.subr.bf16.mxu1 %v9082_v62  ;;  %v9126_v22 = vld [vmem:[%s12107_s3 + $0x648] sm:$0xff]   ;;  %v11314_v62 = vld [vmem:[#allocation3 + $0xd8] ss:$36 sps:$4 sm:$0xff]  }
 0x2a5   :  { %8141 = vmatprep.subr.bf16.mxu0 %v9081_v39  ;;  %v9128_v39 = vld [vmem:[%s12107_s3 + $0x608] sm:$0xff]  }
 0x2a7   :  { %4138 = vmatmul.mubr.bf16.gmra.mxu0 %v10841_v6  ;;  %8180 = vmatpush3.bf16.msra.mxu1 %v9084_v53  ;;  %v9089_v6 = vld [vmem:[%s12107_s3 + $0x4c8] sm:$0xff]   ;;  %v11320_v53 = vld [vmem:[#allocation3 + $0x14] ss:$36 sps:$4 sm:$0xff]  }
 0x2a8   :  { %4145 = vmatprep.mubr.bf16.mxu0 %v10852_v58  ;;  %8142 = vmatpush3.bf16.msra.mxu0 %v9083_v41  ;;  %v9092_v58 = vld [vmem:[%s12107_s3 + $0x510] sm:$0xff]   ;;  %v9127_v41 = vld [vmem:[%s12107_s3 + $0x580] sm:$0xff]  }
 0x2a9   :  { %8143 = vmatprep.subr.bf16.mxu0 %v9085_v42  ;;  %8181 = vmatprep.subr.bf16.mxu1 %v9086_v16  ;;  %v9129_v42 = vld [vmem:[%s12107_s3 + $0x640] sm:$0xff]   ;;  %v9130_v16 = vld [vmem:[%s12107_s3 + $0x6b8] sm:$0xff]  }
 0x2ab   :  { %8182 = vmatpush3.bf16.msra.mxu1 %v9088_v25  ;;  %v11332_v25 = vld [vmem:[#allocation3 + $0xe0] ss:$36 sps:$4 sm:$0xff]  }
 0x2ac   :  { %8144 = vmatpush3.bf16.msra.mxu0 %v9087_v11  ;;  %8183 = vmatprep.subr.bf16.mxu1 %v9090_v1  ;;  %v11335_v11 = vld [vmem:[#allocation3 + $0x1c] ss:$36 sps:$4 sm:$0xff]  }
 0x2ad   :  { %8145 = vmatprep.subr.bf16.mxu0 %v9089_v6  ;;  %v9131_v1 = vld [vmem:[%s12107_s3 + $0x600] sm:$0xff]   ;;  %v9132_v6 = vld [vmem:[%s12107_s3 + $0x6b0] sm:$0xff]  }
 0x2af   :  { %4146 = vmatmul.mubr.bf16.gmra.mxu0 %v10869_v23  ;;  %8184 = vmatpush3.bf16.msra.mxu1 %v9092_v58  ;;  %v9098_v23 = vld [vmem:[%s12107_s3 + $0x5f8] sm:$0xff]  }
 0x2b0   :  { %8146 = vmatpush3.bf16.msra.mxu0 %v9091_v55  ;;  %4836 = vmatprep.mubr.bf16.mxu0 %v11182_v29  ;;  %v9133_v58 = vld [vmem:[%s12107_s3 + $0x738] sm:$0xff]  }
 0x2b1   :  { %8147 = vmatprep.subr.bf16.mxu0 %v9093_v27  ;;  %8185 = vmatprep.subr.bf16.mxu1 %v9094_v47  ;;  %v11347_v27 = vld [vmem:[#allocation3 + $0x10] ss:$36 sps:$4 sm:$0xff]  }
 0x2b3   :  { %8186 = vmatpush3.bf16.msra.mxu1 %v9096_v43  ;;  %v9134_v43 = vld [vmem:[%s12107_s3 + $0x6f8] sm:$0xff]  }
 0x2b4   :  { %8148 = vmatpush3.bf16.msra.mxu0 %v9095_v4  ;;  %8187 = vmatprep.subr.bf16.mxu1 %v9097_v45  ;;  %v11353_v4 = vld [vmem:[#allocation3 + $0x5c] ss:$36 sps:$4 sm:$0xff]  }
 0x2b5   :  { %8213 = vmatprep.subr.bf16.mxu0 %v9098_v23  ;;  %v9136_v23 = vld [vmem:[%s12107_s3 + $0x730] sm:$0xff]  }
 0x2b7   :  { %4837 = vmatmul.mubr.bf16.vlgmr.msra.gmra.mxu0 %v11206_v31  ;;  %8188 = vmatpush3.bf16.msra.mxu1 %v9099_v5 }
 0x2b8   :  { %4844 = vmatprep.mubr.bf16.mxu0 %v11212_v60  ;;  %8214 = vmatpush3.bf16.msra.mxu0 %v9100_v7 }
 0x2b9   :  { %8215 = vmatprep.subr.bf16.mxu0 %v9101_v36  ;;  %8253 = vmatprep.subr.bf16.mxu1 %v9102_v37  ;;  %v9135_v36 = vld [vmem:[%s12107_s3 + $0x6a8] sm:$0xff]  }
 0x2ba   :  { %4902 = vmatmul.mubr.bf16.vlgmr.msra.gmra.mxu1 %v11224_v61 }
 0x2bb   :  { %4909 = vmatprep.mubr.bf16.mxu1 %v11227_v49  ;;  %8254 = vmatpush3.bf16.msra.mxu1 %v9104_v40  ;;  %v11362_v40 = vld [vmem:[#allocation3 + $0x18] ss:$36 sps:$4 sm:$0xff]  }
 0x2bc   :  { %8216 = vmatpush3.bf16.msra.mxu0 %v9103_v38  ;;  %8255 = vmatprep.subr.bf16.mxu1 %v9106_v48 }
 0x2bd   :  { %8217 = vmatprep.subr.bf16.mxu0 %v9105_v12  ;;  %v9137_v12 = vld [vmem:[%s12107_s3 + $0x6f0] sm:$0xff]  }
 0x2bf   :  { %4845 = vmatmul.mubr.bf16.gmra.mxu0 %v11242_v33  ;;  %8256 = vmatpush3.bf16.msra.mxu1 %v9108_v46 }
 0x2c0   :  { %4852 = vmatprep.mubr.bf16.mxu0 %v11248_v56  ;;  %8218 = vmatpush3.bf16.msra.mxu0 %v9107_v28 }
 0x2c1   :  { %8219 = vmatprep.subr.bf16.mxu0 %v9109_v32  ;;  %8257 = vmatprep.subr.bf16.mxu1 %v9110_v24 }
 0x2c2   :  { %4910 = vmatmul.mubr.bf16.gmra.mxu1 %v11260_v15 }
 0x2c3   :  { %4917 = vmatprep.mubr.bf16.mxu1 %v11263_v18  ;;  %8258 = vmatpush3.bf16.msra.mxu1 %v9112_v54  ;;  %v9138_v54 = vld [vmem:[%s12107_s3 + $0x6a0] sm:$0xff]  }
 0x2c4   :  { %8220 = vmatpush3.bf16.msra.mxu0 %v9111_v10  ;;  %8259 = vmatprep.subr.bf16.mxu1 %v9114_v20 }
 0x2c5   :  { %8221 = vmatprep.subr.bf16.mxu0 %v9113_v14 }
 0x2c7   :  { %4853 = vmatmul.mubr.bf16.gmra.mxu0 %v11278_v9  ;;  %8260 = vmatpush3.bf16.msra.mxu1 %v9116_v13  ;;  %v9140_v13 = vld [vmem:[%s12107_s3 + $0x6e8] sm:$0xff]  }
 0x2c8   :  { %4860 = vmatprep.mubr.bf16.mxu0 %v11284_v34  ;;  %8222 = vmatpush3.bf16.msra.mxu0 %v9115_v59 }
 0x2c9   :  { %8223 = vmatprep.subr.bf16.mxu0 %v9117_v0  ;;  %8261 = vmatprep.subr.bf16.mxu1 %v9118_v19  ;;  %v11383_v0 = vld [vmem:[#allocation3 + $0xa4] ss:$36 sps:$4 sm:$0xff]  }
 0x2ca   :  { %4918 = vmatmul.mubr.bf16.gmra.mxu1 %v11296_v3 }
 0x2cb   :  { %4925 = vmatprep.mubr.bf16.mxu1 %v11299_v52  ;;  %8262 = vmatpush3.bf16.msra.mxu1 %v9120_v57  ;;  %v9142_v57 = vld [vmem:[%s12107_s3 + $0x720] sm:$0xff]  }
 0x2cc   :  { %8224 = vmatpush3.bf16.msra.mxu0 %v9119_v17  ;;  %8263 = vmatprep.subr.bf16.mxu1 %v9122_v30 }
 0x2cd   :  { %8225 = vmatprep.subr.bf16.mxu0 %v9121_v8  ;;  %v9141_v8 = vld [vmem:[%s12107_s3 + $0x698] sm:$0xff]  }
 0x2cf   :  { %4861 = vmatmul.mubr.bf16.gmra.mxu0 %v11314_v62  ;;  %8264 = vmatpush3.bf16.msra.mxu1 %v9124_v50 }
 0x2d0   :  { %8226 = vmatpush3.bf16.msra.mxu0 %v9123_v2  ;;  %4966 = vmatprep.mubr.bf16.mxu0 %v11320_v53  ;;  %v11392_v2 = vld [vmem:[#allocation3 + $0x60] ss:$36 sps:$4 sm:$0xff]  }
 0x2d1   :  { %8227 = vmatprep.subr.bf16.mxu0 %v9125_v21  ;;  %8265 = vmatprep.subr.bf16.mxu1 %v9126_v22 }
 0x2d2   :  { %4926 = vmatmul.mubr.bf16.gmra.mxu1 %v11332_v25 }
 0x2d3   :  { %8266 = vmatpush3.bf16.msra.mxu1 %v9128_v39  ;;  %5031 = vmatprep.mubr.bf16.mxu1 %v11335_v11  ;;  %v9143_v39 = vld [vmem:[%s12107_s3 + $0x6e0] sm:$0xff]  }
 0x2d4   :  { %8228 = vmatpush3.bf16.msra.mxu0 %v9127_v41  ;;  %8267 = vmatprep.subr.bf16.mxu1 %v9129_v42 }
 0x2d5   :  { %8566 = vmatprep.subr.bf16.mxu0 %v9130_v16 }
 0x2d7   :  { %v7805_v55 = vpop.f32.mrf.mxu0  ;;  %4967 = vmatmul.mubr.bf16.vlgmr.msra.gmra.mxu0 %v11347_v27  ;;  %v7845_v47 = vpop.f32.mrf.mxu1  ;;  %8268 = vmatpush3.bf16.msra.mxu1 %v9131_v1 }
 0x2d8   :  { %4974 = vmatprep.mubr.bf16.mxu0 %v11353_v4  ;;  %8567 = vmatpush3.bf16.msra.mxu0 %v9130_v16 }
 0x2d9   :  { %v7806_v45 = vpop.f32.mrf.mxu0  ;;  %v7846_v7 = vpop.f32.mrf.mxu1  ;;  %8568 = vmatprep.subr.bf16.mxu0 %v9132_v6  ;;  %8305 = vmatprep.subr.bf16.mxu1 %v9133_v58 }
 0x2da   :  { %v7807_v5 = vadd.f32 %v7806_v45, %v7805_v55  ;;  %v7847_v37 = vadd.f32 %v7846_v7, %v7845_v47  ;;  %5032 = vmatmul.mubr.bf16.vlgmr.msra.gmra.mxu1 %v11362_v40  ;;  %v9148_v7 = vld [vmem:[%s12107_s3 + $0x710] sm:$0xff]  }
 0x2db   :  { %v7808_v38 = vpop.f32.mrf.mxu0  ;;  %v7848_v48 = vpop.f32.mrf.mxu1  ;;  %5039 = vmatprep.mubr.bf16.mxu1 %v10802_v63  ;;  %8306 = vmatpush3.bf16.msra.mxu1 %v9134_v43  ;;  %v9139_v63 = vld [vmem:[%s12107_s3 + $0x728] sm:$0xff]   ;;  %v9146_v43 = vld [vmem:[%s12107_s3 + $0x6d8] sm:$0xff]  }
 0x2dc   :  { %v11369_v46 = vadd.f32 %v7847_v37, %v7807_v5  ;;  %8569 = vmatpush3.bf16.msra.mxu0 %v9132_v6  ;;  %8307 = vmatprep.subr.bf16.mxu1 %v9136_v23  ;;  %v9144_v6 = vld [vmem:[%s12107_s3 + $0x690] sm:$0xff]  }
 0x2dd   :  { %v7809_v28 = vpop.f32.mrf.mxu0  ;;  %v7849_v24 = vpop.f32.mrf.mxu1  ;;  %8570 = vmatprep.subr.bf16.mxu0 %v9135_v36  ;;  %v11413_v23 = vld [vmem:[#allocation3 + $0xec] ss:$36 sps:$4 sm:$0xff]  }
 0x2de   :  { %v7810_v32 = vadd.f32 %v7809_v28, %v7808_v38  ;;  %v7850_v10 = vadd.f32 %v7849_v24, %v7848_v48  ;;  %v9147_v38 = vld [vmem:[%s12107_s3 + $0x688] sm:$0xff]   ;;  %v11425_v24 = vld [vmem:[#allocation3 + $0xf4] ss:$36 sps:$4 sm:$0xff]  }
 0x2df   :  { %v7811_v20 = vpop.f32.mrf.mxu0  ;;  %4975 = vmatmul.mubr.bf16.gmra.mxu0 %v10786_v35  ;;  %v7851_v14 = vpop.f32.mrf.mxu1  ;;  %8308 = vmatpush3.bf16.msra.mxu1 %v9137_v12  ;;  %v11422_v12 = vld [vmem:[#allocation3 + $0xa8] ss:$36 sps:$4 sm:$0xff]  }
 0x2e0   :  { %v11381_v59 = vadd.f32 %v7850_v10, %v7810_v32  ;;  %4982 = vmatprep.mubr.bf16.mxu0 %v11383_v0  ;;  %8571 = vmatpush3.bf16.msra.mxu0 %v9135_v36 }
 0x2e1   :  { %v7812_v19 = vpop.f32.mrf.mxu0  ;;  %v7852_v30 = vpop.f32.mrf.mxu1  ;;  %8572 = vmatprep.subr.bf16.mxu0 %v9138_v54  ;;  %8309 = vmatprep.subr.bf16.mxu1 %v9139_v63 }
 0x2e2   :  { %v7813_v17 = vadd.f32 %v7812_v19, %v7811_v20  ;;  %v7853_v50 = vadd.f32 %v7852_v30, %v7851_v14  ;;  %5040 = vmatmul.mubr.bf16.gmra.mxu1 %v11392_v2  ;;  %v9151_v19 = vld [vmem:[%s12107_s3 + $0x708] sm:$0xff]  }
 0x2e3   :  { %v7814_v21 = vpop.f32.mrf.mxu0  ;;  %v7854_v22 = vpop.f32.mrf.mxu1  ;;  %5047 = vmatprep.mubr.bf16.mxu1 %v10839_v44  ;;  %8310 = vmatpush3.bf16.msra.mxu1 %v9140_v13  ;;  %v9145_v44 = vld [vmem:[%s12107_s3 + $0x718] sm:$0xff]   ;;  %v9150_v13 = vld [vmem:[%s12107_s3 + $0x680] sm:$0xff]   ;;  %v11439_v30 = vld [vmem:[#allocation3 + $0xe8] ss:$36 sps:$4 sm:$0xff]  }
 0x2e4   :  { %v11399_v41 = vadd.f32 %v7853_v50, %v7813_v17  ;;  %8573 = vmatpush3.bf16.msra.mxu0 %v9138_v54  ;;  %8311 = vmatprep.subr.bf16.mxu1 %v9142_v57  ;;  %v9149_v54 = vld [vmem:[%s12107_s3 + $0x6d0] sm:$0xff]   ;;  %v9152_v50 = vld [vmem:[%s12107_s3 + $0x6c8] sm:$0xff]  }
 0x2e5   :  { %v7815_v42 = vpop.f32.mrf.mxu0  ;;  %v7855_v1 = vpop.f32.mrf.mxu1  ;;  %8574 = vmatprep.subr.bf16.mxu0 %v9141_v8 }
 0x2e6   :  { %v7816_v16 = vadd.f32 %v7815_v42, %v7814_v21  ;;  %v7856_v58 = vadd.f32 %v7855_v1, %v7854_v22  ;;  %v11447_v22 = vld [vmem:[#allocation3 + $0x20] ss:$36 sps:$4 sm:$0xff]  }
 0x2e7   :  { %v7817_v55 = vpop.f32.mrf.mxu0  ;;  %4983 = vmatmul.mubr.bf16.gmra.mxu0 %v10822_v26  ;;  %v7857_v47 = vpop.f32.mrf.mxu1  ;;  %8312 = vmatpush3.bf16.msra.mxu1 %v9143_v39  ;;  %v9153_v42 = vld [vmem:[%s12107_s3 + $0x700] sm:$0xff]  }
 0x2e8   :  { %v11411_v45 = vadd.f32 %v7856_v58, %v7816_v16  ;;  %4990 = vmatprep.mubr.bf16.mxu0 %v11413_v23  ;;  %8575 = vmatpush3.bf16.msra.mxu0 %v9141_v8  ;;  %v11456_v58 = vld [vmem:[#allocation3 + $0xf0] ss:$36 sps:$4 sm:$0xff]  }
 0x2e9   :  { %v7818_v5 = vpop.f32.mrf.mxu0  ;;  %v7858_v37 = vpop.f32.mrf.mxu1  ;;  %8576 = vmatprep.subr.bf16.mxu0 %v9144_v6  ;;  %8313 = vmatprep.subr.bf16.mxu1 %v9145_v44 }
 0x2ea   :  { %v7819_v36 = vadd.f32 %v7818_v5, %v7817_v55  ;;  %v7859_v48 = vadd.f32 %v7858_v37, %v7857_v47  ;;  %5048 = vmatmul.mubr.bf16.gmra.mxu1 %v11422_v12 }
 0x2eb   :  { %v7820_v28 = vpop.f32.mrf.mxu0  ;;  %v7860_v32 = vpop.f32.mrf.mxu1  ;;  %5055 = vmatprep.mubr.bf16.mxu1 %v11425_v24  ;;  %8314 = vmatpush3.bf16.msra.mxu1 %v9146_v43  ;;  %v9155_v43 = vld [vmem:[%s12107_s3 + $0x6c0] sm:$0xff]  }
 0x2ec   :  { %v11431_v63 = vadd.f32 %v7859_v48, %v7819_v36  ;;  %8577 = vmatpush3.bf16.msra.mxu0 %v9144_v6  ;;  %8315 = vmatprep.subr.bf16.mxu1 %v9148_v7  ;;  %v9154_v6 = vld [vmem:[%s12107_s3 + $0x7b8] sm:$0xff]  }
 0x2ed   :  { %v7821_v10 = vpop.f32.mrf.mxu0  ;;  %v7861_v14 = vpop.f32.mrf.mxu1  ;;  %8578 = vmatprep.subr.bf16.mxu0 %v9147_v38  ;;  %v9156_v36 = vld [vmem:[%s12107_s3 + $0x778] sm:$0xff]  }
 0x2ee   :  { %v7822_v20 = vadd.f32 %v7821_v10, %v7820_v28  ;;  %v7862_v57 = vadd.f32 %v7861_v14, %v7860_v32  ;;  %v9158_v48 = vld [vmem:[%s12107_s3 + $0x838] sm:$0xff]   ;;  %v11482_v14 = vld [vmem:[#allocation3 + $0xb0] ss:$36 sps:$4 sm:$0xff]  }
 0x2ef   :  { %v7823_v17 = vpop.f32.mrf.mxu0  ;;  %4991 = vmatmul.mubr.bf16.gmra.mxu0 %v11439_v30  ;;  %v7863_v8 = vpop.f32.mrf.mxu1  ;;  %8316 = vmatpush3.bf16.msra.mxu1 %v9149_v54  ;;  %v11474_v54 = vld [vmem:[#allocation3 + $0x68] ss:$36 sps:$4 sm:$0xff]   ;;  %v9160_v10 = vld [vmem:[%s12107_s3 + $0x7f8] sm:$0xff]  }
 0x2f0   :  { %v11445_v21 = vadd.f32 %v7862_v57, %v7822_v20  ;;  %8579 = vmatpush3.bf16.msra.mxu0 %v9147_v38  ;;  %8582 = vmatprep.mubr.bf16.mxu0 %v11447_v22  ;;  %v9162_v57 = vld [vmem:[%s12107_s3 + $0x830] sm:$0xff]  }
 0x2f1   :  { %v7824_v39 = vpop.f32.mrf.mxu0  ;;  %v7864_v1 = vpop.f32.mrf.mxu1  ;;  %8580 = vmatprep.subr.bf16.mxu0 %v9150_v13  ;;  %8317 = vmatprep.subr.bf16.mxu1 %v9151_v19  ;;  %v9159_v19 = vld [vmem:[%s12107_s3 + $0x770] sm:$0xff]  }
 0x2f2   :  { %v7825_v16 = vadd.f32 %v7824_v39, %v7823_v17  ;;  %v7865_v44 = vadd.f32 %v7864_v1, %v7863_v8  ;;  %5056 = vmatmul.mubr.bf16.gmra.mxu1 %v11456_v58  ;;  %v9161_v8 = vld [vmem:[%s12107_s3 + $0x7a8] sm:$0xff]  }
 0x2f3   :  { %v7826_v55 = vpop.f32.mrf.mxu0  ;;  %v7866_v47 = vpop.f32.mrf.mxu1  ;;  %8318 = vmatpush3.bf16.msra.mxu1 %v9152_v50  ;;  %5746 = vmatprep.mubr.bf16.mxu1 %v11182_v29  ;;  %v9157_v29 = vld [vmem:[%s12107_s3 + $0x7b0] sm:$0xff]  }
 0x2f4   :  { %v11463_v5 = vadd.f32 %v7865_v44, %v7825_v16  ;;  %8581 = vmatpush3.bf16.msra.mxu0 %v9150_v13  ;;  %8319 = vmatprep.subr.bf16.mxu1 %v9153_v42  ;;  %v9164_v16 = vld [vmem:[%s12107_s3 + $0x7f0] sm:$0xff]   ;;  %v9163_v44 = vld [vmem:[%s12107_s3 + $0x768] sm:$0xff]  }
 0x2f5   :  { %v7827_v7 = vpop.f32.mrf.mxu0  ;;  %v7867_v38 = vpop.f32.mrf.mxu1  ;;  %8345 = vmatprep.subr.bf16.mxu0 %v9154_v6 }
 0x2f6   :  { %v7828_v37 = vadd.f32 %v7827_v7, %v7826_v55  ;;  %v7868_v28 = vadd.f32 %v7867_v38, %v7866_v47 }
 0x2f7   :  { %v7885_v32 = vpop.f32.mrf.mxu0  ;;  %8583 = vmatmul.mubr.bf16.vlgmr.msra.gmra.mxu0 %v11474_v54  ;;  %8320 = vmatpush3.bf16.msra.mxu1 %v9155_v43 }
 0x2f8   :  { %v11480_v20 = vadd.f32 %v7868_v28, %v7828_v37  ;;  %8586 = vmatprep.mubr.bf16.mxu0 %v11482_v14  ;;  %8346 = vmatpush3.bf16.msra.mxu0 %v9156_v36  ;;  %v11510_v36 = vld [vmem:[#allocation3 + $0xf8] ss:$36 sps:$4 sm:$0xff]   ;;  %v9168_v37 = vld [vmem:[%s12107_s3 + $0x7e8] sm:$0xff]   ;;  %v9170_v28 = vld [vmem:[%s12107_s3 + $0x820] sm:$0xff]  }
 0x2f9   :  { %v7886_v13 = vpop.f32.mrf.mxu0  ;;  %8347 = vmatprep.subr.bf16.mxu0 %v9157_v29  ;;  %8385 = vmatprep.subr.bf16.mxu1 %v9158_v48 }
 0x2fa   :  { %v7887_v17 = vadd.f32 %v7886_v13, %v7885_v32  ;;  %5747 = vmatmul.mubr.bf16.vlgmr.msra.gmra.mxu1 %v11206_v31  ;;  %v7925_v39 = vpop.f32.mrf.mxu1  ;;  %v9169_v13 = vld [vmem:[%s12107_s3 + $0x798] sm:$0xff]  }
 0x2fb   :  { %v7888_v50 = vpop.f32.mrf.mxu0  ;;  %5754 = vmatprep.mubr.bf16.mxu1 %v11212_v60  ;;  %8386 = vmatpush3.bf16.msra.mxu1 %v9160_v10  ;;  %v9165_v60 = vld [vmem:[%s12107_s3 + $0x7a0] sm:$0xff]  }
 0x2fc   :  { %v3157_v42 = vadd.f32 %v7887_v17, %v11369_v46  ;;  %8348 = vmatpush3.bf16.msra.mxu0 %v9159_v19  ;;  %v7926_v6 = vpop.f32.mrf.mxu1  ;;  %8387 = vmatprep.subr.bf16.mxu1 %v9162_v57  ;;  %v9166_v46 = vld [vmem:[%s12107_s3 + $0x828] sm:$0xff]   ;;  %v9172_v17 = vld [vmem:[%s12107_s3 + $0x7e0] sm:$0xff]  }
 0x2fd   :  { %v7889_v1 = vpop.f32.mrf.mxu0  ;;  %v7927_v55 = vadd.f32 %v7926_v6, %v7925_v39  ;;  %8349 = vmatprep.subr.bf16.mxu0 %v9161_v8 }
 0x2fe   :  { %v7890_v31 = vadd.f32 %v7889_v1, %v7888_v50  ;;  %v7928_v43 = vpop.f32.mrf.mxu1 }
 0x2ff   :  { %v7891_v47 = vpop.f32.mrf.mxu0  ;;  %8587 = vmatmul.mubr.bf16.gmra.mxu0 %v11510_v36  ;;  %8388 = vmatpush3.bf16.msra.mxu1 %v9164_v16  ;;  %v11516_v38 = vadd.f32 %v7927_v55, %v3157_v42  ;;  %v9173_v16 = vld [vmem:[%s12107_s3 + $0x790] sm:$0xff]  }
 0x300   :  { %v3160_v7 = vadd.f32 %v7890_v31, %v11381_v59  ;;  %8350 = vmatpush3.bf16.msra.mxu0 %v9163_v44  ;;  %5811 = vmatprep.mubr.bf16.mxu0 %v11137_v51  ;;  %v7929_v48 = vpop.f32.mrf.mxu1  ;;  %v9167_v59 = vld [vmem:[%s12107_s3 + $0x760] sm:$0xff]   ;;  %v9176_v31 = vld [vmem:[%s12107_s3 + $0x7d8] sm:$0xff]  }
 0x301   :  { %v7892_v29 = vpop.f32.mrf.mxu0  ;;  %v7930_v10 = vadd.f32 %v7929_v48, %v7928_v43  ;;  %8351 = vmatprep.subr.bf16.mxu0 %v9165_v60  ;;  %8389 = vmatprep.subr.bf16.mxu1 %v9166_v46  ;;  %v9178_v43 = vld [vmem:[%s12107_s3 + $0x810] sm:$0xff]  }
 0x302   :  { %v7893_v32 = vadd.f32 %v7892_v29, %v7891_v47  ;;  %5755 = vmatmul.mubr.bf16.gmra.mxu1 %v11242_v33  ;;  %v7931_v19 = vpop.f32.mrf.mxu1  ;;  %v9171_v33 = vld [vmem:[%s12107_s3 + $0x758] sm:$0xff]   ;;  %v9175_v47 = vld [vmem:[%s12107_s3 + $0x750] sm:$0xff]  }
 0x303   :  { %v7894_v51 = vpop.f32.mrf.mxu0  ;;  %5762 = vmatprep.mubr.bf16.mxu1 %v11248_v56  ;;  %8390 = vmatpush3.bf16.msra.mxu1 %v9168_v37  ;;  %v11534_v8 = vadd.f32 %v7930_v10, %v3160_v7  ;;  %v9177_v37 = vld [vmem:[%s12107_s3 + $0x788] sm:$0xff]  }
 0x304   :  { %v3165_v57 = vadd.f32 %v7893_v32, %v11399_v41  ;;  %8352 = vmatpush3.bf16.msra.mxu0 %v9167_v59  ;;  %v7932_v39 = vpop.f32.mrf.mxu1  ;;  %8391 = vmatprep.subr.bf16.mxu1 %v9170_v28  ;;  %v9174_v41 = vld [vmem:[%s12107_s3 + $0x818] sm:$0xff]   ;;  %v9180_v28 = vld [vmem:[%s12107_s3 + $0x7d0] sm:$0xff]  }
 0x305   :  { %v7895_v50 = vpop.f32.mrf.mxu0  ;;  %v7933_v42 = vadd.f32 %v7932_v39, %v7931_v19  ;;  %8353 = vmatprep.subr.bf16.mxu0 %v9169_v13  ;;  %v9181_v19 = vld [vmem:[%s12107_s3 + $0x780] sm:$0xff]   ;;  %v9184_v39 = vld [vmem:[%s12107_s3 + $0x7c8] sm:$0xff]  }
 0x306   :  { %v7896_v56 = vadd.f32 %v7895_v50, %v7894_v51  ;;  %v7934_v6 = vpop.f32.mrf.mxu1 }
 0x307   :  { %v7897_v1 = vpop.f32.mrf.mxu0  ;;  %8392 = vmatpush3.bf16.msra.mxu1 %v9172_v17  ;;  %v11549_v55 = vadd.f32 %v7933_v42, %v3165_v57  ;;  %v9183_v42 = vld [vmem:[%s12107_s3 + $0x740] sm:$0xff]  }
 0x308   :  { %v3168_v44 = vadd.f32 %v7896_v56, %v11411_v45  ;;  %8354 = vmatpush3.bf16.msra.mxu0 %v9171_v33  ;;  %v7935_v46 = vpop.f32.mrf.mxu1  ;;  %8393 = vmatprep.subr.bf16.mxu1 %v9174_v41 }
 0x309   :  { %v7898_v60 = vpop.f32.mrf.mxu0  ;;  %v7936_v7 = vadd.f32 %v7935_v46, %v7934_v6  ;;  %8355 = vmatprep.subr.bf16.mxu0 %v9173_v16  ;;  %v9185_v16 = vld [vmem:[%s12107_s3 + $0x800] sm:$0xff]   ;;  %v9186_v6 = vld [vmem:[%s12107_s3 + $0x8b8] sm:$0xff]  }
 0x30a   :  { %v7899_v45 = vadd.f32 %v7898_v60, %v7897_v1  ;;  %5763 = vmatmul.mubr.bf16.gmra.mxu1 %v11278_v9  ;;  %v7937_v48 = vpop.f32.mrf.mxu1  ;;  %v9179_v9 = vld [vmem:[%s12107_s3 + $0x748] sm:$0xff]   ;;  %v9187_v46 = vld [vmem:[%s12107_s3 + $0x7c0] sm:$0xff]  }
 0x30b   :  { %v7900_v29 = vpop.f32.mrf.mxu0  ;;  %5770 = vmatprep.mubr.bf16.mxu1 %v11284_v34  ;;  %8394 = vmatpush3.bf16.msra.mxu1 %v9176_v31  ;;  %v11566_v32 = vadd.f32 %v7936_v7, %v3168_v44 }
 0x30c   :  { %v3173_v59 = vadd.f32 %v7899_v45, %v11431_v63  ;;  %8356 = vmatpush3.bf16.msra.mxu0 %v9175_v47  ;;  %v7938_v13 = vpop.f32.mrf.mxu1  ;;  %8395 = vmatprep.subr.bf16.mxu1 %v9178_v43  ;;  %v9182_v63 = vld [vmem:[%s12107_s3 + $0x808] sm:$0xff]  }
 0x30d   :  { %v7901_v10 = vpop.f32.mrf.mxu0  ;;  %v7939_v51 = vadd.f32 %v7938_v13, %v7937_v48  ;;  %8357 = vmatprep.subr.bf16.mxu0 %v9177_v37 }
 0x30e   :  { %v7902_v34 = vadd.f32 %v7901_v10, %v7900_v29  ;;  %v7940_v17 = vpop.f32.mrf.mxu1 }
 0x30f   :  { %v7903_v57 = vpop.f32.mrf.mxu0  ;;  %8396 = vmatpush3.bf16.msra.mxu1 %v9180_v28  ;;  %v11581_v33 = vadd.f32 %v7939_v51, %v3173_v59 }
 0x310   :  { %v3176_v50 = vadd.f32 %v7902_v34, %v11445_v21  ;;  %8358 = vmatpush3.bf16.msra.mxu0 %v9179_v9  ;;  %v7941_v56 = vpop.f32.mrf.mxu1  ;;  %8397 = vmatprep.subr.bf16.mxu1 %v9182_v63  ;;  %v9191_v63 = vld [vmem:[%s12107_s3 + $0x870] sm:$0xff]  }
 0x311   :  { %v7904_v41 = vpop.f32.mrf.mxu0  ;;  %v7942_v1 = vadd.f32 %v7941_v56, %v7940_v17  ;;  %8359 = vmatprep.subr.bf16.mxu0 %v9181_v19 }
 0x312   :  { %v7905_v21 = vadd.f32 %v7904_v41, %v7903_v57  ;;  %5771 = vmatmul.mubr.bf16.gmra.mxu1 %v11314_v62  ;;  %v7943_v31 = vpop.f32.mrf.mxu1  ;;  %v9188_v62 = vld [vmem:[%s12107_s3 + $0x878] sm:$0xff]  }
 0x313   :  { %v7906_v44 = vpop.f32.mrf.mxu0  ;;  %8398 = vmatpush3.bf16.msra.mxu1 %v9184_v39  ;;  %5876 = vmatprep.mubr.bf16.mxu1 %v11320_v53  ;;  %v11598_v47 = vadd.f32 %v7942_v1, %v3176_v50  ;;  %v9189_v53 = vld [vmem:[%s12107_s3 + $0x8b0] sm:$0xff]   ;;  %v9194_v50 = vld [vmem:[%s12107_s3 + $0x868] sm:$0xff]   ;;  %v9199_v1 = vld [vmem:[%s12107_s3 + $0x8e0] sm:$0xff]  }
 0x314   :  { %v3181_v60 = vadd.f32 %v7905_v21, %v11463_v5  ;;  %8360 = vmatpush3.bf16.msra.mxu0 %v9183_v42  ;;  %v7944_v45 = vpop.f32.mrf.mxu1  ;;  %8399 = vmatprep.subr.bf16.mxu1 %v9185_v16  ;;  %v9190_v5 = vld [vmem:[%s12107_s3 + $0x8f8] sm:$0xff]   ;;  %v9197_v21 = vld [vmem:[%s12107_s3 + $0x860] sm:$0xff]  }
 0x315   :  { %v7907_v43 = vpop.f32.mrf.mxu0  ;;  %v7945_v37 = vadd.f32 %v7944_v45, %v7943_v31  ;;  %8425 = vmatprep.subr.bf16.mxu0 %v9186_v6 }
 0x316   :  { %v7908_v7 = vadd.f32 %v7907_v43, %v7906_v44  ;;  %v7946_v29 = vpop.f32.mrf.mxu1  ;;  %v9202_v43 = vld [vmem:[%s12107_s3 + $0x8d8] sm:$0xff]  }
 0x317   :  { %v8536_v48 = vpop.f32.mrf.mxu0  ;;  %5812 = vmatmul.mubr.bf16.vlgmr.msra.gmra.mxu0 %v11224_v61  ;;  %8400 = vmatpush3.bf16.msra.mxu1 %v9187_v46  ;;  %v3246_v10 = vadd.f32 %v7945_v37, %v3181_v60 }
 0x318   :  { %v3184_v59 = vadd.f32 %v7908_v7, %v11480_v20  ;;  %v11612_v28 = vadd.f32 %v8536_v48, %v11549_v55  ;;  %5819 = vmatprep.mubr.bf16.mxu0 %v11227_v49  ;;  %8426 = vmatpush3.bf16.msra.mxu0 %v9188_v62  ;;  %v7947_v13 = vpop.f32.mrf.mxu1  ;;  %v9193_v20 = vld [vmem:[%s12107_s3 + $0x8f0] sm:$0xff]   ;;  %v9192_v49 = vld [vmem:[%s12107_s3 + $0x8a8] sm:$0xff]  }
 0x319   :  { %v3286_v9 = vpop.f32.mrf.mxu0  ;;  %v7948_v34 = vadd.f32 %v7947_v13, %v7946_v29  ;;  %8427 = vmatprep.subr.bf16.mxu0 %v9189_v53  ;;  %8590 = vmatprep.subr.bf16.mxu1 %v9190_v5  ;;  %v9203_v62 = vld [vmem:[%s12107_s3 + $0x850] sm:$0xff]   ;;  %v9206_v53 = vld [vmem:[%s12107_s3 + $0x848] sm:$0xff]   ;;  %v9207_v29 = vld [vmem:[%s12107_s3 + $0x880] sm:$0xff]  }
 0x31a   :  { %v11622_v61 = vadd.f32 %v3286_v9, %v11516_v38  ;;  %5877 = vmatmul.mubr.bf16.vlgmr.msra.gmra.mxu1 %v11347_v27  ;;  %v7977_v51 = vpop.f32.mrf.mxu1  ;;  %v9195_v27 = vld [vmem:[%s12107_s3 + $0x8a0] sm:$0xff]   ;;  %v9205_v7 = vld [vmem:[%s12107_s3 + $0x8d0] sm:$0xff]  }
 0x31b   :  { %v8537_v55 = vpop.f32.mrf.mxu0  ;;  %5884 = vmatprep.mubr.bf16.mxu1 %v11353_v4  ;;  %8591 = vmatpush3.bf16.msra.mxu1 %v9190_v5  ;;  %v3249_v57 = vadd.f32 %v7948_v34, %v3184_v59  ;;  %v9196_v4 = vld [vmem:[%s12107_s3 + $0x8e8] sm:$0xff]   ;;  %v9209_v59 = vld [vmem:[%s12107_s3 + $0x840] sm:$0xff]  }
 0x31c   :  { %v11629_v19 = vadd.f32 %v8537_v55, %v11566_v32  ;;  %8428 = vmatpush3.bf16.msra.mxu0 %v9191_v63  ;;  %v7978_v17 = vpop.f32.mrf.mxu1  ;;  %8592 = vmatprep.subr.bf16.mxu1 %v9193_v20 }
 0x31d   :  { %v11632_v38 = vpop.f32.mrf.mxu0  ;;  %v11637_v39 = vadd.f32 %v7978_v17, %v7977_v51  ;;  %8429 = vmatprep.subr.bf16.mxu0 %v9192_v49  ;;  %v9287_v49 = vld [vmem:[#allocation3 + $0x64] ss:$36 sps:$4 sm:$0xff]  }
 0x31e   :  { %v11645_v41 = vpop.f32.mrf.mxu1 }
 0x31f   :  { %v8540_v32 = vpop.f32.mrf.mxu0  ;;  %5820 = vmatmul.mubr.bf16.gmra.mxu0 %v11260_v15  ;;  %8593 = vmatpush3.bf16.msra.mxu1 %v9193_v20  ;;  %v9198_v15 = vld [vmem:[%s12107_s3 + $0x898] sm:$0xff]  }
 0x320   :  { %v11648_v56 = vadd.f32 %v8540_v32, %v3246_v10  ;;  %5827 = vmatprep.mubr.bf16.mxu0 %v11263_v18  ;;  %8430 = vmatpush3.bf16.msra.mxu0 %v9194_v50  ;;  %v11651_v16 = vpop.f32.mrf.mxu1  ;;  %v9210_v10 = vld [vmem:[%s12107_s3 + $0x8c0] sm:$0xff]  }
 0x321   :  { %v3302_v42 = vpop.f32.mrf.mxu0  ;;  %8431 = vmatprep.subr.bf16.mxu0 %v9195_v27  ;;  %8594 = vmatprep.subr.bf16.mxu1 %v9196_v4 }
 0x322   :  { %v11660_v6 = vadd.f32 %v3302_v42, %v11581_v33  ;;  %5885 = vmatmul.mubr.bf16.gmra.mxu1 %v10786_v35  ;;  %v7983_v44 = vpop.f32.mrf.mxu1  ;;  %v9200_v33 = vld [vmem:[%s12107_s3 + $0x858] sm:$0xff]   ;;  %v9201_v35 = vld [vmem:[%s12107_s3 + $0x890] sm:$0xff]  }
 0x323   :  { %v8541_v18 = vpop.f32.mrf.mxu0  ;;  %5892 = vmatprep.mubr.bf16.mxu1 %v11383_v0  ;;  %8595 = vmatpush3.bf16.msra.mxu1 %v9196_v4 }
 0x324   :  { %v11666_v31 = vadd.f32 %v8541_v18, %v3249_v57  ;;  %8432 = vmatpush3.bf16.msra.mxu0 %v9197_v21  ;;  %v7984_v60 = vpop.f32.mrf.mxu1  ;;  %8596 = vmatprep.subr.bf16.mxu1 %v9199_v1 }
 0x325   :  { %v11672_v46 = vadd.f32 %v7984_v60, %v7983_v44  ;;  %8433 = vmatprep.subr.bf16.mxu0 %v9198_v15 }
 0x326   :  { %v11680_v0 = vpop.f32.mrf.mxu1 }
 0x327   :  { %5828 = vmatmul.mubr.bf16.gmra.mxu0 %v11296_v3  ;;  %8597 = vmatpush3.bf16.msra.mxu1 %v9199_v1  ;;  %v9204_v3 = vld [vmem:[%s12107_s3 + $0x888] sm:$0xff]  }
 0x328   :  { %5835 = vmatprep.mubr.bf16.mxu0 %v11299_v52  ;;  %8434 = vmatpush3.bf16.msra.mxu0 %v9200_v33  ;;  %v11684_v45 = vpop.f32.mrf.mxu1 }
 0x329   :  { %8435 = vmatprep.subr.bf16.mxu0 %v9201_v35  ;;  %8598 = vmatprep.subr.bf16.mxu1 %v9202_v43 }
 0x32a   :  { %5893 = vmatmul.mubr.bf16.gmra.mxu1 %v10822_v26  ;;  %v7989_v52 = vpop.f32.mrf.mxu1  ;;  %v9208_v26 = vld [vmem:[%s12107_s3 + $0x8c8] sm:$0xff]  }
 0x32b   :  { %5900 = vmatprep.mubr.bf16.mxu1 %v11413_v23  ;;  %8599 = vmatpush3.bf16.msra.mxu1 %v9202_v43 }
 0x32c   :  { %8436 = vmatpush3.bf16.msra.mxu0 %v9203_v62  ;;  %v7990_v37 = vpop.f32.mrf.mxu1  ;;  %8600 = vmatprep.subr.bf16.mxu1 %v9205_v7 }
 0x32d   :  { %v11700_v5 = vadd.f32 %v7990_v37, %v7989_v52  ;;  %8437 = vmatprep.subr.bf16.mxu0 %v9204_v3 }
 0x32e   :  { %v7992_v23 = vpop.f32.mrf.mxu1 }
 0x32f   :  { %5836 = vmatmul.mubr.bf16.gmra.mxu0 %v11332_v25  ;;  %8601 = vmatpush3.bf16.msra.mxu1 %v9205_v7  ;;  %v7988_v7 = vadd.f32 %v11684_v45, %v11680_v0 }
 0x330   :  { %8438 = vmatpush3.bf16.msra.mxu0 %v9206_v53  ;;  %5941 = vmatprep.mubr.bf16.mxu0 %v11335_v11  ;;  %v7993_v48 = vpop.f32.mrf.mxu1  ;;  %v11720_v11 = vpop.f32.mrf.mxu0 }
 0x331   :  { %v11716_v13 = vadd.f32 %v7993_v48, %v7992_v23  ;;  %8439 = vmatprep.subr.bf16.mxu0 %v9207_v29  ;;  %8602 = vmatprep.subr.bf16.mxu1 %v9208_v26 }
 0x332   :  { %5901 = vmatmul.mubr.bf16.gmra.mxu1 %v11439_v30  ;;  %v7995_v25 = vpop.f32.mrf.mxu1 }
 0x333   :  { %8603 = vmatpush3.bf16.msra.mxu1 %v9208_v26  ;;  %8606 = vmatprep.mubr.bf16.mxu1 %v11447_v22 }
 0x334   :  { %8440 = vmatpush3.bf16.msra.mxu0 %v9209_v59  ;;  %v7996_v9 = vpop.f32.mrf.mxu1  ;;  %8604 = vmatprep.subr.bf16.mxu1 %v9210_v10 }
 0x335   :  { %v11722_v63 = vadd.f32 %v7996_v9, %v7995_v25 }
 0x336   :  { %v7998_v34 = vpop.f32.mrf.mxu1 }
 0x337   :  { %v8017_v20 = vpop.f32.mrf.mxu0  ;;  %5942 = vmatmul.mubr.bf16.vlgmr.msra.gmra.mxu0 %v11362_v40  ;;  %8605 = vmatpush3.bf16.msra.mxu1 %v9210_v10  ;;  %v7982_v40 = vadd.f32 %v11651_v16, %v11645_v41 }
 0x338   :  { %5949 = vmatprep.mubr.bf16.mxu0 %v9287_v49  ;;  %v7999_v30 = vpop.f32.mrf.mxu1 }
 0x339   :  { %v8018_v55 = vpop.f32.mrf.mxu0  ;;  %v11725_v57 = vadd.f32 %v7999_v30, %v7998_v34 }
 0x33a   :  { %v8019_v51 = vadd.f32 %v8018_v55, %v8017_v20  ;;  %8607 = vmatmul.mubr.bf16.vlgmr.msra.gmra.mxu1 %v11474_v54  ;;  %v8057_v17 = vpop.f32.mrf.mxu1  ;;  %v9288_v54 = vld [vmem:[#allocation3 + $0xac] ss:$36 sps:$4 sm:$0xff]  }
 0x33b   :  { %v8020_v22 = vpop.f32.mrf.mxu0  ;;  %8610 = vmatprep.mubr.bf16.mxu1 %v11482_v14 }
 0x33c   :  { %v3994_v50 = vadd.f32 %v8019_v51, %v11637_v39  ;;  %v8058_v4 = vpop.f32.mrf.mxu1 }
 0x33d   :  { %v8021_v27 = vpop.f32.mrf.mxu0  ;;  %v8059_v42 = vadd.f32 %v8058_v4, %v8057_v17 }
 0x33e   :  { %v8022_v32 = vadd.f32 %v8021_v27, %v8020_v22  ;;  %v8060_v1 = vpop.f32.mrf.mxu1 }
 0x33f   :  { %v8023_v21 = vpop.f32.mrf.mxu0  ;;  %v11732_v18 = vadd.f32 %v8059_v42, %v3994_v50  ;;  %5950 = vmatmul.mubr.bf16.gmra.mxu0 %v11392_v2 }
 0x340   :  { %v3997_v15 = vadd.f32 %v8022_v32, %v7982_v40  ;;  %5957 = vmatprep.mubr.bf16.mxu0 %v9288_v54  ;;  %v8061_v39 = vpop.f32.mrf.mxu1 }
 0x341   :  { %v8024_v44 = vpop.f32.mrf.mxu0  ;;  %v8062_v14 = vadd.f32 %v8061_v39, %v8060_v1 }
 0x342   :  { %v8025_v60 = vadd.f32 %v8024_v44, %v8023_v21  ;;  %8611 = vmatmul.mubr.bf16.gmra.mxu1 %v11510_v36  ;;  %v8063_v35 = vpop.f32.mrf.mxu1 }
 0x343   :  { %v8026_v33 = vpop.f32.mrf.mxu0  ;;  %v4062_v16 = vadd.f32 %v8062_v14, %v3997_v15 }
 0x344   :  { %v4002_v41 = vadd.f32 %v8025_v60, %v11672_v46  ;;  %v8064_v62 = vpop.f32.mrf.mxu1 }
 0x345   :  { %v8027_v43 = vpop.f32.mrf.mxu0  ;;  %v8065_v2 = vadd.f32 %v8064_v62, %v8063_v35 }
 0x346   :  { %v8028_v3 = vadd.f32 %v8027_v43, %v8026_v33  ;;  %v8066_v37 = vpop.f32.mrf.mxu1 }
 0x347   :  { %v8029_v52 = vpop.f32.mrf.mxu0  ;;  %v4067_v29 = vadd.f32 %v8065_v2, %v4002_v41  ;;  %5958 = vmatmul.mubr.bf16.gmra.mxu0 %v11422_v12 }
 0x348   :  { %v4005_v53 = vadd.f32 %v8028_v3, %v7988_v7  ;;  %5965 = vmatprep.mubr.bf16.mxu0 %v11425_v24  ;;  %v8067_v26 = vpop.f32.mrf.mxu1 }
 0x349   :  { %v8030_v36 = vpop.f32.mrf.mxu0  ;;  %v8068_v46 = vadd.f32 %v8067_v26, %v8066_v37 }
 0x34a   :  { %v8031_v23 = vadd.f32 %v8030_v36, %v8029_v52  ;;  %v8069_v59 = vpop.f32.mrf.mxu1 }
 0x34b   :  { %v8032_v48 = vpop.f32.mrf.mxu0  ;;  %v4070_v25 = vadd.f32 %v8068_v46, %v4005_v53  ;;  %v11757_v53 = vadd.f32 %v11632_v38, %v11534_v8 }
 0x34c   :  { %v4010_v10 = vadd.f32 %v8031_v23, %v11700_v5  ;;  %v8070_v45 = vpop.f32.mrf.mxu1 }
 0x34d   :  { %v8033_v0 = vpop.f32.mrf.mxu0  ;;  %v8071_v20 = vadd.f32 %v8070_v45, %v8069_v59 }
 0x34e   :  { %v8034_v9 = vadd.f32 %v8033_v0, %v8032_v48  ;;  %v8072_v49 = vpop.f32.mrf.mxu1 }
 0x34f   :  { %v8035_v34 = vpop.f32.mrf.mxu0  ;;  %v4075_v12 = vadd.f32 %v8071_v20, %v4010_v10  ;;  %5966 = vmatmul.mubr.bf16.gmra.mxu0 %v11456_v58 }
 0x350   :  { %v4013_v55 = vadd.f32 %v8034_v9, %v11716_v13  ;;  %v8073_v30 = vpop.f32.mrf.mxu1 }
 0x351   :  { %v8036_v24 = vpop.f32.mrf.mxu0  ;;  %v8074_v22 = vadd.f32 %v8073_v30, %v8072_v49 }
 0x352   :  { %v8037_v51 = vadd.f32 %v8036_v24, %v8035_v34  ;;  %v8075_v50 = vpop.f32.mrf.mxu1 }
 0x353   :  { %v8038_v17 = vpop.f32.mrf.mxu0  ;;  %v4078_v27 = vadd.f32 %v8074_v22, %v4013_v55  ;;  %v12151_v55 = vmov 0.0  }
 0x354   :  { %v4018_v5 = vadd.f32 %v8037_v51, %v11722_v63  ;;  %v8076_v40 = vpop.f32.mrf.mxu1  ;;  %8634 = vmatprep.subr.bf16.mxu1 %v12151_v55  ;;  %8614 = vmatprep.subr.bf16.mxu0 %v12151_v55 }
 0x355   :  { %v8039_v4 = vpop.f32.mrf.mxu0  ;;  %v8077_v42 = vadd.f32 %v8076_v40, %v8075_v50  ;;  %v9212_v50 = vld [vmem:[%s12109_s5 + $0x30] sm:$0xff]   ;;  %8650 = vmatprep.mubr.msk.bf16.mxu1 %vm9291_vm8, %v12151_v55  ;;  %8630 = vmatprep.mubr.msk.bf16.mxu0 %vm9291_vm8, %v12151_v55 }
 0x356   :  { %v8040_v32 = vadd.f32 %v8039_v4, %v8038_v17  ;;  %v8078_v21 = vpop.f32.mrf.mxu1 }
 0x357   :  { %v11746_v13 = vadd.f32 %v8077_v42, %v4018_v5  ;;  %v8097_v15 = vpop.f32.mrf.mxu0  ;;  %v11787_v42 = vadd.f32 %v11720_v11, %v11598_v47 }
 0x358   :  { %v4021_v1 = vadd.f32 %v8040_v32, %v11725_v57  ;;  %v8079_v58 = vpop.f32.mrf.mxu1 }
 0x359   :  { %v8098_v54 = vpop.f32.mrf.mxu0  ;;  %v8080_v44 = vadd.f32 %v8079_v58, %v8078_v21 }
 0x35a   :  { %v8099_v39 = vadd.f32 %v8098_v54, %v8097_v15  ;;  %v8560_v60 = vpop.f32.mrf.mxu1  ;;  %v9213_v15 = vld [vmem:[%s12109_s5 + $0x78] sm:$0xff]  }
 0x35b   :  { %v11748_v14 = vadd.f32 %v8080_v44, %v4021_v1  ;;  %v8100_v33 = vpop.f32.mrf.mxu0  ;;  %8615 = vmatpush3.bf16.msra.mxu0 %v9213_v15  ;;  %v9223_v15 = vld [vmem:[%s12109_s5 + $0x50] sm:$0xff]  }
 0x35c   :  { %v4124_v63 = vadd.f32 %v8099_v39, %v11732_v18  ;;  %v4188_v35 = vpop.f32.mrf.mxu1  ;;  %8616 = vmatprep.subr.bf16.mxu0 %v12151_v55 }
 0x35d   :  { %v8101_v41 = vpop.f32.mrf.mxu0 }
 0x35e   :  { %v8102_v43 = vadd.f32 %v8101_v41, %v8100_v33  ;;  %v11751_v62 = vadd.f32 %v4188_v35, %v4124_v63  ;;  %v8561_v7 = vpop.f32.mrf.mxu1 }
 0x35f   :  { %v8103_v57 = vpop.f32.mrf.mxu0 }
 0x360   :  { %v4219_v3 = vmax.f32 %v11622_v61, %v11751_v62  ;;  %v4127_v2 = vadd.f32 %v8102_v43, %v4062_v16  ;;  %v4191_v52 = vpop.f32.mrf.mxu1 }
 0x361   :  { %v8104_v37 = vpop.f32.mrf.mxu0 }
 0x362   :  { %v8105_v36 = vadd.f32 %v8104_v37, %v8103_v57  ;;  %v11759_v26 = vadd.f32 %v4191_v52, %v4127_v2  ;;  %v8564_v48 = vpop.f32.mrf.mxu1  ;;  %v9217_v2 = vld [vmem:[%s12109_s5 + $0x68] sm:$0xff]  }
 0x363   :  { %v8106_v18 = vpop.f32.mrf.mxu0 }
 0x364   :  { %v4132_v23 = vadd.f32 %v8105_v36, %v4067_v29  ;;  %v4220_v46 = vmax.f32 %v11757_v53, %v11759_v26  ;;  %v4204_v8 = vpop.f32.mrf.mxu1  ;;  %v9211_v29 = vld [vmem:[%s12109_s5 + $0x38] sm:$0xff]  }
 0x365   :  { %v8107_v59 = vpop.f32.mrf.mxu0  ;;  %8635 = vmatpush3.bf16.msra.mxu1 %v9211_v29 }
 0x366   :  { %v11763_v10 = vadd.f32 %v8560_v60, %v4132_v23  ;;  %v8108_v0 = vadd.f32 %v8107_v59, %v8106_v18  ;;  %v8565_v30 = vpop.f32.mrf.mxu1  ;;  %8636 = vmatprep.subr.bf16.mxu1 %v12151_v55  ;;  %v9215_v60 = vld [vmem:[%s12109_s5 + $0x70] sm:$0xff]  }
 0x367   :  { %v8109_v16 = vpop.f32.mrf.mxu0  ;;  %8617 = vmatpush3.bf16.msra.mxu0 %v9215_v60 }
 0x368   :  { %v4135_v45 = vadd.f32 %v8108_v0, %v4070_v25  ;;  %v4221_v9 = vmax.f32 %v11612_v28, %v11763_v10  ;;  %v4207_v40 = vpop.f32.mrf.mxu1  ;;  %8618 = vmatprep.subr.bf16.mxu0 %v12151_v55  ;;  %v9219_v0 = vld [vmem:[%s12109_s5 + $0x60] sm:$0xff]  }
 0x369   :  { %v8110_v38 = vpop.f32.mrf.mxu0  ;;  %8637 = vmatpush3.bf16.msra.mxu1 %v9212_v50 }
 0x36a   :  { %v11767_v20 = vadd.f32 %v8561_v7, %v4135_v45  ;;  %v8111_v34 = vadd.f32 %v8110_v38, %v8109_v16  ;;  %8638 = vmatprep.subr.bf16.mxu1 %v12151_v55  ;;  %v9220_v16 = vld [vmem:[%s12109_s5 + $0x10] sm:$0xff]  }
 0x36b   :  { %v8112_v49 = vpop.f32.mrf.mxu0  ;;  %8619 = vmatpush3.bf16.msra.mxu0 %v9217_v2 }
 0x36c   :  { %v4140_v24 = vadd.f32 %v8111_v34, %v4075_v12  ;;  %v4222_v25 = vmax.f32 %v11629_v19, %v11767_v20  ;;  %8620 = vmatprep.subr.bf16.mxu0 %v12151_v55 }
 0x36d   :  { %v8113_v51 = vpop.f32.mrf.mxu0 }
 0x36e   :  { %v11777_v22 = vadd.f32 %v4204_v8, %v4140_v24  ;;  %v8114_v17 = vadd.f32 %v8113_v51, %v8112_v49  ;;  %v9222_v51 = vld [vmem:[%s12109_s5 + $0x8] sm:$0xff]  }
 0x36f   :  { %v8115_v5 = vpop.f32.mrf.mxu0  ;;  %8621 = vmatpush3.bf16.msra.mxu0 %v9219_v0 }
 0x370   :  { %v4143_v4 = vadd.f32 %v8114_v17, %v4078_v27  ;;  %v4223_v12 = vmax.f32 %v11660_v6, %v11777_v22  ;;  %v9214_v27 = vld [vmem:[%s12109_s5 + $0x28] sm:$0xff]   ;;  %8622 = vmatprep.subr.bf16.mxu0 %v12151_v55 }
 0x371   :  { %v8116_v32 = vpop.f32.mrf.mxu0  ;;  %8639 = vmatpush3.bf16.msra.mxu1 %v9214_v27  ;;  %v9224_v27 = vld [vmem:[%s12109_s5] sm:$0xff]  }
 0x372   :  { %v11789_v21 = vadd.f32 %v4207_v40, %v4143_v4  ;;  %v8117_v1 = vadd.f32 %v8116_v32, %v8115_v5  ;;  %8640 = vmatprep.subr.bf16.mxu1 %v12151_v55 }
 0x373   :  { %v8118_v58 = vpop.f32.mrf.mxu0 }
 0x374   :  { %v4148_v54 = vadd.f32 %v8117_v1, %v11746_v13  ;;  %v4224_v44 = vmax.f32 %v11787_v42, %v11789_v21  ;;  %v9216_v13 = vld [vmem:[%s12109_s5 + $0x20] sm:$0xff]  }
 0x375   :  { %v8119_v47 = vpop.f32.mrf.mxu0  ;;  %8641 = vmatpush3.bf16.msra.mxu1 %v9216_v13 }
 0x376   :  { %v11802_v11 = vadd.f32 %v8564_v48, %v4148_v54  ;;  %v8120_v39 = vadd.f32 %v8119_v47, %v8118_v58  ;;  %8642 = vmatprep.subr.bf16.mxu1 %v12151_v55 }
 0x377   :  { %v8149_v33 = vpop.f32.mrf.mxu0 }
 0x378   :  { %v4151_v63 = vadd.f32 %v8120_v39, %v11748_v14  ;;  %v4225_v35 = vmax.f32 %v11648_v56, %v11802_v11  ;;  %v9218_v14 = vld [vmem:[%s12109_s5 + $0x18] sm:$0xff]  }
 0x379   :  { %v8150_v41 = vpop.f32.mrf.mxu0  ;;  %8643 = vmatpush3.bf16.msra.mxu1 %v9218_v14 }
 0x37a   :  { %v11815_v43 = vadd.f32 %v8565_v30, %v4151_v63  ;;  %v8151_v7 = vadd.f32 %v8150_v41, %v8149_v33  ;;  %v8189_v57 = vpop.f32.mrf.mxu1  ;;  %8644 = vmatprep.subr.bf16.mxu1 %v12151_v55  ;;  %v9221_v30 = vld [vmem:[%s12109_s5 + $0x58] sm:$0xff]   ;;  %v9225_v63 = vld [vmem:[%s12109_s5 + $0x48] sm:$0xff]  }
 0x37b   :  { %v8152_v52 = vpop.f32.mrf.mxu0  ;;  %8623 = vmatpush3.bf16.msra.mxu0 %v9221_v30 }
 0x37c   :  { %v8190_v37 = vpop.f32.mrf.mxu1  ;;  %v4226_v36 = vmax.f32 %v11666_v31, %v11815_v43  ;;  %8624 = vmatprep.subr.bf16.mxu0 %v12151_v55 }
 0x37d   :  { %v8153_v18 = vpop.f32.mrf.mxu0  ;;  %v8191_v23 = vadd.f32 %v8190_v37, %v8189_v57  ;;  %8645 = vmatpush3.bf16.msra.mxu1 %v9220_v16 }
 0x37e   :  { %v8154_v48 = vadd.f32 %v8153_v18, %v8152_v52  ;;  %v8192_v59 = vpop.f32.mrf.mxu1  ;;  %8646 = vmatprep.subr.bf16.mxu1 %v12151_v55 }
 0x37f   :  { %v11833_v45 = vadd.f32 %v8191_v23, %v8151_v7  ;;  %v8155_v8 = vpop.f32.mrf.mxu0  ;;  %8625 = vmatpush3.bf16.msra.mxu0 %v9223_v15 }
 0x380   :  { %v8193_v38 = vpop.f32.mrf.mxu1  ;;  %8626 = vmatprep.subr.bf16.mxu0 %v12151_v55 }
 0x381   :  { %v8156_v34 = vpop.f32.mrf.mxu0  ;;  %v8194_v29 = vadd.f32 %v8193_v38, %v8192_v59  ;;  %8647 = vmatpush3.bf16.msra.mxu1 %v9222_v51 }
 0x382   :  { %v8157_v49 = vadd.f32 %v8156_v34, %v8155_v8  ;;  %v8195_v24 = vpop.f32.mrf.mxu1  ;;  %8648 = vmatprep.subr.bf16.mxu1 %v12151_v55 }
 0x383   :  { %v11843_v17 = vadd.f32 %v8194_v29, %v8154_v48  ;;  %v8158_v50 = vpop.f32.mrf.mxu0  ;;  %8627 = vmatpush3.bf16.msra.mxu0 %v9225_v63  ;;  %v9227_v48 = vld [vmem:[%s12109_s5 + $0x40] sm:$0xff]  }
 0x384   :  { %v8196_v5 = vpop.f32.mrf.mxu1  ;;  %8628 = vmatprep.subr.bf16.mxu0 %v12151_v55 }
 0x385   :  { %v8159_v4 = vpop.f32.mrf.mxu0  ;;  %v8197_v40 = vadd.f32 %v8196_v5, %v8195_v24  ;;  %8649 = vmatpush3.bf16.msra.mxu1 %v9224_v27 }
 0x386   :  { %v8160_v32 = vadd.f32 %v8159_v4, %v8158_v50  ;;  %v8198_v1 = vpop.f32.mrf.mxu1  ;;  %8674 = vmatprep.subr.bf16.mxu1 %v12151_v55 }
 0x387   :  { %v11853_v58 = vadd.f32 %v8197_v40, %v8157_v49  ;;  %v8161_v54 = vpop.f32.mrf.mxu0  ;;  %8629 = vmatpush3.bf16.msra.mxu0 %v9227_v48 }
 0x388   :  { %v8199_v47 = vpop.f32.mrf.mxu1  ;;  %8654 = vmatprep.subr.bf16.mxu0 %v12151_v55 }
 0x389   :  { %v8162_v39 = vpop.f32.mrf.mxu0  ;;  %v8200_v60 = vadd.f32 %v8199_v47, %v8198_v1 }
 0x38a   :  { %v8163_v13 = vadd.f32 %v8162_v39, %v8161_v54  ;;  %v8201_v33 = vpop.f32.mrf.mxu1 }
 0x38b   :  { %v4915_v41 = vadd.f32 %v8200_v60, %v8160_v32  ;;  %v8164_v7 = vpop.f32.mrf.mxu0 }
 0x38c   :  { %v8202_v57 = vpop.f32.mrf.mxu1 }
 0x38d   :  { %v8165_v2 = vpop.f32.mrf.mxu0  ;;  %v8203_v14 = vadd.f32 %v8202_v57, %v8201_v33 }
 0x38e   :  { %v8166_v52 = vadd.f32 %v8165_v2, %v8164_v7  ;;  %v8204_v37 = vpop.f32.mrf.mxu1 }
 0x38f   :  { %v4920_v18 = vadd.f32 %v8203_v14, %v8163_v13  ;;  %v8167_v23 = vpop.f32.mrf.mxu0 }
 0x390   :  { %v8205_v59 = vpop.f32.mrf.mxu1 }
 0x391   :  { %v8168_v0 = vpop.f32.mrf.mxu0  ;;  %v8206_v16 = vadd.f32 %v8205_v59, %v8204_v37 }
 0x392   :  { %v8169_v8 = vadd.f32 %v8168_v0, %v8167_v23  ;;  %v8207_v38 = vpop.f32.mrf.mxu1 }
 0x393   :  { %v4923_v34 = vadd.f32 %v8206_v16, %v8166_v52  ;;  %v8170_v29 = vpop.f32.mrf.mxu0 }
 0x394   :  { %v8208_v49 = vpop.f32.mrf.mxu1 }
 0x395   :  { %v8171_v24 = vpop.f32.mrf.mxu0  ;;  %v8209_v30 = vadd.f32 %v8208_v49, %v8207_v38 }
 0x396   :  { %v8172_v51 = vadd.f32 %v8171_v24, %v8170_v29  ;;  %v8210_v50 = vpop.f32.mrf.mxu1 }
 0x397   :  { %v4928_v5 = vadd.f32 %v8209_v30, %v8169_v8  ;;  %v8229_v4 = vpop.f32.mrf.mxu0 }
 0x398   :  { %v8211_v40 = vpop.f32.mrf.mxu1 }
 0x399   :  { %v8212_v32 = vadd.f32 %v8211_v40, %v8210_v50  ;;  %v8230_v1 = vpop.f32.mrf.mxu0 }
 0x39a   :  { %v8231_v15 = vadd.f32 %v8230_v1, %v8229_v4  ;;  %v8269_v27 = vpop.f32.mrf.mxu1 }
 0x39b   :  { %v4931_v54 = vadd.f32 %v8212_v32, %v8172_v51  ;;  %v8232_v47 = vpop.f32.mrf.mxu0 }
 0x39c   :  { %v4969_v39 = vadd.f32 %v8231_v15, %v11833_v45  ;;  %v8270_v60 = vpop.f32.mrf.mxu1 }
 0x39d   :  { %v8233_v13 = vpop.f32.mrf.mxu0  ;;  %v8271_v33 = vadd.f32 %v8270_v60, %v8269_v27 }
 0x39e   :  { %v8234_v63 = vadd.f32 %v8233_v13, %v8232_v47  ;;  %v8272_v7 = vpop.f32.mrf.mxu1 }
 0x39f   :  { %v8235_v57 = vpop.f32.mrf.mxu0  ;;  %v5034_v2 = vadd.f32 %v8271_v33, %v4969_v39 }
 0x3a0   :  { %v4972_v14 = vadd.f32 %v8234_v63, %v11843_v17  ;;  %v8273_v52 = vpop.f32.mrf.mxu1 }
 0x3a1   :  { %v8236_v37 = vpop.f32.mrf.mxu0  ;;  %v8274_v23 = vadd.f32 %v8273_v52, %v8272_v7 }
 0x3a2   :  { %v8237_v48 = vadd.f32 %v8236_v37, %v8235_v57  ;;  %v8275_v59 = vpop.f32.mrf.mxu1 }
 0x3a3   :  { %v8238_v0 = vpop.f32.mrf.mxu0  ;;  %v5037_v16 = vadd.f32 %v8274_v23, %v4972_v14 }
 0x3a4   :  { %v4977_v8 = vadd.f32 %v8237_v48, %v11853_v58  ;;  %v8276_v38 = vpop.f32.mrf.mxu1 }
 0x3a5   :  { %v8239_v45 = vpop.f32.mrf.mxu0  ;;  %v8277_v29 = vadd.f32 %v8276_v38, %v8275_v59 }
 0x3a6   :  { %v8240_v49 = vadd.f32 %v8239_v45, %v8238_v0  ;;  %v8278_v24 = vpop.f32.mrf.mxu1 }
 0x3a7   :  { %v8241_v30 = vpop.f32.mrf.mxu0  ;;  %v5042_v51 = vadd.f32 %v8277_v29, %v4977_v8 }
 0x3a8   :  { %v4980_v50 = vadd.f32 %v8240_v49, %v4915_v41  ;;  %v8279_v4 = vpop.f32.mrf.mxu1 }
 0x3a9   :  { %v8242_v40 = vpop.f32.mrf.mxu0  ;;  %v8280_v17 = vadd.f32 %v8279_v4, %v8278_v24 }
 0x3aa   :  { %v8243_v32 = vadd.f32 %v8242_v40, %v8241_v30  ;;  %v8281_v1 = vpop.f32.mrf.mxu1 }
 0x3ab   :  { %v8244_v15 = vpop.f32.mrf.mxu0  ;;  %v5045_v27 = vadd.f32 %v8280_v17, %v4980_v50 }
 0x3ac   :  { %v4985_v47 = vadd.f32 %v8243_v32, %v4920_v18  ;;  %v8282_v39 = vpop.f32.mrf.mxu1 }
 0x3ad   :  { %v8245_v60 = vpop.f32.mrf.mxu0  ;;  %v8283_v13 = vadd.f32 %v8282_v39, %v8281_v1 }
 0x3ae   :  { %v8246_v58 = vadd.f32 %v8245_v60, %v8244_v15  ;;  %v8284_v33 = vpop.f32.mrf.mxu1 }
 0x3af   :  { %v8247_v63 = vpop.f32.mrf.mxu0  ;;  %v5050_v7 = vadd.f32 %v8283_v13, %v4985_v47 }
 0x3b0   :  { %v4988_v57 = vadd.f32 %v8246_v58, %v4923_v34  ;;  %v8285_v14 = vpop.f32.mrf.mxu1 }
 0x3b1   :  { %v8248_v52 = vpop.f32.mrf.mxu0  ;;  %v8286_v37 = vadd.f32 %v8285_v14, %v8284_v33 }
 0x3b2   :  { %v8249_v41 = vadd.f32 %v8248_v52, %v8247_v63  ;;  %v8287_v23 = vpop.f32.mrf.mxu1 }
 0x3b3   :  { %v8250_v48 = vpop.f32.mrf.mxu0  ;;  %v5053_v59 = vadd.f32 %v8286_v37, %v4988_v57 }
 0x3b4   :  { %v4993_v0 = vadd.f32 %v8249_v41, %v4928_v5  ;;  %v8288_v8 = vpop.f32.mrf.mxu1 }
 0x3b5   :  { %v8251_v38 = vpop.f32.mrf.mxu0  ;;  %v8289_v45 = vadd.f32 %v8288_v8, %v8287_v23 }
 0x3b6   :  { %v8252_v18 = vadd.f32 %v8251_v38, %v8250_v48  ;;  %v8290_v29 = vpop.f32.mrf.mxu1 }
 0x3b7   :  { %v8584_v49 = vpop.f32.mrf.mxu0  ;;  %v5058_v24 = vadd.f32 %v8289_v45, %v4993_v0 }
 0x3b8   :  { %v4996_v30 = vadd.f32 %v8252_v18, %v4931_v54  ;;  %v5107_v50 = vadd.f32 %v8584_v49, %v5042_v51  ;;  %v8291_v4 = vpop.f32.mrf.mxu1 }
 0x3b9   :  { %v8292_v40 = vadd.f32 %v8291_v4, %v8290_v29  ;;  %v5098_v34 = vpop.f32.mrf.mxu0 }
 0x3ba   :  { %v11875_v17 = vmax.f32 %v4221_v9, %v5107_v50  ;;  %v5099_v32 = vadd.f32 %v5098_v34, %v5034_v2  ;;  %v11877_v1 = vpop.f32.mrf.mxu1 }
 0x3bb   :  { %v8585_v5 = vpop.f32.mrf.mxu0  ;;  %v5061_v15 = vadd.f32 %v8292_v40, %v4996_v30 }
 0x3bc   :  { %v11882_v47 = vmax.f32 %v4219_v3, %v5099_v32  ;;  %v5110_v54 = vadd.f32 %v8585_v5, %v5045_v27  ;;  %v11884_v51 = vpop.f32.mrf.mxu1 }
 0x3bd   :  { %v5101_v39 = vpop.f32.mrf.mxu0 }
 0x3be   :  { %v11889_v28 = vmax.f32 %v4222_v25, %v5110_v54  ;;  %v5102_v10 = vadd.f32 %v5101_v39, %v5037_v16  ;;  %v11891_v9 = vpop.f32.mrf.mxu1 }
 0x3bf   :  { %v8588_v2 = vpop.f32.mrf.mxu0 }
 0x3c0   :  { %v11896_v60 = vmax.f32 %v4220_v46, %v5102_v10  ;;  %v5123_v61 = vadd.f32 %v8588_v2, %v5058_v24  ;;  %v11898_v62 = vpop.f32.mrf.mxu1 }
 0x3c1   :  { %v5114_v3 = vpop.f32.mrf.mxu0 }
 0x3c2   :  { %v11903_v27 = vmax.f32 %v4225_v35, %v5123_v61  ;;  %v5115_v19 = vadd.f32 %v5114_v3, %v5050_v7  ;;  %v11905_v20 = vpop.f32.mrf.mxu1 }
 0x3c3   :  { %v8589_v25 = vpop.f32.mrf.mxu0 }
 0x3c4   :  { %12291 = vst [vmem:[#allocation4_spill] sm:$0xff] %v11903_v27  ;;  %v11910_v16 = vmax.f32 %v4223_v12, %v5115_v19  ;;  %v5126_v53 = vadd.f32 %v8589_v25, %v5061_v15  ;;  %v11912_v26 = vpop.f32.mrf.mxu1  ;;  %v8323_v25 = vadd.f32 %v11884_v51, %v11877_v1 }
 0x3c5   :  { %v5117_v46 = vpop.f32.mrf.mxu0 }
 0x3c6   :  { %v11917_v13 = vmax.f32 %v4226_v36, %v5126_v53  ;;  %v5118_v56 = vadd.f32 %v5117_v46, %v5053_v59  ;;  %v11919_v11 = vpop.f32.mrf.mxu1 }
 0x3c8   :  { %12292 = vst [vmem:[#allocation5_spill] sm:$0xff] %v11917_v13  ;;  %v11924_v35 = vmax.f32 %v4224_v44, %v5118_v56  ;;  %v11926_v6 = vpop.f32.mrf.mxu1 }
 0x3ca   :  { %12293 = vst [vmem:[#allocation6_spill] sm:$0xff] %v11924_v35  ;;  %v8333_v22 = vpop.f32.mrf.mxu1 }
 0x3cc   :  { %v8334_v12 = vpop.f32.mrf.mxu1 }
 0x3cd   :  { %v11928_v58 = vadd.f32 %v8334_v12, %v8333_v22 }
 0x3ce   :  { %v8336_v33 = vpop.f32.mrf.mxu1 }
 0x3d0   :  { %v8337_v63 = vpop.f32.mrf.mxu1 }
 0x3d1   :  { %v11930_v7 = vadd.f32 %v8337_v63, %v8336_v33 }
 0x3d2   :  { %v8339_v31 = vpop.f32.mrf.mxu1 }
 0x3d4   :  { %v8340_v43 = vpop.f32.mrf.mxu1 }
 0x3d5   :  { %v11932_v36 = vadd.f32 %v8340_v43, %v8339_v31  ;;  %v8326_v31 = vadd.f32 %v11898_v62, %v11891_v9 }
 0x3d6   :  { %v8342_v57 = vpop.f32.mrf.mxu1 }
 0x3d7   :  { %v8361_v14 = vpop.f32.mrf.mxu0 }
 0x3d8   :  { %v8343_v52 = vpop.f32.mrf.mxu1 }
 0x3d9   :  { %v11934_v42 = vadd.f32 %v8343_v52, %v8342_v57  ;;  %v8362_v21 = vpop.f32.mrf.mxu0 }
 0x3da   :  { %v8401_v44 = vpop.f32.mrf.mxu1  ;;  %v8363_v61 = vadd.f32 %v8362_v21, %v8361_v14 }
 0x3db   :  { %v8364_v37 = vpop.f32.mrf.mxu0 }
 0x3dc   :  { %v8402_v41 = vpop.f32.mrf.mxu1  ;;  %v5814_v22 = vadd.f32 %v8363_v61, %v8323_v25 }
 0x3dd   :  { %v8365_v23 = vpop.f32.mrf.mxu0  ;;  %v8403_v53 = vadd.f32 %v8402_v41, %v8401_v44  ;;  %v8329_v44 = vadd.f32 %v11912_v26, %v11905_v20  ;;  %v11972_v20 = vld [vmem:[%s12110_s4] ss:$0 sm:$0xff] }
 0x3de   :  { %v8404_v48 = vpop.f32.mrf.mxu1  ;;  %v8366_v12 = vadd.f32 %v8365_v23, %v8364_v37 }
 0x3df   :  { %v8367_v59 = vpop.f32.mrf.mxu0  ;;  %v5879_v43 = vadd.f32 %v8403_v53, %v5814_v22 }
 0x3e0   :  { %v8405_v0 = vpop.f32.mrf.mxu1  ;;  %v5817_v55 = vadd.f32 %v8366_v12, %v8326_v31 }
 0x3e1   :  { %v8368_v8 = vpop.f32.mrf.mxu0  ;;  %v8406_v57 = vadd.f32 %v8405_v0, %v8404_v48 }
 0x3e2   :  { %v8407_v38 = vpop.f32.mrf.mxu1  ;;  %v8369_v13 = vadd.f32 %v8368_v8, %v8367_v59  ;;  %v8332_v59 = vadd.f32 %v11926_v6, %v11919_v11 }
 0x3e3   :  { %v8370_v45 = vpop.f32.mrf.mxu0  ;;  %v5882_v37 = vadd.f32 %v8406_v57, %v5817_v55 }
 0x3e4   :  { %v8408_v18 = vpop.f32.mrf.mxu1  ;;  %v5822_v62 = vadd.f32 %v8369_v13, %v8329_v44 }
 0x3e5   :  { %v8371_v29 = vpop.f32.mrf.mxu0  ;;  %v8409_v23 = vadd.f32 %v8408_v18, %v8407_v38 }
 0x3e6   :  { %v8410_v49 = vpop.f32.mrf.mxu1  ;;  %v8372_v35 = vadd.f32 %v8371_v29, %v8370_v45 }
 0x3e7   :  { %v8373_v24 = vpop.f32.mrf.mxu0  ;;  %v5887_v26 = vadd.f32 %v8409_v23, %v5822_v62 }
 0x3e8   :  { %v8411_v30 = vpop.f32.mrf.mxu1  ;;  %v5825_v45 = vadd.f32 %v8372_v35, %v8332_v59 }
 0x3e9   :  { %v8374_v50 = vpop.f32.mrf.mxu0  ;;  %v8412_v8 = vadd.f32 %v8411_v30, %v8410_v49 }
 0x3ea   :  { %v8413_v4 = vpop.f32.mrf.mxu1  ;;  %v8375_v29 = vadd.f32 %v8374_v50, %v8373_v24 }
 0x3eb   :  { %v11936_v40 = vpop.f32.mrf.mxu0  ;;  %v5890_v12 = vadd.f32 %v8412_v8, %v5825_v45  ;;  %v12295_v45 = vld [vmem:[#allocation6_spill] sm:$0xff] }
 0x3ec   :  { %v8414_v34 = vpop.f32.mrf.mxu1 }
 0x3ed   :  { %v11938_v32 = vpop.f32.mrf.mxu0  ;;  %v8415_v49 = vadd.f32 %v8414_v34, %v8413_v4  ;;  %v9226_v34 = vld [vmem:[%s12109_s5 + $0xf8] sm:$0xff]  }
 0x3ee   :  { %v11940_v5 = vpop.f32.mrf.mxu1  ;;  %v8378_v35 = vadd.f32 %v11938_v32, %v11936_v40 }
 0x3ef   :  { %v11942_v15 = vpop.f32.mrf.mxu0 }
 0x3f0   :  { %v11944_v54 = vpop.f32.mrf.mxu1  ;;  %v5833_v40 = vadd.f32 %v8378_v35, %v11930_v7 }
 0x3f1   :  { %v11946_v39 = vpop.f32.mrf.mxu0 }
 0x3f2   :  { %v11948_v10 = vpop.f32.mrf.mxu1 }
 0x3f3   :  { %v11950_v2 = vpop.f32.mrf.mxu0 }
 0x3f4   :  { %v11952_v3 = vpop.f32.mrf.mxu1 }
 0x3f5   :  { %v11954_v19 = vpop.f32.mrf.mxu0  ;;  %v8421_v7 = vadd.f32 %v11952_v3, %v11948_v10 }
 0x3f6   :  { %v11958_v46 = vpop.f32.mrf.mxu1  ;;  %v8384_v62 = vadd.f32 %v11954_v19, %v11950_v2 }
 0x3f7   :  { %v8441_v56 = vpop.f32.mrf.mxu0 }
 0x3f8   :  { %v11960_v33 = vpop.f32.mrf.mxu1 }
 0x3f9   :  { %v8442_v63 = vpop.f32.mrf.mxu0  ;;  %v8424_v10 = vadd.f32 %v11960_v33, %v11958_v46 }
 0x3fa   :  { %v8443_v14 = vadd.f32 %v8442_v63, %v8441_v56  ;;  %v8608_v52 = vpop.f32.mrf.mxu1 }
 0x3fb   :  { %v8444_v21 = vpop.f32.mrf.mxu0 }
 0x3fc   :  { %v5944_v1 = vadd.f32 %v8443_v14, %v5879_v43  ;;  %v6008_v51 = vpop.f32.mrf.mxu1  ;;  %v5830_v43 = vadd.f32 %v8375_v29, %v11928_v58 }
 0x3fd   :  { %v8445_v41 = vpop.f32.mrf.mxu0 }
 0x3fe   :  { %v8446_v61 = vadd.f32 %v8445_v41, %v8444_v21  ;;  %v6009_v25 = vadd.f32 %v6008_v51, %v5944_v1  ;;  %v8609_v27 = vpop.f32.mrf.mxu1  ;;  %v8418_v21 = vadd.f32 %v11944_v54, %v11940_v5 }
 0x3ff   :  { %v8447_v9 = vpop.f32.mrf.mxu0 }
 0x400   :  { %v6039_v48 = vmax.f32 %v11882_v47, %v6009_v25  ;;  %v5947_v0 = vadd.f32 %v8446_v61, %v5882_v37  ;;  %v6011_v53 = vpop.f32.mrf.mxu1  ;;  %v5898_v37 = vadd.f32 %v8418_v21, %v5833_v40  ;;  %v12294_v25 = vmov 0.0  }
 0x401   :  { %v8448_v55 = vpop.f32.mrf.mxu0 }
 0x402   :  { %v8449_v38 = vadd.f32 %v8448_v55, %v8447_v9  ;;  %v6012_v18 = vadd.f32 %v6011_v53, %v5947_v0  ;;  %v6054_v47 = vadd.f32 %v11972_v20, %v6039_v48  ;;  %v11976_v11 = vpop.f32.mrf.mxu1 }
 0x403   :  { %v8450_v13 = vpop.f32.mrf.mxu0 }
 0x404   :  { %v5952_v56 = vadd.f32 %v8449_v38, %v5887_v26  ;;  %v6040_v22 = vmax.f32 %v11896_v60, %v6012_v18  ;;  %v6062_v50 = vmax.f32 %v6054_v47, 0.0  ;;  %v6024_v1 = vpop.f32.mrf.mxu1  ;;  %v9229_v26 = vld [vmem:[%s12109_s5 + $0xb8] sm:$0xff]  }
 0x405   :  { %v8451_v6 = vpop.f32.mrf.mxu0 }
 0x406   :  { %v6017_v30 = vadd.f32 %v8608_v52, %v5952_v56  ;;  %v6055_v63 = vadd.f32 %v11972_v20, %v6040_v22  ;;  %v8452_v31 = vadd.f32 %v8451_v6, %v8450_v13  ;;  %v5895_v52 = vadd.f32 %v8415_v49, %v5830_v43  ;;  %v8613_v23 = vpop.f32.mrf.mxu1  ;;  %v9231_v22 = vld [vmem:[%s12109_s5 + $0xb0] sm:$0xff]  }
 0x407   :  { %v8453_v24 = vpop.f32.mrf.mxu0 }
 0x408   :  { %v6041_v57 = vmax.f32 %v11875_v17, %v6017_v30  ;;  %v6063_v14 = vmax.f32 %v6055_v63, 0.0  ;;  %v5955_v60 = vadd.f32 %v8452_v31, %v5890_v12  ;;  %v8381_v17 = vadd.f32 %v11946_v39, %v11942_v15  ;;  %v6027_v3 = vpop.f32.mrf.mxu1  ;;  %v9232_v12 = vld [vmem:[%s12109_s5 + $0xe0] sm:$0xff]  }
 0x409   :  { %v8454_v4 = vpop.f32.mrf.mxu0  ;;  %v12296_v31 = vld [vmem:[#allocation4_spill] sm:$0xff] }
 0x40a   :  { %v6070_v58 = vpack.c.bf16 %v6063_v14, %v6062_v50  ;;  %v6020_v51 = vadd.f32 %v8609_v27, %v5955_v60  ;;  %v8455_v44 = vadd.f32 %v8454_v4, %v8453_v24  ;;  %v6056_v41 = vadd.f32 %v11972_v20, %v6041_v57  ;;  %v9228_v27 = vld [vmem:[%s12109_s5 + $0xf0] sm:$0xff]   ;;  %v9233_v24 = vld [vmem:[%s12109_s5 + $0xa8] sm:$0xff]  }
 0x40b   :  { %v8456_v32 = vpop.f32.mrf.mxu0  ;;  %v5838_v9 = vadd.f32 %v8381_v17, %v11932_v36  ;;  %v9230_v36 = vld [vmem:[%s12109_s5 + $0xe8] sm:$0xff]   ;;  %v9236_v4 = vld [vmem:[%s12109_s5 + $0xd0] sm:$0xff]   ;;  %v9240_v17 = vld [vmem:[%s12109_s5 + $0xc0] sm:$0xff]  }
 0x40c   :  { %v6042_v5 = vmax.f32 %v11889_v28, %v6020_v51  ;;  %v5960_v54 = vadd.f32 %v8455_v44, %v5895_v52  ;;  %8651 = vmatmul.mubr.bf16.vlgmr.msra.gmra.mxu1 %v6070_v58  ;;  %v6064_v0 = vmax.f32 %v6056_v41, 0.0  ;;  %v12297_v60 = vld [vmem:[#allocation5_spill] sm:$0xff]  ;;  %v9237_v51 = vld [vmem:[%s12109_s5 + $0x98] sm:$0xff]   ;;  %v9242_v41 = vld [vmem:[%s12109_s5 + $0x80] sm:$0xff]  }
 0x40d   :  { %8675 = vmatpush3.bf16.msra.mxu1 %v9226_v34  ;;  %v8457_v61 = vpop.f32.mrf.mxu0  ;;  %8690 = vmatprep.mubr.msk.bf16.mxu1 %vm9291_vm8, %v12294_v25  ;;  %v5903_v2 = vadd.f32 %v8421_v7, %v5838_v9  ;;  %v9238_v44 = vld [vmem:[%s12109_s5 + $0xc8] sm:$0xff]  }
 0x40e   :  { %v6057_v15 = vadd.f32 %v11972_v20, %v6042_v5  ;;  %v6025_v39 = vadd.f32 %v6024_v1, %v5960_v54  ;;  %v8458_v28 = vadd.f32 %v8457_v61, %v8456_v32  ;;  %8676 = vmatprep.subr.bf16.mxu1 %v12294_v25  ;;  %v9235_v1 = vld [vmem:[%s12109_s5 + $0xa0] sm:$0xff]   ;;  %v9241_v32 = vld [vmem:[%s12109_s5 + $0x88] sm:$0xff]   ;;  %v9243_v5 = vld [vmem:[%s12111_s7 + $0x18] sm:$0xff]  }
 0x40f   :  { %v8459_v48 = vpop.f32.mrf.mxu0  ;;  %v9244_v54 = vld [vmem:[%s12111_s7 + $0x10] sm:$0xff]  }
 0x410   :  { %v6065_v53 = vmax.f32 %v6057_v15, 0.0  ;;  %v6043_v59 = vmax.f32 %v11910_v16, %v6025_v39  ;;  %v5963_v8 = vadd.f32 %v8458_v28, %v5898_v37  ;;  %v5841_v16 = vadd.f32 %v8384_v62, %v11934_v42  ;;  %v9245_v37 = vld [vmem:[%s12111_s7 + $0x8] sm:$0xff]  }
 0x411   :  { %8677 = vmatpush3.bf16.msra.mxu1 %v9228_v27  ;;  %v8460_v55 = vpop.f32.mrf.mxu0 }
 0x412   :  { %v6087_v19 = vpack.c.bf16 %v6065_v53, %v6064_v0  ;;  %v6028_v38 = vadd.f32 %v6027_v3, %v5963_v8  ;;  %v8461_v18 = vadd.f32 %v8460_v55, %v8459_v48  ;;  %8678 = vmatprep.subr.bf16.mxu1 %v12294_v25  ;;  %v6058_v33 = vadd.f32 %v11972_v20, %v6043_v59 }
 0x413   :  { %v8462_v46 = vpop.f32.mrf.mxu0  ;;  %v5906_v47 = vadd.f32 %v8424_v10, %v5841_v16 }
 0x414   :  { %v6044_v29 = vmax.f32 %v12295_v45, %v6028_v38  ;;  %v5968_v13 = vadd.f32 %v8461_v18, %v5903_v2  ;;  %8631 = vmatmul.mubr.bf16.vlgmr.msra.gmra.mxu0 %v6087_v19  ;;  %v6066_v30 = vmax.f32 %v6058_v33, 0.0 }
 0x415   :  { %8655 = vmatpush3.bf16.msra.mxu0 %v9229_v26  ;;  %8679 = vmatpush3.bf16.msra.mxu1 %v9230_v36  ;;  %v8463_v56 = vpop.f32.mrf.mxu0  ;;  %v7734_v36 = vld [vmem:[%s12112_s6] ss:$0 sm:$0xff] }
 0x416   :  { %v6059_v42 = vadd.f32 %v11972_v20, %v6044_v29  ;;  %v6033_v6 = vadd.f32 %v11976_v11, %v5968_v13  ;;  %v8464_v49 = vadd.f32 %v8463_v56, %v8462_v46  ;;  %8656 = vmatprep.subr.bf16.mxu0 %v12294_v25  ;;  %8680 = vmatprep.subr.bf16.mxu1 %v12294_v25  ;;  %v9234_v11 = vld [vmem:[%s12109_s5 + $0xd8] sm:$0xff]   ;;  %v7735_v13 = vld [vmem:[%s12113_s8] ss:$0 sm:$0xff] }
 0x417   :  { %8670 = vmatprep.mubr.msk.bf16.mxu0 %vm9291_vm8, %v12294_v25 }
 0x418   :  { %v6067_v63 = vmax.f32 %v6059_v42, 0.0  ;;  %v6045_v43 = vmax.f32 %v12296_v31, %v6033_v6  ;;  %v5971_v35 = vadd.f32 %v8464_v49, %v5906_v47 }
 0x419   :  { %8657 = vmatpush3.bf16.msra.mxu0 %v9231_v22  ;;  %8681 = vmatpush3.bf16.msra.mxu1 %v9232_v12 }
 0x41a   :  { %v6283_v50 = vpack.c.bf16 %v6067_v63, %v6066_v30  ;;  %v6036_v57 = vadd.f32 %v8613_v23, %v5971_v35  ;;  %8658 = vmatprep.subr.bf16.mxu0 %v12294_v25  ;;  %8682 = vmatprep.subr.bf16.mxu1 %v12294_v25  ;;  %v6060_v14 = vadd.f32 %v11972_v20, %v6045_v43  ;;  %v9246_v23 = vld [vmem:[%s12111_s7] sm:$0xff]  }
 0x41c   :  { %v6046_v21 = vmax.f32 %v12297_v60, %v6036_v57  ;;  %v6068_v52 = vmax.f32 %v6060_v14, 0.0 }
 0x41d   :  { %8659 = vmatpush3.bf16.msra.mxu0 %v9233_v24  ;;  %8683 = vmatpush3.bf16.msra.mxu1 %v9234_v11 }
 0x41e   :  { %v6061_v34 = vadd.f32 %v11972_v20, %v6046_v21  ;;  %8660 = vmatprep.subr.bf16.mxu0 %v12294_v25  ;;  %8684 = vmatprep.subr.bf16.mxu1 %v12294_v25  ;;  %v9239_v20 = vld [vmem:[%s12109_s5 + $0x90] sm:$0xff]  }
 0x420   :  { %v6069_v58 = vmax.f32 %v6061_v34, 0.0 }
 0x421   :  { %8661 = vmatpush3.bf16.msra.mxu0 %v9235_v1  ;;  %8685 = vmatpush3.bf16.msra.mxu1 %v9236_v4 }
 0x422   :  { %v6392_v40 = vpack.c.bf16 %v6069_v58, %v6068_v52  ;;  %8662 = vmatprep.subr.bf16.mxu0 %v12294_v25  ;;  %8686 = vmatprep.subr.bf16.mxu1 %v12294_v25 }
 0x425   :  { %8663 = vmatpush3.bf16.msra.mxu0 %v9237_v51  ;;  %8687 = vmatpush3.bf16.msra.mxu1 %v9238_v44 }
 0x426   :  { %8664 = vmatprep.subr.bf16.mxu0 %v12294_v25  ;;  %8688 = vmatprep.subr.bf16.mxu1 %v12294_v25 }
 0x429   :  { %8665 = vmatpush3.bf16.msra.mxu0 %v9239_v20  ;;  %8689 = vmatpush3.bf16.msra.mxu1 %v9240_v17 }
 0x42a   :  { %8666 = vmatprep.subr.bf16.mxu0 %v12294_v25 }
 0x42c   :  { %8691 = vmatmul.mubr.bf16.vlgmr.msra.gmra.mxu1 %v6392_v40 }
 0x42d   :  { %8667 = vmatpush3.bf16.msra.mxu0 %v9241_v32 }
 0x42e   :  { %8668 = vmatprep.subr.bf16.mxu0 %v12294_v25 }
 0x431   :  { %8669 = vmatpush3.bf16.msra.mxu0 %v9242_v41 }
 0x432   :  { %8694 = vmatprep.subr.bf16.mxu0 %v12294_v25 }
 0x434   :  { %8671 = vmatmul.mubr.bf16.vlgmr.msra.gmra.mxu0 %v6283_v50 }
 0x435   :  { %8702 = vmatprep.mubr.msk.bf16.mxu0 %vm9291_vm8, %v12294_v25  ;;  %8695 = vmatpush3.bf16.msra.mxu0 %v9243_v5 }
 0x436   :  { %8696 = vmatprep.subr.bf16.mxu0 %v12294_v25 }
 0x439   :  { %8697 = vmatpush3.bf16.msra.mxu0 %v9244_v54 }
 0x43a   :  { %8698 = vmatprep.subr.bf16.mxu0 %v12294_v25 }
 0x43d   :  { %8699 = vmatpush3.bf16.msra.mxu0 %v9245_v37 }
 0x43e   :  { %8700 = vmatprep.subr.bf16.mxu0 %v12294_v25 }
 0x441   :  { %8701 = vmatpush3.bf16.msra.mxu0 %v9246_v23 }
 0x4cc   :  { %v6276_v61 = vpop.f32.mrf.mxu1 }
 0x4ce   :  { %v8652_v27 = vpop.f32.mrf.mxu1 }
 0x4d0   :  { %v6279_v7 = vpop.f32.mrf.mxu1 }
 0x4d2   :  { %v8653_v15 = vpop.f32.mrf.mxu1 }
 0x4d4   :  { %v6187_v39 = vpop.f32.mrf.mxu0 }
 0x4d5   :  { %v6277_v8 = vadd.f32 %v6276_v61, %v6187_v39 }
 0x4d6   :  { %v8632_v28 = vpop.f32.mrf.mxu0 }
 0x4d8   :  { %v6190_v9 = vpop.f32.mrf.mxu0 }
 0x4d9   :  { %v6280_v55 = vadd.f32 %v6279_v7, %v6190_v9 }
 0x4da   :  { %v8633_v62 = vpop.f32.mrf.mxu0 }
 0x4ec   :  { %v6492_v48 = vpop.f32.mrf.mxu1 }
 0x4ee   :  { %v8692_v0 = vpop.f32.mrf.mxu1 }
 0x4f0   :  { %v6495_v53 = vpop.f32.mrf.mxu1 }
 0x4f2   :  { %v8693_v59 = vpop.f32.mrf.mxu1 }
 0x4f4   :  { %v6383_v10 = vpop.f32.mrf.mxu0 }
 0x4f5   :  { %v6390_v25 = vadd.f32 %v6383_v10, %v6277_v8 }
 0x4f6   :  { %v8672_v3 = vpop.f32.mrf.mxu0 }
 0x4f7   :  { %v6499_v26 = vadd.f32 %v6492_v48, %v6390_v25 }
 0x4f8   :  { %v6386_v2 = vpop.f32.mrf.mxu0 }
 0x4f9   :  { %v6391_v19 = vadd.f32 %v6386_v2, %v6280_v55  ;;  %v6508_v18 = vadd.f32 %v7734_v36, %v6499_v26 }
 0x4fa   :  { %v8673_v38 = vpop.f32.mrf.mxu0 }
 0x4fb   :  { %v6500_v16 = vadd.f32 %v6495_v53, %v6391_v19  ;;  %v6510_v33 = vmax.f32 %v6508_v18, 0.0 }
 0x4fd   :  { %v6509_v46 = vadd.f32 %v7734_v36, %v6500_v16 }
 0x4ff   :  { %v6511_v45 = vmax.f32 %v6509_v46, 0.0 }
 0x501   :  { %v6512_v29 = vpack.c.bf16 %v6511_v45, %v6510_v33 }
 0x503   :  { %8703 = vmatmul.mubr.msk.bf16.vlgmr.msra.gmra.mxu0 %vm1599_vm3, %v6512_v29 }
 0x5c3   :  { %v6589_v47 = vpop.f32.mrf.mxu0 }
 0x5c4   :  { %v6590_v56 = vadd.f32 %v7735_v13, %v6589_v47 }
 0x5c5   :  { %v8704_v22 = vpop.f32.mrf.mxu0 }
 0x5c6   :  { %6596 = vmax.xlane.f32.xlu0 %v6590_v56 }
 0x5c7   :  { %v6592_v12 = vpop.f32.mrf.mxu0 }
 0x5c8   :  { %v6593_v42 = vadd.f32 %v7735_v13, %v6592_v12 }
 0x5c9   :  { %v8705_v6 = vpop.f32.mrf.mxu0 }
 0x5ca   :  { %6598 = vmax.xlane.f32.xlu1 %v6593_v42 }
 0x64f   :  { %v6597_v49 = vpop.xlane.xlu0 %6596 }
 0x650   :  { %v6600_v30 = vsub.f32 %v6590_v56, %v6597_v49 }
 0x652   :  { %v6602_v63 = vmul.f32 1.442695, %v6600_v30 }
 0x653   :  { %v6599_v31 = vpop.xlane.xlu1 %6598 }
 0x654   :  { %9247 = vpow2.f32 %v6602_v63  ;;  %v6601_v43 = vsub.f32 %v6593_v42, %v6599_v31 }
 0x656   :  { %v6604_v35 = vmul.f32 1.442695, %v6601_v43 }
 0x658   :  { %9249 = vpow2.f32 %v6604_v35 }
 0x661   :  { %v9248_v24 = vpop.eup %9247 }
 0x662   :  { %6606 = vadd.xlane.f32.xlu0 %v9248_v24 }
 0x665   :  { %v9250_v11 = vpop.eup %9249 }
 0x666   :  { %6608 = vadd.xlane.f32.xlu0 %v9250_v11 }
 0x6eb   :  { %v6607_v50 = vpop.xlane.xlu0 %6606 }
 0x6ec   :  { %9251 = vlog2.f32 %v6607_v50 }
 0x6ef   :  { %v6609_v57 = vpop.xlane.xlu0 %6608 }
 0x6f0   :  { %9253 = vlog2.f32 %v6609_v57 }
 0x6f9   :  { %v9252_v14 = vpop.eup %9251 }
 0x6fa   :  { %v6611_v60 = vmul.f32 0.6931472, %v9252_v14 }
 0x6fc   :  { %v6614_v21 = vsub.f32 %v6600_v30, %v6611_v60 }
 0x6fd   :  { %v9254_v1 = vpop.eup %9253 }
 0x6fe   :  { %6616 = vst [vmem:[%s12114_s9] sm:$0xff] %v6614_v21  ;;  %v6613_v4 = vmul.f32 0.6931472, %v9254_v1 }
 0x700   :  { %v6615_v34 = vsub.f32 %v6601_v43, %v6613_v4 }
 0x702   :  { %6617 = vst [vmem:[%s12114_s9 + $0x8] sm:$0xff] %v6615_v34 }

</bundles_post_ra>
